<compile_context>
chip_gen: v5e
topology: v5e:2x2
jax: 0.10.0
libtpu: 0.0.40
codegen_flags: <defaults>
</compile_context>

<pallas_src>
import functools
import numpy as np

import jax
import jax.numpy as jnp
from jax.experimental import pallas as pl
from jax.experimental.pallas import tpu as pltpu

# ----------------------- small config -----------------------
B = 2
SRC_LEN = 16
TGT_LEN = 9            # forward slices to TGT_LEN - 1 = 8
LEN_MAX_SEQ = 16
D_MODEL = 64           # stands in for 768
D_INNER = 128          # stands in for 3072
N_LAYERS = 2           # stands in for 12
N_HEAD = 4             # stands in for 12
D_K = 16               # stands in for 64
D_V = 16
N_SRC_VOCAB = 96
N_TGT_VOCAB = 96
N_TYPE_VOCAB = 2
VOCAB_PAD = 128        # lane-dense (>=128) padded projection width

SQRT1_2 = 0.7071067811865476
NEG_INF = -1e30
EXACT_SOFTMAX = False  # True -> exact division in softmax (validation vs. PyTorch reference)


# ----------------------- in-kernel helpers -----------------------
def _ln(x, g, b, eps):
    mu = jnp.mean(x, axis=-1, keepdims=True)
    var = jnp.mean(jnp.square(x - mu), axis=-1, keepdims=True)
    return (x - mu) * jax.lax.rsqrt(var + eps) * g + b


def _softmax_rows(s):
    s = s - jnp.max(s, axis=-1, keepdims=True)
    p = jnp.exp(s)
    denom = jnp.sum(p, axis=-1, keepdims=True)
    if EXACT_SOFTMAX:
        return p / denom
    return p * pl.reciprocal(denom, approx=True)


def _mh_attn_fused(q_src, kv_src, q_off, k_off, v_off, bias, fc_w, scale,
                   n_head, d_k, d_v):
    """Multi-head attention with the head-concat folded into the output projection.

    out = concat_h(softmax(q_h k_h^T * scale + bias) v_h) @ fc_w
        = sum_h softmax(q_h k_h^T * scale + bias) v_h @ fc_w[h*d_v:(h+1)*d_v, :]
    -> no lane concatenate, a single live (Lq, D) f32 accumulator.
    q_src/kv_src are packed f32 projections; bias is an additive mask (or None);
    fc_w is the bf16 (n_head*d_v, D) output-projection weight (bias added by caller).
    """
    out = None
    for h in range(n_head):
        q_h = q_src[:, q_off + h * d_k: q_off + (h + 1) * d_k].astype(jnp.bfloat16)
        k_h = kv_src[:, k_off + h * d_k: k_off + (h + 1) * d_k].astype(jnp.bfloat16)
        v_h = kv_src[:, v_off + h * d_v: v_off + (h + 1) * d_v].astype(jnp.bfloat16)
        s = jax.lax.dot_general(q_h, k_h, (((1,), (1,)), ((), ())),
                                preferred_element_type=jnp.float32) * scale
        if bias is not None:
            s = s + bias
        p = _softmax_rows(s).astype(jnp.bfloat16)
        ctx = jnp.dot(p, v_h, preferred_element_type=jnp.float32)
        c = jnp.dot(ctx.astype(jnp.bfloat16), fc_w[h * d_v:(h + 1) * d_v, :],
                    preferred_element_type=jnp.float32)
        out = c if out is None else out + c
    return out


# ----------------------- Pallas kernels -----------------------
def _bert_stack_kernel(x_ref, emb_g_ref, emb_b_ref,
                       wqkv_ref, bqkv_ref, ao_w_ref, ao_b_ref, ao_g_ref, ao_bb_ref,
                       w1_ref, b1_ref, w2_ref, b2_ref, ffn_g_ref, ffn_b_ref,
                       o_ref, *, n_head, d_k, d_v, scale, eps):
    """Whole BERT encoder stack. grid = (B, N_LAYERS); o_ref carries the activation."""
    l = pl.program_id(1)

    @pl.when(l == 0)
    def _():
        # embedding LayerNorm folded into the first layer step
        o_ref[0] = _ln(x_ref[0], emb_g_ref[...], emb_b_ref[...], eps)

    h = o_ref[0]                                                   # (Ls, D) f32

    # --- self-attention sub-layer (BERT path carries no attention mask) ---
    qkv = jnp.dot(h.astype(jnp.bfloat16), wqkv_ref[0],
                  preferred_element_type=jnp.float32) + bqkv_ref[0]
    hk = n_head * d_k
    attn = _mh_attn_fused(qkv, qkv, 0, hk, 2 * hk, None, ao_w_ref[0],
                          scale, n_head, d_k, d_v)
    y = _ln(attn + ao_b_ref[0] + h, ao_g_ref[0], ao_bb_ref[0], eps)

    # --- FFN sub-layer (exact gelu) ---
    hid = jnp.dot(y.astype(jnp.bfloat16), w1_ref[0],
                  preferred_element_type=jnp.float32) + b1_ref[0]
    hid = hid * 0.5 * (1.0 + jax.lax.erf(hid * SQRT1_2))
    out = jnp.dot(hid.astype(jnp.bfloat16), w2_ref[0],
                  preferred_element_type=jnp.float32) + b2_ref[0]
    o_ref[0] = _ln(out + y, ffn_g_ref[0], ffn_b_ref[0], eps)


def _decoder_stack_kernel(x_ref, enc_ref, np_ref, tkb_ref, skb_ref, wprj_ref,
                          s_wqkv, s_bqkv, s_fcw, s_fcb, s_g, s_b,
                          c_wq, c_bq, c_wkv, c_bkv, c_fcw, c_fcb, c_g, c_b,
                          f_w1, f_b1, f_w2, f_b2, f_g, f_b,
                          logits_ref, h_scr,
                          *, n_head, d_k, d_v, scale, eps, prj_scale):
    """Whole decoder stack + tied scaled output projection. grid = (B, N_LAYERS)."""
    l = pl.program_id(1)
    lt = h_scr.shape[0]

    @pl.when(l == 0)
    def _():
        h_scr[...] = x_ref[0]

    h = h_scr[...]                                                 # (Lt, D) f32
    non_pad = np_ref[0]                                            # (Lt, 1)

    # additive masks: causal part built in-kernel, key-pad part is a tiny (1, Lk) bias row
    row = jax.lax.broadcasted_iota(jnp.int32, (lt, lt), 0)
    col = jax.lax.broadcasted_iota(jnp.int32, (lt, lt), 1)
    causal = (col > row).astype(jnp.float32) * NEG_INF
    slf_bias = causal + tkb_ref[0]                                 # (Lt, Lt)
    enc_bias = skb_ref[0]                                          # (1, Ls)

    hk = n_head * d_k

    # --- masked self-attention ---
    qkv = jnp.dot(h.astype(jnp.bfloat16), s_wqkv[0],
                  preferred_element_type=jnp.float32) + s_bqkv[0]
    attn = _mh_attn_fused(qkv, qkv, 0, hk, 2 * hk, slf_bias, s_fcw[0],
                          scale, n_head, d_k, d_v)
    h = _ln(attn + s_fcb[0] + h, s_g[0], s_b[0], eps) * non_pad

    # --- encoder-decoder cross attention ---
    q = jnp.dot(h.astype(jnp.bfloat16), c_wq[0],
                preferred_element_type=jnp.float32) + c_bq[0]
    kv = jnp.dot(enc_ref[0].astype(jnp.bfloat16), c_wkv[0],
                 preferred_element_type=jnp.float32) + c_bkv[0]
    attn = _mh_attn_fused(q, kv, 0, 0, hk, enc_bias, c_fcw[0],
                          scale, n_head, d_k, d_v)
    h = _ln(attn + c_fcb[0] + h, c_g[0], c_b[0], eps) * non_pad

    # --- position-wise FFN (conv1d k=1 == linear), relu ---
    hid = jnp.maximum(jnp.dot(h.astype(jnp.bfloat16), f_w1[0],
                              preferred_element_type=jnp.float32) + f_b1[0], 0.0)
    out = jnp.dot(hid.astype(jnp.bfloat16), f_w2[0],
                  preferred_element_type=jnp.float32) + f_b2[0]
    h = _ln(out + h, f_g[0], f_b[0], eps) * non_pad
    h_scr[...] = h

    # --- tied / scaled vocab projection fused into the last layer step (lane-dense 128) ---
    @pl.when(l == pl.num_programs(1) - 1)
    def _():
        logits_ref[0] = jnp.dot(h.astype(jnp.bfloat16), wprj_ref[...],
                                preferred_element_type=jnp.float32) * prj_scale


# ----------------------- pallas_call wrappers -----------------------
def _bspec(a):
    return pl.BlockSpec((1,) + tuple(a.shape[1:]), lambda b, l: (b, 0, 0))


def _lspec(a):
    return pl.BlockSpec((1,) + tuple(a.shape[1:]), lambda b, l: (l, 0, 0))


def _cspec(a):
    nd = a.ndim
    return pl.BlockSpec(tuple(a.shape), lambda b, l, _nd=nd: (0,) * _nd)


def pallas_bert_encoder(x, bp):
    Bb, Ls, D = x.shape
    nl = bp["wqkv"].shape[0]
    kern = functools.partial(_bert_stack_kernel, n_head=N_HEAD, d_k=D_K, d_v=D_V,
                             scale=1.0 / float(np.sqrt(D_MODEL // N_HEAD)), eps=1e-12)
    layer_arrays = [bp["wqkv"], bp["bqkv"], bp["ao_w"], bp["ao_b"], bp["ao_ln_g"],
                    bp["ao_ln_b"], bp["w1"], bp["b1"], bp["w2"], bp["b2"],
                    bp["o_ln_g"], bp["o_ln_b"]]
    inputs = [x, bp["emb_ln_g"], bp["emb_ln_b"]] + layer_arrays
    in_specs = [_bspec(x), _cspec(bp["emb_ln_g"]), _cspec(bp["emb_ln_b"])] + \
               [_lspec(a) for a in layer_arrays]
    return pl.pallas_call(
        kern,
        out_shape=jax.ShapeDtypeStruct((Bb, Ls, D), jnp.float32),
        grid=(Bb, nl),
        in_specs=in_specs,
        out_specs=pl.BlockSpec((1, Ls, D), lambda b, l: (b, 0, 0)),
        compiler_params=pltpu.CompilerParams(
            dimension_semantics=("parallel", "arbitrary")),
    )(*inputs)


def pallas_decoder(dec_in, enc_out, non_pad, tgt_key_bias, src_key_bias, dp):
    Bb, Lt, D = dec_in.shape
    nl = dp["slf_wqkv"].shape[0]
    kern = functools.partial(
        _decoder_stack_kernel, n_head=N_HEAD, d_k=D_K, d_v=D_V,
        scale=1.0 / float(np.sqrt(D_K)), eps=1e-5,
        prj_scale=float(D_MODEL) ** (-0.5))
    batch_arrays = [dec_in, enc_out, non_pad, tgt_key_bias, src_key_bias]
    const_arrays = [dp["tgt_word_prj_pad"]]
    layer_arrays = [dp[k] for k in (
        "slf_wqkv", "slf_bqkv", "slf_fc_w", "slf_fc_b", "slf_ln_g", "slf_ln_b",
        "enc_wq", "enc_bq", "enc_wkv", "enc_bkv", "enc_fc_w", "enc_fc_b",
        "enc_ln_g", "enc_ln_b",
        "ffn_w1", "ffn_b1", "ffn_w2", "ffn_b2", "ffn_ln_g", "ffn_ln_b")]
    inputs = batch_arrays + const_arrays + layer_arrays
    in_specs = [_bspec(a) for a in batch_arrays] + [_cspec(a) for a in const_arrays] + \
               [_lspec(a) for a in layer_arrays]
    return pl.pallas_call(
        kern,
        out_shape=jax.ShapeDtypeStruct((Bb, Lt, VOCAB_PAD), jnp.float32),
        grid=(Bb, nl),
        in_specs=in_specs,
        out_specs=pl.BlockSpec((1, Lt, VOCAB_PAD), lambda b, l: (b, 0, 0)),
        scratch_shapes=[pltpu.VMEM((Lt, D), jnp.float32)],
        compiler_params=pltpu.CompilerParams(
            dimension_semantics=("parallel", "arbitrary")),
    )(*inputs)


# ----------------------- parameter init -----------------------
def _sinusoid_table(n_position, d_hid):
    pos = np.arange(n_position, dtype=np.float64)[:, None]
    i = np.arange(d_hid, dtype=np.float64)[None, :]
    angle = pos / np.power(10000.0, 2.0 * (i // 2) / d_hid)
    tab = np.zeros((n_position, d_hid), dtype=np.float64)
    tab[:, 0::2] = np.sin(angle[:, 0::2])
    tab[:, 1::2] = np.cos(angle[:, 1::2])
    tab[0] = 0.0  # padding_idx
    return jnp.asarray(tab, jnp.float32)


def init_params(key):
    keys = iter(jax.random.split(key, 256))
    nk = lambda: next(keys)
    bf16 = jnp.bfloat16

    def xavier(shape):
        std = np.sqrt(2.0 / (shape[-2] + shape[-1]))
        return jax.random.normal(nk(), shape, jnp.float32) * std

    def stack_x(shape):
        return jnp.stack([xavier(shape) for _ in range(N_LAYERS)], axis=0)

    def zeros_l(width):
        return jnp.zeros((N_LAYERS, 1, width), jnp.float32)

    def ones_l(width):
        return jnp.ones((N_LAYERS, 1, width), jnp.float32)

    # ---- BERT encoder (QKV pre-fused at init; matmul weights stored bf16) ----
    wq, wk, wv = stack_x((D_MODEL, D_MODEL)), stack_x((D_MODEL, D_MODEL)), stack_x((D_MODEL, D_MODEL))
    bert = dict(
        word_emb=jax.random.normal(nk(), (N_SRC_VOCAB, D_MODEL), jnp.float32) * 0.02,
        pos_emb=jax.random.normal(nk(), (LEN_MAX_SEQ, D_MODEL), jnp.float32) * 0.02,
        type_emb=jax.random.normal(nk(), (N_TYPE_VOCAB, D_MODEL), jnp.float32) * 0.02,
        emb_ln_g=jnp.ones((1, D_MODEL), jnp.float32),
        emb_ln_b=jnp.zeros((1, D_MODEL), jnp.float32),
        wqkv=jnp.concatenate([wq, wk, wv], axis=2).astype(bf16),
        bqkv=zeros_l(3 * D_MODEL),
        ao_w=stack_x((D_MODEL, D_MODEL)).astype(bf16), ao_b=zeros_l(D_MODEL),
        ao_ln_g=ones_l(D_MODEL), ao_ln_b=zeros_l(D_MODEL),
        w1=stack_x((D_MODEL, D_INNER)).astype(bf16), b1=zeros_l(D_INNER),
        w2=stack_x((D_INNER, D_MODEL)).astype(bf16), b2=zeros_l(D_MODEL),
        o_ln_g=ones_l(D_MODEL), o_ln_b=zeros_l(D_MODEL),
    )

    # ---- Decoder ----
    hk, hv = N_HEAD * D_K, N_HEAD * D_V
    s_wq, s_wk, s_wv = stack_x((D_MODEL, hk)), stack_x((D_MODEL, hk)), stack_x((D_MODEL, hv))
    c_wk, c_wv = stack_x((D_MODEL, hk)), stack_x((D_MODEL, hv))
    tgt_emb = jax.random.normal(nk(), (N_TGT_VOCAB, D_MODEL), jnp.float32) * 0.02
    tgt_emb = tgt_emb.at[0].set(0.0)  # padding_idx = 0
    # Tied projection: tgt_word_prj.weight = decoder.tgt_word_emb.weight.
    # Pre-transposed + lane-padded to 128 once at init (inference only, no updates,
    # so the tie with tgt_word_emb is preserved by construction).
    prj_pad = jnp.pad(tgt_emb, ((0, VOCAB_PAD - N_TGT_VOCAB), (0, 0))).T.astype(bf16)
    dec = dict(
        tgt_word_emb=tgt_emb,
        pos_table=_sinusoid_table(LEN_MAX_SEQ + 1, D_MODEL),
        tgt_word_prj_pad=prj_pad,
        slf_wqkv=jnp.concatenate([s_wq, s_wk, s_wv], axis=2).astype(bf16),
        slf_bqkv=zeros_l(2 * hk + hv),
        slf_fc_w=stack_x((hv, D_MODEL)).astype(bf16), slf_fc_b=zeros_l(D_MODEL),
        slf_ln_g=ones_l(D_MODEL), slf_ln_b=zeros_l(D_MODEL),
        enc_wq=stack_x((D_MODEL, hk)).astype(bf16), enc_bq=zeros_l(hk),
        enc_wkv=jnp.concatenate([c_wk, c_wv], axis=2).astype(bf16),
        enc_bkv=zeros_l(hk + hv),
        enc_fc_w=stack_x((hv, D_MODEL)).astype(bf16), enc_fc_b=zeros_l(D_MODEL),
        enc_ln_g=ones_l(D_MODEL), enc_ln_b=zeros_l(D_MODEL),
        ffn_w1=stack_x((D_MODEL, D_INNER)).astype(bf16), ffn_b1=zeros_l(D_INNER),
        ffn_w2=stack_x((D_INNER, D_MODEL)).astype(bf16), ffn_b2=zeros_l(D_MODEL),
        ffn_ln_g=ones_l(D_MODEL), ffn_ln_b=zeros_l(D_MODEL),
    )
    return {"bert": bert, "dec": dec}


# ----------------------- forward -----------------------
def forward(params, src_seq, src_sen, tgt_seq, tgt_pos):
    tgt_seq = tgt_seq[:, :-1]
    tgt_pos = tgt_pos[:, :-1]
    bp, dp = params["bert"], params["dec"]
    Bb, Ls = src_seq.shape
    Lt = tgt_seq.shape[1]

    # TODO(synk): embedding gathers stay in plain JAX (no clean Pallas gather for tiny tables)
    enc_in = (bp["word_emb"][src_seq]
              + bp["pos_emb"][jnp.arange(Ls)][None, :, :]
              + bp["type_emb"][src_sen])
    enc_output = pallas_bert_encoder(enc_in, bp)

    dec_in = dp["tgt_word_emb"][tgt_seq] + dp["pos_table"][tgt_pos]
    # tiny additive / multiplicative mask components (causal part is built in-kernel)
    non_pad = (tgt_seq != 0).astype(jnp.float32)[:, :, None]                  # (B, Lt, 1)
    tgt_key_bias = ((tgt_seq == 0).astype(jnp.float32) * NEG_INF)[:, None, :]  # (B, 1, Lt)
    src_key_bias = ((src_seq == 0).astype(jnp.float32) * NEG_INF)[:, None, :]  # (B, 1, Ls)

    logits_pad = pallas_decoder(dec_in, enc_output, non_pad, tgt_key_bias,
                                src_key_bias, dp)                              # (B, Lt, 128)
    return logits_pad.reshape(Bb * Lt, VOCAB_PAD)[:, :N_TGT_VOCAB]


# ----------------------- main -----------------------
if __name__ == "__main__":
    key = jax.random.PRNGKey(0)
    pkey, k1, k2 = jax.random.split(key, 3)
    params = init_params(pkey)

    src_seq = jax.random.randint(k1, (B, SRC_LEN), 1, N_SRC_VOCAB, dtype=jnp.int32)
    src_sen = jnp.concatenate(
        [jnp.zeros((B, SRC_LEN // 2), jnp.int32), jnp.ones((B, SRC_LEN // 2), jnp.int32)], axis=1)
    tgt_seq = jax.random.randint(k2, (B, TGT_LEN), 1, N_TGT_VOCAB, dtype=jnp.int32)
    tgt_pos = jnp.tile(jnp.arange(1, TGT_LEN + 1, dtype=jnp.int32)[None, :], (B, 1))

    fwd = jax.jit(forward)
    logits = jax.block_until_ready(fwd(params, src_seq, src_sen, tgt_seq, tgt_pos))

    assert logits.shape == (B * (TGT_LEN - 1), N_TGT_VOCAB), logits.shape
    assert logits.dtype == jnp.float32
    assert bool(jnp.all(jnp.isfinite(logits)))
    print("KERNEL_OK")
</pallas_src>

<mosaic_0001>
module attributes {stable_mosaic.version = 11 : i64} {
  func.func @_bert_stack_kernel(%arg0: i32, %arg1: i32, %arg2: memref<1x16x64xf32, #tpu.memory_space<vmem>>, %arg3: memref<1x64xf32, #tpu.memory_space<vmem>>, %arg4: memref<1x64xf32, #tpu.memory_space<vmem>>, %arg5: memref<1x64x192xbf16, #tpu.memory_space<vmem>>, %arg6: memref<1x1x192xf32, #tpu.memory_space<vmem>>, %arg7: memref<1x64x64xbf16, #tpu.memory_space<vmem>>, %arg8: memref<1x1x64xf32, #tpu.memory_space<vmem>>, %arg9: memref<1x1x64xf32, #tpu.memory_space<vmem>>, %arg10: memref<1x1x64xf32, #tpu.memory_space<vmem>>, %arg11: memref<1x64x128xbf16, #tpu.memory_space<vmem>>, %arg12: memref<1x1x128xf32, #tpu.memory_space<vmem>>, %arg13: memref<1x128x64xbf16, #tpu.memory_space<vmem>>, %arg14: memref<1x1x64xf32, #tpu.memory_space<vmem>>, %arg15: memref<1x1x64xf32, #tpu.memory_space<vmem>>, %arg16: memref<1x1x64xf32, #tpu.memory_space<vmem>>, %arg17: memref<1x16x64xf32, #tpu.memory_space<vmem>>) attributes {dimension_semantics = [#tpu.dimension_semantics<parallel>, #tpu.dimension_semantics<arbitrary>], iteration_bounds = array<i64: 2, 2>, scalar_prefetch = 0 : i64, scratch_operands = 0 : i64, tpu.core_type = #tpu.core_type<tc>, window_params = [{transform_indices = @transform_0, window_bounds = array<i64: 1, 16, 64>}, {pipeline_mode = #tpu.pipeline_mode<synchronous>, transform_indices = @transform_1, window_bounds = array<i64: 1, 64>}, {pipeline_mode = #tpu.pipeline_mode<synchronous>, transform_indices = @transform_2, window_bounds = array<i64: 1, 64>}, {transform_indices = @transform_3, window_bounds = array<i64: 1, 64, 192>}, {transform_indices = @transform_4, window_bounds = array<i64: 1, 1, 192>}, {transform_indices = @transform_5, window_bounds = array<i64: 1, 64, 64>}, {transform_indices = @transform_6, window_bounds = array<i64: 1, 1, 64>}, {transform_indices = @transform_7, window_bounds = array<i64: 1, 1, 64>}, {transform_indices = @transform_8, window_bounds = array<i64: 1, 1, 64>}, {transform_indices = @transform_9, window_bounds = array<i64: 1, 64, 128>}, {transform_indices = @transform_10, window_bounds = array<i64: 1, 1, 128>}, {transform_indices = @transform_11, window_bounds = array<i64: 1, 128, 64>}, {transform_indices = @transform_12, window_bounds = array<i64: 1, 1, 64>}, {transform_indices = @transform_13, window_bounds = array<i64: 1, 1, 64>}, {transform_indices = @transform_14, window_bounds = array<i64: 1, 1, 64>}, {transform_indices = @transform_15, window_bounds = array<i64: 1, 16, 64>}]} {
    %c0_i32 = arith.constant 0 : i32
    %0 = arith.cmpi eq, %arg1, %c0_i32 : i32
    %1 = arith.extui %0 : i1 to i32
    %c0_i32_0 = arith.constant 0 : i32
    %2 = arith.cmpi ne, %1, %c0_i32_0 : i32
    scf.if %2 {
      %c0_81 = arith.constant 0 : index
      %c0_82 = arith.constant 0 : index
      %c0_83 = arith.constant 0 : index
      %199 = vector.load %arg2[%c0_81, %c0_82, %c0_83] : memref<1x16x64xf32, #tpu.memory_space<vmem>>, vector<1x16x64xf32>
      %200 = vector.shape_cast %199 : vector<1x16x64xf32> to vector<16x64xf32>
      %c0_84 = arith.constant 0 : index
      %c0_85 = arith.constant 0 : index
      %201 = vector.load %arg3[%c0_84, %c0_85] : memref<1x64xf32, #tpu.memory_space<vmem>>, vector<1x64xf32>
      %c0_86 = arith.constant 0 : index
      %c0_87 = arith.constant 0 : index
      %202 = vector.load %arg4[%c0_86, %c0_87] : memref<1x64xf32, #tpu.memory_space<vmem>>, vector<1x64xf32>
      %cst_88 = arith.constant dense<0.000000e+00> : vector<16xf32>
      %203 = vector.multi_reduction <add>, %200, %cst_88 [1] : vector<16x64xf32> to vector<16xf32>
      %204 = vector.shape_cast %203 : vector<16xf32> to vector<16x1xf32>
      %cst_89 = arith.constant 6.400000e+01 : f32
      %205 = vector.broadcast %cst_89 : f32 to vector<16x1xf32>
      %206 = arith.divf %204, %205 : vector<16x1xf32>
      %207 = vector.broadcast %206 : vector<16x1xf32> to vector<16x64xf32>
      %208 = arith.subf %200, %207 : vector<16x64xf32>
      %209 = arith.mulf %208, %208 : vector<16x64xf32>
      %cst_90 = arith.constant dense<0.000000e+00> : vector<16xf32>
      %210 = vector.multi_reduction <add>, %209, %cst_90 [1] : vector<16x64xf32> to vector<16xf32>
      %211 = vector.shape_cast %210 : vector<16xf32> to vector<16x1xf32>
      %cst_91 = arith.constant 6.400000e+01 : f32
      %212 = vector.broadcast %cst_91 : f32 to vector<16x1xf32>
      %213 = arith.divf %211, %212 : vector<16x1xf32>
      %214 = vector.broadcast %206 : vector<16x1xf32> to vector<16x64xf32>
      %215 = arith.subf %200, %214 : vector<16x64xf32>
      %cst_92 = arith.constant 9.99999996E-13 : f32
      %216 = vector.broadcast %cst_92 : f32 to vector<16x1xf32>
      %217 = arith.addf %213, %216 : vector<16x1xf32>
      %218 = math.rsqrt %217 : vector<16x1xf32>
      %219 = vector.broadcast %218 : vector<16x1xf32> to vector<16x64xf32>
      %220 = arith.mulf %215, %219 : vector<16x64xf32>
      %221 = vector.broadcast %201 : vector<1x64xf32> to vector<16x64xf32>
      %222 = arith.mulf %220, %221 : vector<16x64xf32>
      %223 = vector.broadcast %202 : vector<1x64xf32> to vector<16x64xf32>
      %224 = arith.addf %222, %223 : vector<16x64xf32>
      %c0_93 = arith.constant 0 : index
      %c0_94 = arith.constant 0 : index
      %c0_95 = arith.constant 0 : index
      %225 = vector.load %arg17[%c0_93, %c0_94, %c0_95] : memref<1x16x64xf32, #tpu.memory_space<vmem>>, vector<1x16x64xf32>
      %226 = vector.shape_cast %225 : vector<1x16x64xf32> to vector<16x64xf32>
      %227 = vector.shape_cast %224 : vector<16x64xf32> to vector<1x16x64xf32>
      tpu.vector_store %arg17[%c0_93, %c0_94, %c0_95], %227 {strides = array<i32>} : memref<1x16x64xf32, #tpu.memory_space<vmem>>, vector<1x16x64xf32>,
    } else {
    }
    %c0 = arith.constant 0 : index
    %c0_1 = arith.constant 0 : index
    %c0_2 = arith.constant 0 : index
    %3 = vector.load %arg17[%c0, %c0_1, %c0_2] : memref<1x16x64xf32, #tpu.memory_space<vmem>>, vector<1x16x64xf32>
    %4 = vector.shape_cast %3 : vector<1x16x64xf32> to vector<16x64xf32>
    %5 = arith.truncf %4 : vector<16x64xf32> to vector<16x64xbf16>
    %c0_3 = arith.constant 0 : index
    %c0_4 = arith.constant 0 : index
    %c0_5 = arith.constant 0 : index
    %6 = vector.load %arg5[%c0_3, %c0_4, %c0_5] : memref<1x64x192xbf16, #tpu.memory_space<vmem>>, vector<1x64x192xbf16>
    %7 = vector.shape_cast %6 : vector<1x64x192xbf16> to vector<64x192xbf16>
    %cst = arith.constant dense<0.000000e+00> : vector<16x192xf32>
    %8 = tpu.matmul %5, %7, %cst {dimension_numbers = #tpu.dot_dimension_numbers<[1], [0], [0], [1], [0, 0, 1, 1], [], []>} : vector<16x64xbf16>, vector<64x192xbf16>, vector<16x192xf32> -> vector<16x192xf32>
    %c0_6 = arith.constant 0 : index
    %c0_7 = arith.constant 0 : index
    %c0_8 = arith.constant 0 : index
    %9 = vector.load %arg6[%c0_6, %c0_7, %c0_8] : memref<1x1x192xf32, #tpu.memory_space<vmem>>, vector<1x1x192xf32>
    %10 = vector.shape_cast %9 : vector<1x1x192xf32> to vector<1x192xf32>
    %11 = vector.broadcast %10 : vector<1x192xf32> to vector<16x192xf32>
    %12 = arith.addf %8, %11 : vector<16x192xf32>
    %c0_9 = arith.constant 0 : index
    %c0_10 = arith.constant 0 : index
    %c0_11 = arith.constant 0 : index
    %13 = vector.load %arg7[%c0_9, %c0_10, %c0_11] : memref<1x64x64xbf16, #tpu.memory_space<vmem>>, vector<1x64x64xbf16>
    %14 = vector.shape_cast %13 : vector<1x64x64xbf16> to vector<64x64xbf16>
    %15 = vector.extract_strided_slice %12 {offsets = [0, 0], sizes = [16, 16], strides = [1, 1]} : vector<16x192xf32> to vector<16x16xf32>
    %16 = arith.truncf %15 : vector<16x16xf32> to vector<16x16xbf16>
    %17 = vector.extract_strided_slice %12 {offsets = [0, 64], sizes = [16, 16], strides = [1, 1]} : vector<16x192xf32> to vector<16x16xf32>
    %18 = arith.truncf %17 : vector<16x16xf32> to vector<16x16xbf16>
    %19 = vector.extract_strided_slice %12 {offsets = [0, 128], sizes = [16, 16], strides = [1, 1]} : vector<16x192xf32> to vector<16x16xf32>
    %20 = arith.truncf %19 : vector<16x16xf32> to vector<16x16xbf16>
    %cst_12 = arith.constant dense<0.000000e+00> : vector<16x16xf32>
    %21 = tpu.matmul %16, %18, %cst_12 {dimension_numbers = #tpu.dot_dimension_numbers<[1], [1], [0], [0], [0, 0, 1, 0], [], []>} : vector<16x16xbf16>, vector<16x16xbf16>, vector<16x16xf32> -> vector<16x16xf32>
    %cst_13 = arith.constant 2.500000e-01 : f32
    %22 = vector.broadcast %cst_13 : f32 to vector<16x16xf32>
    %23 = arith.mulf %21, %22 : vector<16x16xf32>
    %cst_14 = arith.constant dense<0xFF800000> : vector<16xf32>
    %24 = vector.multi_reduction <maximumf>, %23, %cst_14 [1] : vector<16x16xf32> to vector<16xf32>
    %25 = vector.shape_cast %24 : vector<16xf32> to vector<16x1xf32>
    %26 = vector.broadcast %25 : vector<16x1xf32> to vector<16x16xf32>
    %27 = arith.subf %23, %26 : vector<16x16xf32>
    %28 = math.exp %27 : vector<16x16xf32>
    %cst_15 = arith.constant dense<0.000000e+00> : vector<16xf32>
    %29 = vector.multi_reduction <add>, %28, %cst_15 [1] : vector<16x16xf32> to vector<16xf32>
    %30 = vector.shape_cast %29 : vector<16xf32> to vector<16x1xf32>
    %31 = tpu.reciprocal %30 {approx = true} : vector<16x1xf32> -> vector<16x1xf32>
    %32 = vector.broadcast %31 : vector<16x1xf32> to vector<16x16xf32>
    %33 = arith.mulf %28, %32 : vector<16x16xf32>
    %34 = arith.truncf %33 : vector<16x16xf32> to vector<16x16xbf16>
    %cst_16 = arith.constant dense<0.000000e+00> : vector<16x16xf32>
    %35 = tpu.matmul %34, %20, %cst_16 {dimension_numbers = #tpu.dot_dimension_numbers<[1], [0], [0], [1], [0, 0, 1, 1], [], []>} : vector<16x16xbf16>, vector<16x16xbf16>, vector<16x16xf32> -> vector<16x16xf32>
    %36 = arith.truncf %35 : vector<16x16xf32> to vector<16x16xbf16>
    %37 = vector.extract_strided_slice %14 {offsets = [0, 0], sizes = [16, 64], strides = [1, 1]} : vector<64x64xbf16> to vector<16x64xbf16>
    %cst_17 = arith.constant dense<0.000000e+00> : vector<16x64xf32>
    %38 = tpu.matmul %36, %37, %cst_17 {dimension_numbers = #tpu.dot_dimension_numbers<[1], [0], [0], [1], [0, 0, 1, 1], [], []>} : vector<16x16xbf16>, vector<16x64xbf16>, vector<16x64xf32> -> vector<16x64xf32>
    %39 = vector.extract_strided_slice %12 {offsets = [0, 16], sizes = [16, 16], strides = [1, 1]} : vector<16x192xf32> to vector<16x16xf32>
    %40 = arith.truncf %39 : vector<16x16xf32> to vector<16x16xbf16>
    %41 = vector.extract_strided_slice %12 {offsets = [0, 80], sizes = [16, 16], strides = [1, 1]} : vector<16x192xf32> to vector<16x16xf32>
    %42 = arith.truncf %41 : vector<16x16xf32> to vector<16x16xbf16>
    %43 = vector.extract_strided_slice %12 {offsets = [0, 144], sizes = [16, 16], strides = [1, 1]} : vector<16x192xf32> to vector<16x16xf32>
    %44 = arith.truncf %43 : vector<16x16xf32> to vector<16x16xbf16>
    %cst_18 = arith.constant dense<0.000000e+00> : vector<16x16xf32>
    %45 = tpu.matmul %40, %42, %cst_18 {dimension_numbers = #tpu.dot_dimension_numbers<[1], [1], [0], [0], [0, 0, 1, 0], [], []>} : vector<16x16xbf16>, vector<16x16xbf16>, vector<16x16xf32> -> vector<16x16xf32>
    %cst_19 = arith.constant 2.500000e-01 : f32
    %46 = vector.broadcast %cst_19 : f32 to vector<16x16xf32>
    %47 = arith.mulf %45, %46 : vector<16x16xf32>
    %cst_20 = arith.constant dense<0xFF800000> : vector<16xf32>
    %48 = vector.multi_reduction <maximumf>, %47, %cst_20 [1] : vector<16x16xf32> to vector<16xf32>
    %49 = vector.shape_cast %48 : vector<16xf32> to vector<16x1xf32>
    %50 = vector.broadcast %49 : vector<16x1xf32> to vector<16x16xf32>
    %51 = arith.subf %47, %50 : vector<16x16xf32>
    %52 = math.exp %51 : vector<16x16xf32>
    %cst_21 = arith.constant dense<0.000000e+00> : vector<16xf32>
    %53 = vector.multi_reduction <add>, %52, %cst_21 [1] : vector<16x16xf32> to vector<16xf32>
    %54 = vector.shape_cast %53 : vector<16xf32> to vector<16x1xf32>
    %55 = tpu.reciprocal %54 {approx = true} : vector<16x1xf32> -> vector<16x1xf32>
    %56 = vector.broadcast %55 : vector<16x1xf32> to vector<16x16xf32>
    %57 = arith.mulf %52, %56 : vector<16x16xf32>
    %58 = arith.truncf %57 : vector<16x16xf32> to vector<16x16xbf16>
    %cst_22 = arith.constant dense<0.000000e+00> : vector<16x16xf32>
    %59 = tpu.matmul %58, %44, %cst_22 {dimension_numbers = #tpu.dot_dimension_numbers<[1], [0], [0], [1], [0, 0, 1, 1], [], []>} : vector<16x16xbf16>, vector<16x16xbf16>, vector<16x16xf32> -> vector<16x16xf32>
    %60 = arith.truncf %59 : vector<16x16xf32> to vector<16x16xbf16>
    %61 = vector.extract_strided_slice %14 {offsets = [16, 0], sizes = [16, 64], strides = [1, 1]} : vector<64x64xbf16> to vector<16x64xbf16>
    %cst_23 = arith.constant dense<0.000000e+00> : vector<16x64xf32>
    %62 = tpu.matmul %60, %61, %cst_23 {dimension_numbers = #tpu.dot_dimension_numbers<[1], [0], [0], [1], [0, 0, 1, 1], [], []>} : vector<16x16xbf16>, vector<16x64xbf16>, vector<16x64xf32> -> vector<16x64xf32>
    %63 = arith.addf %38, %62 : vector<16x64xf32>
    %64 = vector.extract_strided_slice %12 {offsets = [0, 32], sizes = [16, 16], strides = [1, 1]} : vector<16x192xf32> to vector<16x16xf32>
    %65 = arith.truncf %64 : vector<16x16xf32> to vector<16x16xbf16>
    %66 = vector.extract_strided_slice %12 {offsets = [0, 96], sizes = [16, 16], strides = [1, 1]} : vector<16x192xf32> to vector<16x16xf32>
    %67 = arith.truncf %66 : vector<16x16xf32> to vector<16x16xbf16>
    %68 = vector.extract_strided_slice %12 {offsets = [0, 160], sizes = [16, 16], strides = [1, 1]} : vector<16x192xf32> to vector<16x16xf32>
    %69 = arith.truncf %68 : vector<16x16xf32> to vector<16x16xbf16>
    %cst_24 = arith.constant dense<0.000000e+00> : vector<16x16xf32>
    %70 = tpu.matmul %65, %67, %cst_24 {dimension_numbers = #tpu.dot_dimension_numbers<[1], [1], [0], [0], [0, 0, 1, 0], [], []>} : vector<16x16xbf16>, vector<16x16xbf16>, vector<16x16xf32> -> vector<16x16xf32>
    %cst_25 = arith.constant 2.500000e-01 : f32
    %71 = vector.broadcast %cst_25 : f32 to vector<16x16xf32>
    %72 = arith.mulf %70, %71 : vector<16x16xf32>
    %cst_26 = arith.constant dense<0xFF800000> : vector<16xf32>
    %73 = vector.multi_reduction <maximumf>, %72, %cst_26 [1] : vector<16x16xf32> to vector<16xf32>
    %74 = vector.shape_cast %73 : vector<16xf32> to vector<16x1xf32>
    %75 = vector.broadcast %74 : vector<16x1xf32> to vector<16x16xf32>
    %76 = arith.subf %72, %75 : vector<16x16xf32>
    %77 = math.exp %76 : vector<16x16xf32>
    %cst_27 = arith.constant dense<0.000000e+00> : vector<16xf32>
    %78 = vector.multi_reduction <add>, %77, %cst_27 [1] : vector<16x16xf32> to vector<16xf32>
    %79 = vector.shape_cast %78 : vector<16xf32> to vector<16x1xf32>
    %80 = tpu.reciprocal %79 {approx = true} : vector<16x1xf32> -> vector<16x1xf32>
    %81 = vector.broadcast %80 : vector<16x1xf32> to vector<16x16xf32>
    %82 = arith.mulf %77, %81 : vector<16x16xf32>
    %83 = arith.truncf %82 : vector<16x16xf32> to vector<16x16xbf16>
    %cst_28 = arith.constant dense<0.000000e+00> : vector<16x16xf32>
    %84 = tpu.matmul %83, %69, %cst_28 {dimension_numbers = #tpu.dot_dimension_numbers<[1], [0], [0], [1], [0, 0, 1, 1], [], []>} : vector<16x16xbf16>, vector<16x16xbf16>, vector<16x16xf32> -> vector<16x16xf32>
    %85 = arith.truncf %84 : vector<16x16xf32> to vector<16x16xbf16>
    %86 = vector.extract_strided_slice %14 {offsets = [32, 0], sizes = [16, 64], strides = [1, 1]} : vector<64x64xbf16> to vector<16x64xbf16>
    %cst_29 = arith.constant dense<0.000000e+00> : vector<16x64xf32>
    %87 = tpu.matmul %85, %86, %cst_29 {dimension_numbers = #tpu.dot_dimension_numbers<[1], [0], [0], [1], [0, 0, 1, 1], [], []>} : vector<16x16xbf16>, vector<16x64xbf16>, vector<16x64xf32> -> vector<16x64xf32>
    %88 = arith.addf %63, %87 : vector<16x64xf32>
    %89 = vector.extract_strided_slice %12 {offsets = [0, 48], sizes = [16, 16], strides = [1, 1]} : vector<16x192xf32> to vector<16x16xf32>
    %90 = arith.truncf %89 : vector<16x16xf32> to vector<16x16xbf16>
    %91 = vector.extract_strided_slice %12 {offsets = [0, 112], sizes = [16, 16], strides = [1, 1]} : vector<16x192xf32> to vector<16x16xf32>
    %92 = arith.truncf %91 : vector<16x16xf32> to vector<16x16xbf16>
    %93 = vector.extract_strided_slice %12 {offsets = [0, 176], sizes = [16, 16], strides = [1, 1]} : vector<16x192xf32> to vector<16x16xf32>
    %94 = arith.truncf %93 : vector<16x16xf32> to vector<16x16xbf16>
    %cst_30 = arith.constant dense<0.000000e+00> : vector<16x16xf32>
    %95 = tpu.matmul %90, %92, %cst_30 {dimension_numbers = #tpu.dot_dimension_numbers<[1], [1], [0], [0], [0, 0, 1, 0], [], []>} : vector<16x16xbf16>, vector<16x16xbf16>, vector<16x16xf32> -> vector<16x16xf32>
    %cst_31 = arith.constant 2.500000e-01 : f32
    %96 = vector.broadcast %cst_31 : f32 to vector<16x16xf32>
    %97 = arith.mulf %95, %96 : vector<16x16xf32>
    %cst_32 = arith.constant dense<0xFF800000> : vector<16xf32>
    %98 = vector.multi_reduction <maximumf>, %97, %cst_32 [1] : vector<16x16xf32> to vector<16xf32>
    %99 = vector.shape_cast %98 : vector<16xf32> to vector<16x1xf32>
    %100 = vector.broadcast %99 : vector<16x1xf32> to vector<16x16xf32>
    %101 = arith.subf %97, %100 : vector<16x16xf32>
    %102 = math.exp %101 : vector<16x16xf32>
    %cst_33 = arith.constant dense<0.000000e+00> : vector<16xf32>
    %103 = vector.multi_reduction <add>, %102, %cst_33 [1] : vector<16x16xf32> to vector<16xf32>
    %104 = vector.shape_cast %103 : vector<16xf32> to vector<16x1xf32>
    %105 = tpu.reciprocal %104 {approx = true} : vector<16x1xf32> -> vector<16x1xf32>
    %106 = vector.broadcast %105 : vector<16x1xf32> to vector<16x16xf32>
    %107 = arith.mulf %102, %106 : vector<16x16xf32>
    %108 = arith.truncf %107 : vector<16x16xf32> to vector<16x16xbf16>
    %cst_34 = arith.constant dense<0.000000e+00> : vector<16x16xf32>
    %109 = tpu.matmul %108, %94, %cst_34 {dimension_numbers = #tpu.dot_dimension_numbers<[1], [0], [0], [1], [0, 0, 1, 1], [], []>} : vector<16x16xbf16>, vector<16x16xbf16>, vector<16x16xf32> -> vector<16x16xf32>
    %110 = arith.truncf %109 : vector<16x16xf32> to vector<16x16xbf16>
    %111 = vector.extract_strided_slice %14 {offsets = [48, 0], sizes = [16, 64], strides = [1, 1]} : vector<64x64xbf16> to vector<16x64xbf16>
    %cst_35 = arith.constant dense<0.000000e+00> : vector<16x64xf32>
    %112 = tpu.matmul %110, %111, %cst_35 {dimension_numbers = #tpu.dot_dimension_numbers<[1], [0], [0], [1], [0, 0, 1, 1], [], []>} : vector<16x16xbf16>, vector<16x64xbf16>, vector<16x64xf32> -> vector<16x64xf32>
    %113 = arith.addf %88, %112 : vector<16x64xf32>
    %c0_36 = arith.constant 0 : index
    %c0_37 = arith.constant 0 : index
    %c0_38 = arith.constant 0 : index
    %114 = vector.load %arg8[%c0_36, %c0_37, %c0_38] : memref<1x1x64xf32, #tpu.memory_space<vmem>>, vector<1x1x64xf32>
    %115 = vector.shape_cast %114 : vector<1x1x64xf32> to vector<1x64xf32>
    %116 = vector.broadcast %115 : vector<1x64xf32> to vector<16x64xf32>
    %117 = arith.addf %113, %116 : vector<16x64xf32>
    %118 = arith.addf %117, %4 : vector<16x64xf32>
    %c0_39 = arith.constant 0 : index
    %c0_40 = arith.constant 0 : index
    %c0_41 = arith.constant 0 : index
    %119 = vector.load %arg9[%c0_39, %c0_40, %c0_41] : memref<1x1x64xf32, #tpu.memory_space<vmem>>, vector<1x1x64xf32>
    %120 = vector.shape_cast %119 : vector<1x1x64xf32> to vector<1x64xf32>
    %c0_42 = arith.constant 0 : index
    %c0_43 = arith.constant 0 : index
    %c0_44 = arith.constant 0 : index
    %121 = vector.load %arg10[%c0_42, %c0_43, %c0_44] : memref<1x1x64xf32, #tpu.memory_space<vmem>>, vector<1x1x64xf32>
    %122 = vector.shape_cast %121 : vector<1x1x64xf32> to vector<1x64xf32>
    %cst_45 = arith.constant dense<0.000000e+00> : vector<16xf32>
    %123 = vector.multi_reduction <add>, %118, %cst_45 [1] : vector<16x64xf32> to vector<16xf32>
    %124 = vector.shape_cast %123 : vector<16xf32> to vector<16x1xf32>
    %cst_46 = arith.constant 6.400000e+01 : f32
    %125 = vector.broadcast %cst_46 : f32 to vector<16x1xf32>
    %126 = arith.divf %124, %125 : vector<16x1xf32>
    %127 = vector.broadcast %126 : vector<16x1xf32> to vector<16x64xf32>
    %128 = arith.subf %118, %127 : vector<16x64xf32>
    %129 = arith.mulf %128, %128 : vector<16x64xf32>
    %cst_47 = arith.constant dense<0.000000e+00> : vector<16xf32>
    %130 = vector.multi_reduction <add>, %129, %cst_47 [1] : vector<16x64xf32> to vector<16xf32>
    %131 = vector.shape_cast %130 : vector<16xf32> to vector<16x1xf32>
    %cst_48 = arith.constant 6.400000e+01 : f32
    %132 = vector.broadcast %cst_48 : f32 to vector<16x1xf32>
    %133 = arith.divf %131, %132 : vector<16x1xf32>
    %134 = vector.broadcast %126 : vector<16x1xf32> to vector<16x64xf32>
    %135 = arith.subf %118, %134 : vector<16x64xf32>
    %cst_49 = arith.constant 9.99999996E-13 : f32
    %136 = vector.broadcast %cst_49 : f32 to vector<16x1xf32>
    %137 = arith.addf %133, %136 : vector<16x1xf32>
    %138 = math.rsqrt %137 : vector<16x1xf32>
    %139 = vector.broadcast %138 : vector<16x1xf32> to vector<16x64xf32>
    %140 = arith.mulf %135, %139 : vector<16x64xf32>
    %141 = vector.broadcast %120 : vector<1x64xf32> to vector<16x64xf32>
    %142 = arith.mulf %140, %141 : vector<16x64xf32>
    %143 = vector.broadcast %122 : vector<1x64xf32> to vector<16x64xf32>
    %144 = arith.addf %142, %143 : vector<16x64xf32>
    %145 = arith.truncf %144 : vector<16x64xf32> to vector<16x64xbf16>
    %c0_50 = arith.constant 0 : index
    %c0_51 = arith.constant 0 : index
    %c0_52 = arith.constant 0 : index
    %146 = vector.load %arg11[%c0_50, %c0_51, %c0_52] : memref<1x64x128xbf16, #tpu.memory_space<vmem>>, vector<1x64x128xbf16>
    %147 = vector.shape_cast %146 : vector<1x64x128xbf16> to vector<64x128xbf16>
    %cst_53 = arith.constant dense<0.000000e+00> : vector<16x128xf32>
    %148 = tpu.matmul %145, %147, %cst_53 {dimension_numbers = #tpu.dot_dimension_numbers<[1], [0], [0], [1], [0, 0, 1, 1], [], []>} : vector<16x64xbf16>, vector<64x128xbf16>, vector<16x128xf32> -> vector<16x128xf32>
    %c0_54 = arith.constant 0 : index
    %c0_55 = arith.constant 0 : index
    %c0_56 = arith.constant 0 : index
    %149 = vector.load %arg12[%c0_54, %c0_55, %c0_56] : memref<1x1x128xf32, #tpu.memory_space<vmem>>, vector<1x1x128xf32>
    %150 = vector.shape_cast %149 : vector<1x1x128xf32> to vector<1x128xf32>
    %151 = vector.broadcast %150 : vector<1x128xf32> to vector<16x128xf32>
    %152 = arith.addf %148, %151 : vector<16x128xf32>
    %cst_57 = arith.constant 5.000000e-01 : f32
    %153 = vector.broadcast %cst_57 : f32 to vector<16x128xf32>
    %154 = arith.mulf %152, %153 : vector<16x128xf32>
    %cst_58 = arith.constant 0.707106769 : f32
    %155 = vector.broadcast %cst_58 : f32 to vector<16x128xf32>
    %156 = arith.mulf %152, %155 : vector<16x128xf32>
    %157 = math.erf %156 : vector<16x128xf32>
    %cst_59 = arith.constant 1.000000e+00 : f32
    %158 = vector.broadcast %cst_59 : f32 to vector<16x128xf32>
    %159 = arith.addf %158, %157 : vector<16x128xf32>
    %160 = arith.mulf %154, %159 : vector<16x128xf32>
    %161 = arith.truncf %160 : vector<16x128xf32> to vector<16x128xbf16>
    %c0_60 = arith.constant 0 : index
    %c0_61 = arith.constant 0 : index
    %c0_62 = arith.constant 0 : index
    %162 = vector.load %arg13[%c0_60, %c0_61, %c0_62] : memref<1x128x64xbf16, #tpu.memory_space<vmem>>, vector<1x128x64xbf16>
    %163 = vector.shape_cast %162 : vector<1x128x64xbf16> to vector<128x64xbf16>
    %cst_63 = arith.constant dense<0.000000e+00> : vector<16x64xf32>
    %164 = tpu.matmul %161, %163, %cst_63 {dimension_numbers = #tpu.dot_dimension_numbers<[1], [0], [0], [1], [0, 0, 1, 1], [], []>} : vector<16x128xbf16>, vector<128x64xbf16>, vector<16x64xf32> -> vector<16x64xf32>
    %c0_64 = arith.constant 0 : index
    %c0_65 = arith.constant 0 : index
    %c0_66 = arith.constant 0 : index
    %165 = vector.load %arg14[%c0_64, %c0_65, %c0_66] : memref<1x1x64xf32, #tpu.memory_space<vmem>>, vector<1x1x64xf32>
    %166 = vector.shape_cast %165 : vector<1x1x64xf32> to vector<1x64xf32>
    %167 = vector.broadcast %166 : vector<1x64xf32> to vector<16x64xf32>
    %168 = arith.addf %164, %167 : vector<16x64xf32>
    %169 = arith.addf %168, %144 : vector<16x64xf32>
    %c0_67 = arith.constant 0 : index
    %c0_68 = arith.constant 0 : index
    %c0_69 = arith.constant 0 : index
    %170 = vector.load %arg15[%c0_67, %c0_68, %c0_69] : memref<1x1x64xf32, #tpu.memory_space<vmem>>, vector<1x1x64xf32>
    %171 = vector.shape_cast %170 : vector<1x1x64xf32> to vector<1x64xf32>
    %c0_70 = arith.constant 0 : index
    %c0_71 = arith.constant 0 : index
    %c0_72 = arith.constant 0 : index
    %172 = vector.load %arg16[%c0_70, %c0_71, %c0_72] : memref<1x1x64xf32, #tpu.memory_space<vmem>>, vector<1x1x64xf32>
    %173 = vector.shape_cast %172 : vector<1x1x64xf32> to vector<1x64xf32>
    %cst_73 = arith.constant dense<0.000000e+00> : vector<16xf32>
    %174 = vector.multi_reduction <add>, %169, %cst_73 [1] : vector<16x64xf32> to vector<16xf32>
    %175 = vector.shape_cast %174 : vector<16xf32> to vector<16x1xf32>
    %cst_74 = arith.constant 6.400000e+01 : f32
    %176 = vector.broadcast %cst_74 : f32 to vector<16x1xf32>
    %177 = arith.divf %175, %176 : vector<16x1xf32>
    %178 = vector.broadcast %177 : vector<16x1xf32> to vector<16x64xf32>
    %179 = arith.subf %169, %178 : vector<16x64xf32>
    %180 = arith.mulf %179, %179 : vector<16x64xf32>
    %cst_75 = arith.constant dense<0.000000e+00> : vector<16xf32>
    %181 = vector.multi_reduction <add>, %180, %cst_75 [1] : vector<16x64xf32> to vector<16xf32>
    %182 = vector.shape_cast %181 : vector<16xf32> to vector<16x1xf32>
    %cst_76 = arith.constant 6.400000e+01 : f32
    %183 = vector.broadcast %cst_76 : f32 to vector<16x1xf32>
    %184 = arith.divf %182, %183 : vector<16x1xf32>
    %185 = vector.broadcast %177 : vector<16x1xf32> to vector<16x64xf32>
    %186 = arith.subf %169, %185 : vector<16x64xf32>
    %cst_77 = arith.constant 9.99999996E-13 : f32
    %187 = vector.broadcast %cst_77 : f32 to vector<16x1xf32>
    %188 = arith.addf %184, %187 : vector<16x1xf32>
    %189 = math.rsqrt %188 : vector<16x1xf32>
    %190 = vector.broadcast %189 : vector<16x1xf32> to vector<16x64xf32>
    %191 = arith.mulf %186, %190 : vector<16x64xf32>
    %192 = vector.broadcast %171 : vector<1x64xf32> to vector<16x64xf32>
    %193 = arith.mulf %191, %192 : vector<16x64xf32>
    %194 = vector.broadcast %173 : vector<1x64xf32> to vector<16x64xf32>
    %195 = arith.addf %193, %194 : vector<16x64xf32>
    %c0_78 = arith.constant 0 : index
    %c0_79 = arith.constant 0 : index
    %c0_80 = arith.constant 0 : index
    %196 = vector.load %arg17[%c0_78, %c0_79, %c0_80] : memref<1x16x64xf32, #tpu.memory_space<vmem>>, vector<1x16x64xf32>
    %197 = vector.shape_cast %196 : vector<1x16x64xf32> to vector<16x64xf32>
    %198 = vector.shape_cast %195 : vector<16x64xf32> to vector<1x16x64xf32>
    tpu.vector_store %arg17[%c0_78, %c0_79, %c0_80], %198 {strides = array<i32>} : memref<1x16x64xf32, #tpu.memory_space<vmem>>, vector<1x16x64xf32>,
    return
  }
  func.func @transform_0(%arg0: i32, %arg1: i32) -> (i32, i32, i32) {
    %c0_i32 = arith.constant 0 : i32
    %c0_i32_0 = arith.constant 0 : i32
    %c0_i32_1 = arith.constant 0 : i32
    return %arg0, %c0_i32, %c0_i32_0 : i32, i32, i32
  }
  func.func @transform_1(%arg0: i32, %arg1: i32) -> (i32, i32) {
    %c0_i32 = arith.constant 0 : i32
    %c0_i32_0 = arith.constant 0 : i32
    %c0_i32_1 = arith.constant 0 : i32
    return %c0_i32, %c0_i32_0 : i32, i32
  }
  func.func @transform_2(%arg0: i32, %arg1: i32) -> (i32, i32) {
    %c0_i32 = arith.constant 0 : i32
    %c0_i32_0 = arith.constant 0 : i32
    %c0_i32_1 = arith.constant 0 : i32
    return %c0_i32, %c0_i32_0 : i32, i32
  }
  func.func @transform_3(%arg0: i32, %arg1: i32) -> (i32, i32, i32) {
    %c0_i32 = arith.constant 0 : i32
    %c0_i32_0 = arith.constant 0 : i32
    %c0_i32_1 = arith.constant 0 : i32
    return %arg1, %c0_i32, %c0_i32_0 : i32, i32, i32
  }
  func.func @transform_4(%arg0: i32, %arg1: i32) -> (i32, i32, i32) {
    %c0_i32 = arith.constant 0 : i32
    %c0_i32_0 = arith.constant 0 : i32
    %c0_i32_1 = arith.constant 0 : i32
    return %arg1, %c0_i32, %c0_i32_0 : i32, i32, i32
  }
  func.func @transform_5(%arg0: i32, %arg1: i32) -> (i32, i32, i32) {
    %c0_i32 = arith.constant 0 : i32
    %c0_i32_0 = arith.constant 0 : i32
    %c0_i32_1 = arith.constant 0 : i32
    return %arg1, %c0_i32, %c0_i32_0 : i32, i32, i32
  }
  func.func @transform_6(%arg0: i32, %arg1: i32) -> (i32, i32, i32) {
    %c0_i32 = arith.constant 0 : i32
    %c0_i32_0 = arith.constant 0 : i32
    %c0_i32_1 = arith.constant 0 : i32
    return %arg1, %c0_i32, %c0_i32_0 : i32, i32, i32
  }
  func.func @transform_7(%arg0: i32, %arg1: i32) -> (i32, i32, i32) {
    %c0_i32 = arith.constant 0 : i32
    %c0_i32_0 = arith.constant 0 : i32
    %c0_i32_1 = arith.constant 0 : i32
    return %arg1, %c0_i32, %c0_i32_0 : i32, i32, i32
  }
  func.func @transform_8(%arg0: i32, %arg1: i32) -> (i32, i32, i32) {
    %c0_i32 = arith.constant 0 : i32
    %c0_i32_0 = arith.constant 0 : i32
    %c0_i32_1 = arith.constant 0 : i32
    return %arg1, %c0_i32, %c0_i32_0 : i32, i32, i32
  }
  func.func @transform_9(%arg0: i32, %arg1: i32) -> (i32, i32, i32) {
    %c0_i32 = arith.constant 0 : i32
    %c0_i32_0 = arith.constant 0 : i32
    %c0_i32_1 = arith.constant 0 : i32
    return %arg1, %c0_i32, %c0_i32_0 : i32, i32, i32
  }
  func.func @transform_10(%arg0: i32, %arg1: i32) -> (i32, i32, i32) {
    %c0_i32 = arith.constant 0 : i32
    %c0_i32_0 = arith.constant 0 : i32
    %c0_i32_1 = arith.constant 0 : i32
    return %arg1, %c0_i32, %c0_i32_0 : i32, i32, i32
  }
  func.func @transform_11(%arg0: i32, %arg1: i32) -> (i32, i32, i32) {
    %c0_i32 = arith.constant 0 : i32
    %c0_i32_0 = arith.constant 0 : i32
    %c0_i32_1 = arith.constant 0 : i32
    return %arg1, %c0_i32, %c0_i32_0 : i32, i32, i32
  }
  func.func @transform_12(%arg0: i32, %arg1: i32) -> (i32, i32, i32) {
    %c0_i32 = arith.constant 0 : i32
    %c0_i32_0 = arith.constant 0 : i32
    %c0_i32_1 = arith.constant 0 : i32
    return %arg1, %c0_i32, %c0_i32_0 : i32, i32, i32
  }
  func.func @transform_13(%arg0: i32, %arg1: i32) -> (i32, i32, i32) {
    %c0_i32 = arith.constant 0 : i32
    %c0_i32_0 = arith.constant 0 : i32
    %c0_i32_1 = arith.constant 0 : i32
    return %arg1, %c0_i32, %c0_i32_0 : i32, i32, i32
  }
  func.func @transform_14(%arg0: i32, %arg1: i32) -> (i32, i32, i32) {
    %c0_i32 = arith.constant 0 : i32
    %c0_i32_0 = arith.constant 0 : i32
    %c0_i32_1 = arith.constant 0 : i32
    return %arg1, %c0_i32, %c0_i32_0 : i32, i32, i32
  }
  func.func @transform_15(%arg0: i32, %arg1: i32) -> (i32, i32, i32) {
    %c0_i32 = arith.constant 0 : i32
    %c0_i32_0 = arith.constant 0 : i32
    %c0_i32_1 = arith.constant 0 : i32
    return %arg0, %c0_i32, %c0_i32_0 : i32, i32, i32
  }
}

module attributes {stable_mosaic.version = 11 : i64} {
  func.func @_decoder_stack_kernel(%arg0: i32, %arg1: i32, %arg2: memref<1x8x64xf32, #tpu.memory_space<vmem>>, %arg3: memref<1x16x64xf32, #tpu.memory_space<vmem>>, %arg4: memref<1x8x1xf32, #tpu.memory_space<vmem>>, %arg5: memref<1x1x8xf32, #tpu.memory_space<vmem>>, %arg6: memref<1x1x16xf32, #tpu.memory_space<vmem>>, %arg7: memref<64x128xbf16, #tpu.memory_space<vmem>>, %arg8: memref<1x64x192xbf16, #tpu.memory_space<vmem>>, %arg9: memref<1x1x192xf32, #tpu.memory_space<vmem>>, %arg10: memref<1x64x64xbf16, #tpu.memory_space<vmem>>, %arg11: memref<1x1x64xf32, #tpu.memory_space<vmem>>, %arg12: memref<1x1x64xf32, #tpu.memory_space<vmem>>, %arg13: memref<1x1x64xf32, #tpu.memory_space<vmem>>, %arg14: memref<1x64x64xbf16, #tpu.memory_space<vmem>>, %arg15: memref<1x1x64xf32, #tpu.memory_space<vmem>>, %arg16: memref<1x64x128xbf16, #tpu.memory_space<vmem>>, %arg17: memref<1x1x128xf32, #tpu.memory_space<vmem>>, %arg18: memref<1x64x64xbf16, #tpu.memory_space<vmem>>, %arg19: memref<1x1x64xf32, #tpu.memory_space<vmem>>, %arg20: memref<1x1x64xf32, #tpu.memory_space<vmem>>, %arg21: memref<1x1x64xf32, #tpu.memory_space<vmem>>, %arg22: memref<1x64x128xbf16, #tpu.memory_space<vmem>>, %arg23: memref<1x1x128xf32, #tpu.memory_space<vmem>>, %arg24: memref<1x128x64xbf16, #tpu.memory_space<vmem>>, %arg25: memref<1x1x64xf32, #tpu.memory_space<vmem>>, %arg26: memref<1x1x64xf32, #tpu.memory_space<vmem>>, %arg27: memref<1x1x64xf32, #tpu.memory_space<vmem>>, %arg28: memref<1x8x128xf32, #tpu.memory_space<vmem>>, %arg29: memref<8x64xf32, #tpu.memory_space<vmem>>) attributes {dimension_semantics = [#tpu.dimension_semantics<parallel>, #tpu.dimension_semantics<arbitrary>], iteration_bounds = array<i64: 2, 2>, scalar_prefetch = 0 : i64, scratch_operands = 1 : i64, tpu.core_type = #tpu.core_type<tc>, window_params = [{transform_indices = @transform_0, window_bounds = array<i64: 1, 8, 64>}, {transform_indices = @transform_1, window_bounds = array<i64: 1, 16, 64>}, {transform_indices = @transform_2, window_bounds = array<i64: 1, 8, 1>}, {transform_indices = @transform_3, window_bounds = array<i64: 1, 1, 8>}, {transform_indices = @transform_4, window_bounds = array<i64: 1, 1, 16>}, {pipeline_mode = #tpu.pipeline_mode<synchronous>, transform_indices = @transform_5, window_bounds = array<i64: 64, 128>}, {transform_indices = @transform_6, window_bounds = array<i64: 1, 64, 192>}, {transform_indices = @transform_7, window_bounds = array<i64: 1, 1, 192>}, {transform_indices = @transform_8, window_bounds = array<i64: 1, 64, 64>}, {transform_indices = @transform_9, window_bounds = array<i64: 1, 1, 64>}, {transform_indices = @transform_10, window_bounds = array<i64: 1, 1, 64>}, {transform_indices = @transform_11, window_bounds = array<i64: 1, 1, 64>}, {transform_indices = @transform_12, window_bounds = array<i64: 1, 64, 64>}, {transform_indices = @transform_13, window_bounds = array<i64: 1, 1, 64>}, {transform_indices = @transform_14, window_bounds = array<i64: 1, 64, 128>}, {transform_indices = @transform_15, window_bounds = array<i64: 1, 1, 128>}, {transform_indices = @transform_16, window_bounds = array<i64: 1, 64, 64>}, {transform_indices = @transform_17, window_bounds = array<i64: 1, 1, 64>}, {transform_indices = @transform_18, window_bounds = array<i64: 1, 1, 64>}, {transform_indices = @transform_19, window_bounds = array<i64: 1, 1, 64>}, {transform_indices = @transform_20, window_bounds = array<i64: 1, 64, 128>}, {transform_indices = @transform_21, window_bounds = array<i64: 1, 1, 128>}, {transform_indices = @transform_22, window_bounds = array<i64: 1, 128, 64>}, {transform_indices = @transform_23, window_bounds = array<i64: 1, 1, 64>}, {transform_indices = @transform_24, window_bounds = array<i64: 1, 1, 64>}, {transform_indices = @transform_25, window_bounds = array<i64: 1, 1, 64>}, {transform_indices = @transform_26, window_bounds = array<i64: 1, 8, 128>}]} {
    %c0_i32 = arith.constant 0 : i32
    %0 = arith.cmpi eq, %arg1, %c0_i32 : i32
    %1 = arith.extui %0 : i1 to i32
    %c0_i32_0 = arith.constant 0 : i32
    %2 = arith.cmpi ne, %1, %c0_i32_0 : i32
    scf.if %2 {
      %c0_146 = arith.constant 0 : index
      %c0_147 = arith.constant 0 : index
      %c0_148 = arith.constant 0 : index
      %376 = vector.load %arg2[%c0_146, %c0_147, %c0_148] : memref<1x8x64xf32, #tpu.memory_space<vmem>>, vector<1x8x64xf32>
      %377 = vector.shape_cast %376 : vector<1x8x64xf32> to vector<8x64xf32>
      %c0_149 = arith.constant 0 : index
      %c0_150 = arith.constant 0 : index
      %378 = vector.load %arg29[%c0_149, %c0_150] : memref<8x64xf32, #tpu.memory_space<vmem>>, vector<8x64xf32>
      tpu.vector_store %arg29[%c0_149, %c0_150], %377 {strides = array<i32>} : memref<8x64xf32, #tpu.memory_space<vmem>>, vector<8x64xf32>,
    } else {
    }
    %c0 = arith.constant 0 : index
    %c0_1 = arith.constant 0 : index
    %3 = vector.load %arg29[%c0, %c0_1] : memref<8x64xf32, #tpu.memory_space<vmem>>, vector<8x64xf32>
    %c0_2 = arith.constant 0 : index
    %c0_3 = arith.constant 0 : index
    %c0_4 = arith.constant 0 : index
    %4 = vector.load %arg4[%c0_2, %c0_3, %c0_4] : memref<1x8x1xf32, #tpu.memory_space<vmem>>, vector<1x8x1xf32>
    %5 = vector.shape_cast %4 : vector<1x8x1xf32> to vector<8x1xf32>
    %6 = tpu.iota {dimensions = array<i32: 0>} : vector<8x8xi32>
    %7 = tpu.iota {dimensions = array<i32: 1>} : vector<8x8xi32>
    %8 = arith.cmpi sgt, %7, %6 : vector<8x8xi32>
    %9 = arith.extui %8 : vector<8x8xi1> to vector<8x8xi32>
    %10 = arith.sitofp %9 : vector<8x8xi32> to vector<8x8xf32>
    %cst = arith.constant -1.000000e+30 : f32
    %11 = vector.broadcast %cst : f32 to vector<8x8xf32>
    %12 = arith.mulf %10, %11 : vector<8x8xf32>
    %c0_5 = arith.constant 0 : index
    %c0_6 = arith.constant 0 : index
    %c0_7 = arith.constant 0 : index
    %13 = vector.load %arg5[%c0_5, %c0_6, %c0_7] : memref<1x1x8xf32, #tpu.memory_space<vmem>>, vector<1x1x8xf32>
    %14 = vector.shape_cast %13 : vector<1x1x8xf32> to vector<1x8xf32>
    %15 = vector.broadcast %14 : vector<1x8xf32> to vector<8x8xf32>
    %16 = arith.addf %12, %15 : vector<8x8xf32>
    %c0_8 = arith.constant 0 : index
    %c0_9 = arith.constant 0 : index
    %c0_10 = arith.constant 0 : index
    %17 = vector.load %arg6[%c0_8, %c0_9, %c0_10] : memref<1x1x16xf32, #tpu.memory_space<vmem>>, vector<1x1x16xf32>
    %18 = vector.shape_cast %17 : vector<1x1x16xf32> to vector<1x16xf32>
    %19 = arith.truncf %3 : vector<8x64xf32> to vector<8x64xbf16>
    %c0_11 = arith.constant 0 : index
    %c0_12 = arith.constant 0 : index
    %c0_13 = arith.constant 0 : index
    %20 = vector.load %arg8[%c0_11, %c0_12, %c0_13] : memref<1x64x192xbf16, #tpu.memory_space<vmem>>, vector<1x64x192xbf16>
    %21 = vector.shape_cast %20 : vector<1x64x192xbf16> to vector<64x192xbf16>
    %cst_14 = arith.constant dense<0.000000e+00> : vector<8x192xf32>
    %22 = tpu.matmul %19, %21, %cst_14 {dimension_numbers = #tpu.dot_dimension_numbers<[1], [0], [0], [1], [0, 0, 1, 1], [], []>} : vector<8x64xbf16>, vector<64x192xbf16>, vector<8x192xf32> -> vector<8x192xf32>
    %c0_15 = arith.constant 0 : index
    %c0_16 = arith.constant 0 : index
    %c0_17 = arith.constant 0 : index
    %23 = vector.load %arg9[%c0_15, %c0_16, %c0_17] : memref<1x1x192xf32, #tpu.memory_space<vmem>>, vector<1x1x192xf32>
    %24 = vector.shape_cast %23 : vector<1x1x192xf32> to vector<1x192xf32>
    %25 = vector.broadcast %24 : vector<1x192xf32> to vector<8x192xf32>
    %26 = arith.addf %22, %25 : vector<8x192xf32>
    %c0_18 = arith.constant 0 : index
    %c0_19 = arith.constant 0 : index
    %c0_20 = arith.constant 0 : index
    %27 = vector.load %arg10[%c0_18, %c0_19, %c0_20] : memref<1x64x64xbf16, #tpu.memory_space<vmem>>, vector<1x64x64xbf16>
    %28 = vector.shape_cast %27 : vector<1x64x64xbf16> to vector<64x64xbf16>
    %29 = vector.extract_strided_slice %26 {offsets = [0, 0], sizes = [8, 16], strides = [1, 1]} : vector<8x192xf32> to vector<8x16xf32>
    %30 = arith.truncf %29 : vector<8x16xf32> to vector<8x16xbf16>
    %31 = vector.extract_strided_slice %26 {offsets = [0, 64], sizes = [8, 16], strides = [1, 1]} : vector<8x192xf32> to vector<8x16xf32>
    %32 = arith.truncf %31 : vector<8x16xf32> to vector<8x16xbf16>
    %33 = vector.extract_strided_slice %26 {offsets = [0, 128], sizes = [8, 16], strides = [1, 1]} : vector<8x192xf32> to vector<8x16xf32>
    %34 = arith.truncf %33 : vector<8x16xf32> to vector<8x16xbf16>
    %cst_21 = arith.constant dense<0.000000e+00> : vector<8x8xf32>
    %35 = tpu.matmul %30, %32, %cst_21 {dimension_numbers = #tpu.dot_dimension_numbers<[1], [1], [0], [0], [0, 0, 1, 0], [], []>} : vector<8x16xbf16>, vector<8x16xbf16>, vector<8x8xf32> -> vector<8x8xf32>
    %cst_22 = arith.constant 2.500000e-01 : f32
    %36 = vector.broadcast %cst_22 : f32 to vector<8x8xf32>
    %37 = arith.mulf %35, %36 : vector<8x8xf32>
    %38 = arith.addf %37, %16 : vector<8x8xf32>
    %cst_23 = arith.constant dense<0xFF800000> : vector<8xf32>
    %39 = vector.multi_reduction <maximumf>, %38, %cst_23 [1] : vector<8x8xf32> to vector<8xf32>
    %40 = vector.shape_cast %39 : vector<8xf32> to vector<8x1xf32>
    %41 = vector.broadcast %40 : vector<8x1xf32> to vector<8x8xf32>
    %42 = arith.subf %38, %41 : vector<8x8xf32>
    %43 = math.exp %42 : vector<8x8xf32>
    %cst_24 = arith.constant dense<0.000000e+00> : vector<8xf32>
    %44 = vector.multi_reduction <add>, %43, %cst_24 [1] : vector<8x8xf32> to vector<8xf32>
    %45 = vector.shape_cast %44 : vector<8xf32> to vector<8x1xf32>
    %46 = tpu.reciprocal %45 {approx = true} : vector<8x1xf32> -> vector<8x1xf32>
    %47 = vector.broadcast %46 : vector<8x1xf32> to vector<8x8xf32>
    %48 = arith.mulf %43, %47 : vector<8x8xf32>
    %49 = arith.truncf %48 : vector<8x8xf32> to vector<8x8xbf16>
    %cst_25 = arith.constant dense<0.000000e+00> : vector<8x16xf32>
    %50 = tpu.matmul %49, %34, %cst_25 {dimension_numbers = #tpu.dot_dimension_numbers<[1], [0], [0], [1], [0, 0, 1, 1], [], []>} : vector<8x8xbf16>, vector<8x16xbf16>, vector<8x16xf32> -> vector<8x16xf32>
    %51 = arith.truncf %50 : vector<8x16xf32> to vector<8x16xbf16>
    %52 = vector.extract_strided_slice %28 {offsets = [0, 0], sizes = [16, 64], strides = [1, 1]} : vector<64x64xbf16> to vector<16x64xbf16>
    %cst_26 = arith.constant dense<0.000000e+00> : vector<8x64xf32>
    %53 = tpu.matmul %51, %52, %cst_26 {dimension_numbers = #tpu.dot_dimension_numbers<[1], [0], [0], [1], [0, 0, 1, 1], [], []>} : vector<8x16xbf16>, vector<16x64xbf16>, vector<8x64xf32> -> vector<8x64xf32>
    %54 = vector.extract_strided_slice %26 {offsets = [0, 16], sizes = [8, 16], strides = [1, 1]} : vector<8x192xf32> to vector<8x16xf32>
    %55 = arith.truncf %54 : vector<8x16xf32> to vector<8x16xbf16>
    %56 = vector.extract_strided_slice %26 {offsets = [0, 80], sizes = [8, 16], strides = [1, 1]} : vector<8x192xf32> to vector<8x16xf32>
    %57 = arith.truncf %56 : vector<8x16xf32> to vector<8x16xbf16>
    %58 = vector.extract_strided_slice %26 {offsets = [0, 144], sizes = [8, 16], strides = [1, 1]} : vector<8x192xf32> to vector<8x16xf32>
    %59 = arith.truncf %58 : vector<8x16xf32> to vector<8x16xbf16>
    %cst_27 = arith.constant dense<0.000000e+00> : vector<8x8xf32>
    %60 = tpu.matmul %55, %57, %cst_27 {dimension_numbers = #tpu.dot_dimension_numbers<[1], [1], [0], [0], [0, 0, 1, 0], [], []>} : vector<8x16xbf16>, vector<8x16xbf16>, vector<8x8xf32> -> vector<8x8xf32>
    %cst_28 = arith.constant 2.500000e-01 : f32
    %61 = vector.broadcast %cst_28 : f32 to vector<8x8xf32>
    %62 = arith.mulf %60, %61 : vector<8x8xf32>
    %63 = arith.addf %62, %16 : vector<8x8xf32>
    %cst_29 = arith.constant dense<0xFF800000> : vector<8xf32>
    %64 = vector.multi_reduction <maximumf>, %63, %cst_29 [1] : vector<8x8xf32> to vector<8xf32>
    %65 = vector.shape_cast %64 : vector<8xf32> to vector<8x1xf32>
    %66 = vector.broadcast %65 : vector<8x1xf32> to vector<8x8xf32>
    %67 = arith.subf %63, %66 : vector<8x8xf32>
    %68 = math.exp %67 : vector<8x8xf32>
    %cst_30 = arith.constant dense<0.000000e+00> : vector<8xf32>
    %69 = vector.multi_reduction <add>, %68, %cst_30 [1] : vector<8x8xf32> to vector<8xf32>
    %70 = vector.shape_cast %69 : vector<8xf32> to vector<8x1xf32>
    %71 = tpu.reciprocal %70 {approx = true} : vector<8x1xf32> -> vector<8x1xf32>
    %72 = vector.broadcast %71 : vector<8x1xf32> to vector<8x8xf32>
    %73 = arith.mulf %68, %72 : vector<8x8xf32>
    %74 = arith.truncf %73 : vector<8x8xf32> to vector<8x8xbf16>
    %cst_31 = arith.constant dense<0.000000e+00> : vector<8x16xf32>
    %75 = tpu.matmul %74, %59, %cst_31 {dimension_numbers = #tpu.dot_dimension_numbers<[1], [0], [0], [1], [0, 0, 1, 1], [], []>} : vector<8x8xbf16>, vector<8x16xbf16>, vector<8x16xf32> -> vector<8x16xf32>
    %76 = arith.truncf %75 : vector<8x16xf32> to vector<8x16xbf16>
    %77 = vector.extract_strided_slice %28 {offsets = [16, 0], sizes = [16, 64], strides = [1, 1]} : vector<64x64xbf16> to vector<16x64xbf16>
    %cst_32 = arith.constant dense<0.000000e+00> : vector<8x64xf32>
    %78 = tpu.matmul %76, %77, %cst_32 {dimension_numbers = #tpu.dot_dimension_numbers<[1], [0], [0], [1], [0, 0, 1, 1], [], []>} : vector<8x16xbf16>, vector<16x64xbf16>, vector<8x64xf32> -> vector<8x64xf32>
    %79 = arith.addf %53, %78 : vector<8x64xf32>
    %80 = vector.extract_strided_slice %26 {offsets = [0, 32], sizes = [8, 16], strides = [1, 1]} : vector<8x192xf32> to vector<8x16xf32>
    %81 = arith.truncf %80 : vector<8x16xf32> to vector<8x16xbf16>
    %82 = vector.extract_strided_slice %26 {offsets = [0, 96], sizes = [8, 16], strides = [1, 1]} : vector<8x192xf32> to vector<8x16xf32>
    %83 = arith.truncf %82 : vector<8x16xf32> to vector<8x16xbf16>
    %84 = vector.extract_strided_slice %26 {offsets = [0, 160], sizes = [8, 16], strides = [1, 1]} : vector<8x192xf32> to vector<8x16xf32>
    %85 = arith.truncf %84 : vector<8x16xf32> to vector<8x16xbf16>
    %cst_33 = arith.constant dense<0.000000e+00> : vector<8x8xf32>
    %86 = tpu.matmul %81, %83, %cst_33 {dimension_numbers = #tpu.dot_dimension_numbers<[1], [1], [0], [0], [0, 0, 1, 0], [], []>} : vector<8x16xbf16>, vector<8x16xbf16>, vector<8x8xf32> -> vector<8x8xf32>
    %cst_34 = arith.constant 2.500000e-01 : f32
    %87 = vector.broadcast %cst_34 : f32 to vector<8x8xf32>
    %88 = arith.mulf %86, %87 : vector<8x8xf32>
    %89 = arith.addf %88, %16 : vector<8x8xf32>
    %cst_35 = arith.constant dense<0xFF800000> : vector<8xf32>
    %90 = vector.multi_reduction <maximumf>, %89, %cst_35 [1] : vector<8x8xf32> to vector<8xf32>
    %91 = vector.shape_cast %90 : vector<8xf32> to vector<8x1xf32>
    %92 = vector.broadcast %91 : vector<8x1xf32> to vector<8x8xf32>
    %93 = arith.subf %89, %92 : vector<8x8xf32>
    %94 = math.exp %93 : vector<8x8xf32>
    %cst_36 = arith.constant dense<0.000000e+00> : vector<8xf32>
    %95 = vector.multi_reduction <add>, %94, %cst_36 [1] : vector<8x8xf32> to vector<8xf32>
    %96 = vector.shape_cast %95 : vector<8xf32> to vector<8x1xf32>
    %97 = tpu.reciprocal %96 {approx = true} : vector<8x1xf32> -> vector<8x1xf32>
    %98 = vector.broadcast %97 : vector<8x1xf32> to vector<8x8xf32>
    %99 = arith.mulf %94, %98 : vector<8x8xf32>
    %100 = arith.truncf %99 : vector<8x8xf32> to vector<8x8xbf16>
    %cst_37 = arith.constant dense<0.000000e+00> : vector<8x16xf32>
    %101 = tpu.matmul %100, %85, %cst_37 {dimension_numbers = #tpu.dot_dimension_numbers<[1], [0], [0], [1], [0, 0, 1, 1], [], []>} : vector<8x8xbf16>, vector<8x16xbf16>, vector<8x16xf32> -> vector<8x16xf32>
    %102 = arith.truncf %101 : vector<8x16xf32> to vector<8x16xbf16>
    %103 = vector.extract_strided_slice %28 {offsets = [32, 0], sizes = [16, 64], strides = [1, 1]} : vector<64x64xbf16> to vector<16x64xbf16>
    %cst_38 = arith.constant dense<0.000000e+00> : vector<8x64xf32>
    %104 = tpu.matmul %102, %103, %cst_38 {dimension_numbers = #tpu.dot_dimension_numbers<[1], [0], [0], [1], [0, 0, 1, 1], [], []>} : vector<8x16xbf16>, vector<16x64xbf16>, vector<8x64xf32> -> vector<8x64xf32>
    %105 = arith.addf %79, %104 : vector<8x64xf32>
    %106 = vector.extract_strided_slice %26 {offsets = [0, 48], sizes = [8, 16], strides = [1, 1]} : vector<8x192xf32> to vector<8x16xf32>
    %107 = arith.truncf %106 : vector<8x16xf32> to vector<8x16xbf16>
    %108 = vector.extract_strided_slice %26 {offsets = [0, 112], sizes = [8, 16], strides = [1, 1]} : vector<8x192xf32> to vector<8x16xf32>
    %109 = arith.truncf %108 : vector<8x16xf32> to vector<8x16xbf16>
    %110 = vector.extract_strided_slice %26 {offsets = [0, 176], sizes = [8, 16], strides = [1, 1]} : vector<8x192xf32> to vector<8x16xf32>
    %111 = arith.truncf %110 : vector<8x16xf32> to vector<8x16xbf16>
    %cst_39 = arith.constant dense<0.000000e+00> : vector<8x8xf32>
    %112 = tpu.matmul %107, %109, %cst_39 {dimension_numbers = #tpu.dot_dimension_numbers<[1], [1], [0], [0], [0, 0, 1, 0], [], []>} : vector<8x16xbf16>, vector<8x16xbf16>, vector<8x8xf32> -> vector<8x8xf32>
    %cst_40 = arith.constant 2.500000e-01 : f32
    %113 = vector.broadcast %cst_40 : f32 to vector<8x8xf32>
    %114 = arith.mulf %112, %113 : vector<8x8xf32>
    %115 = arith.addf %114, %16 : vector<8x8xf32>
    %cst_41 = arith.constant dense<0xFF800000> : vector<8xf32>
    %116 = vector.multi_reduction <maximumf>, %115, %cst_41 [1] : vector<8x8xf32> to vector<8xf32>
    %117 = vector.shape_cast %116 : vector<8xf32> to vector<8x1xf32>
    %118 = vector.broadcast %117 : vector<8x1xf32> to vector<8x8xf32>
    %119 = arith.subf %115, %118 : vector<8x8xf32>
    %120 = math.exp %119 : vector<8x8xf32>
    %cst_42 = arith.constant dense<0.000000e+00> : vector<8xf32>
    %121 = vector.multi_reduction <add>, %120, %cst_42 [1] : vector<8x8xf32> to vector<8xf32>
    %122 = vector.shape_cast %121 : vector<8xf32> to vector<8x1xf32>
    %123 = tpu.reciprocal %122 {approx = true} : vector<8x1xf32> -> vector<8x1xf32>
    %124 = vector.broadcast %123 : vector<8x1xf32> to vector<8x8xf32>
    %125 = arith.mulf %120, %124 : vector<8x8xf32>
    %126 = arith.truncf %125 : vector<8x8xf32> to vector<8x8xbf16>
    %cst_43 = arith.constant dense<0.000000e+00> : vector<8x16xf32>
    %127 = tpu.matmul %126, %111, %cst_43 {dimension_numbers = #tpu.dot_dimension_numbers<[1], [0], [0], [1], [0, 0, 1, 1], [], []>} : vector<8x8xbf16>, vector<8x16xbf16>, vector<8x16xf32> -> vector<8x16xf32>
    %128 = arith.truncf %127 : vector<8x16xf32> to vector<8x16xbf16>
    %129 = vector.extract_strided_slice %28 {offsets = [48, 0], sizes = [16, 64], strides = [1, 1]} : vector<64x64xbf16> to vector<16x64xbf16>
    %cst_44 = arith.constant dense<0.000000e+00> : vector<8x64xf32>
    %130 = tpu.matmul %128, %129, %cst_44 {dimension_numbers = #tpu.dot_dimension_numbers<[1], [0], [0], [1], [0, 0, 1, 1], [], []>} : vector<8x16xbf16>, vector<16x64xbf16>, vector<8x64xf32> -> vector<8x64xf32>
    %131 = arith.addf %105, %130 : vector<8x64xf32>
    %c0_45 = arith.constant 0 : index
    %c0_46 = arith.constant 0 : index
    %c0_47 = arith.constant 0 : index
    %132 = vector.load %arg11[%c0_45, %c0_46, %c0_47] : memref<1x1x64xf32, #tpu.memory_space<vmem>>, vector<1x1x64xf32>
    %133 = vector.shape_cast %132 : vector<1x1x64xf32> to vector<1x64xf32>
    %134 = vector.broadcast %133 : vector<1x64xf32> to vector<8x64xf32>
    %135 = arith.addf %131, %134 : vector<8x64xf32>
    %136 = arith.addf %135, %3 : vector<8x64xf32>
    %c0_48 = arith.constant 0 : index
    %c0_49 = arith.constant 0 : index
    %c0_50 = arith.constant 0 : index
    %137 = vector.load %arg12[%c0_48, %c0_49, %c0_50] : memref<1x1x64xf32, #tpu.memory_space<vmem>>, vector<1x1x64xf32>
    %138 = vector.shape_cast %137 : vector<1x1x64xf32> to vector<1x64xf32>
    %c0_51 = arith.constant 0 : index
    %c0_52 = arith.constant 0 : index
    %c0_53 = arith.constant 0 : index
    %139 = vector.load %arg13[%c0_51, %c0_52, %c0_53] : memref<1x1x64xf32, #tpu.memory_space<vmem>>, vector<1x1x64xf32>
    %140 = vector.shape_cast %139 : vector<1x1x64xf32> to vector<1x64xf32>
    %cst_54 = arith.constant dense<0.000000e+00> : vector<8xf32>
    %141 = vector.multi_reduction <add>, %136, %cst_54 [1] : vector<8x64xf32> to vector<8xf32>
    %142 = vector.shape_cast %141 : vector<8xf32> to vector<8x1xf32>
    %cst_55 = arith.constant 6.400000e+01 : f32
    %143 = vector.broadcast %cst_55 : f32 to vector<8x1xf32>
    %144 = arith.divf %142, %143 : vector<8x1xf32>
    %145 = vector.broadcast %144 : vector<8x1xf32> to vector<8x64xf32>
    %146 = arith.subf %136, %145 : vector<8x64xf32>
    %147 = arith.mulf %146, %146 : vector<8x64xf32>
    %cst_56 = arith.constant dense<0.000000e+00> : vector<8xf32>
    %148 = vector.multi_reduction <add>, %147, %cst_56 [1] : vector<8x64xf32> to vector<8xf32>
    %149 = vector.shape_cast %148 : vector<8xf32> to vector<8x1xf32>
    %cst_57 = arith.constant 6.400000e+01 : f32
    %150 = vector.broadcast %cst_57 : f32 to vector<8x1xf32>
    %151 = arith.divf %149, %150 : vector<8x1xf32>
    %152 = vector.broadcast %144 : vector<8x1xf32> to vector<8x64xf32>
    %153 = arith.subf %136, %152 : vector<8x64xf32>
    %cst_58 = arith.constant 9.99999974E-6 : f32
    %154 = vector.broadcast %cst_58 : f32 to vector<8x1xf32>
    %155 = arith.addf %151, %154 : vector<8x1xf32>
    %156 = math.rsqrt %155 : vector<8x1xf32>
    %157 = vector.broadcast %156 : vector<8x1xf32> to vector<8x64xf32>
    %158 = arith.mulf %153, %157 : vector<8x64xf32>
    %159 = vector.broadcast %138 : vector<1x64xf32> to vector<8x64xf32>
    %160 = arith.mulf %158, %159 : vector<8x64xf32>
    %161 = vector.broadcast %140 : vector<1x64xf32> to vector<8x64xf32>
    %162 = arith.addf %160, %161 : vector<8x64xf32>
    %163 = vector.broadcast %5 : vector<8x1xf32> to vector<8x64xf32>
    %164 = arith.mulf %162, %163 : vector<8x64xf32>
    %165 = arith.truncf %164 : vector<8x64xf32> to vector<8x64xbf16>
    %c0_59 = arith.constant 0 : index
    %c0_60 = arith.constant 0 : index
    %c0_61 = arith.constant 0 : index
    %166 = vector.load %arg14[%c0_59, %c0_60, %c0_61] : memref<1x64x64xbf16, #tpu.memory_space<vmem>>, vector<1x64x64xbf16>
    %167 = vector.shape_cast %166 : vector<1x64x64xbf16> to vector<64x64xbf16>
    %cst_62 = arith.constant dense<0.000000e+00> : vector<8x64xf32>
    %168 = tpu.matmul %165, %167, %cst_62 {dimension_numbers = #tpu.dot_dimension_numbers<[1], [0], [0], [1], [0, 0, 1, 1], [], []>} : vector<8x64xbf16>, vector<64x64xbf16>, vector<8x64xf32> -> vector<8x64xf32>
    %c0_63 = arith.constant 0 : index
    %c0_64 = arith.constant 0 : index
    %c0_65 = arith.constant 0 : index
    %169 = vector.load %arg15[%c0_63, %c0_64, %c0_65] : memref<1x1x64xf32, #tpu.memory_space<vmem>>, vector<1x1x64xf32>
    %170 = vector.shape_cast %169 : vector<1x1x64xf32> to vector<1x64xf32>
    %171 = vector.broadcast %170 : vector<1x64xf32> to vector<8x64xf32>
    %172 = arith.addf %168, %171 : vector<8x64xf32>
    %c0_66 = arith.constant 0 : index
    %c0_67 = arith.constant 0 : index
    %c0_68 = arith.constant 0 : index
    %173 = vector.load %arg3[%c0_66, %c0_67, %c0_68] : memref<1x16x64xf32, #tpu.memory_space<vmem>>, vector<1x16x64xf32>
    %174 = vector.shape_cast %173 : vector<1x16x64xf32> to vector<16x64xf32>
    %175 = arith.truncf %174 : vector<16x64xf32> to vector<16x64xbf16>
    %c0_69 = arith.constant 0 : index
    %c0_70 = arith.constant 0 : index
    %c0_71 = arith.constant 0 : index
    %176 = vector.load %arg16[%c0_69, %c0_70, %c0_71] : memref<1x64x128xbf16, #tpu.memory_space<vmem>>, vector<1x64x128xbf16>
    %177 = vector.shape_cast %176 : vector<1x64x128xbf16> to vector<64x128xbf16>
    %cst_72 = arith.constant dense<0.000000e+00> : vector<16x128xf32>
    %178 = tpu.matmul %175, %177, %cst_72 {dimension_numbers = #tpu.dot_dimension_numbers<[1], [0], [0], [1], [0, 0, 1, 1], [], []>} : vector<16x64xbf16>, vector<64x128xbf16>, vector<16x128xf32> -> vector<16x128xf32>
    %c0_73 = arith.constant 0 : index
    %c0_74 = arith.constant 0 : index
    %c0_75 = arith.constant 0 : index
    %179 = vector.load %arg17[%c0_73, %c0_74, %c0_75] : memref<1x1x128xf32, #tpu.memory_space<vmem>>, vector<1x1x128xf32>
    %180 = vector.shape_cast %179 : vector<1x1x128xf32> to vector<1x128xf32>
    %181 = vector.broadcast %180 : vector<1x128xf32> to vector<16x128xf32>
    %182 = arith.addf %178, %181 : vector<16x128xf32>
    %c0_76 = arith.constant 0 : index
    %c0_77 = arith.constant 0 : index
    %c0_78 = arith.constant 0 : index
    %183 = vector.load %arg18[%c0_76, %c0_77, %c0_78] : memref<1x64x64xbf16, #tpu.memory_space<vmem>>, vector<1x64x64xbf16>
    %184 = vector.shape_cast %183 : vector<1x64x64xbf16> to vector<64x64xbf16>
    %185 = vector.extract_strided_slice %172 {offsets = [0, 0], sizes = [8, 16], strides = [1, 1]} : vector<8x64xf32> to vector<8x16xf32>
    %186 = arith.truncf %185 : vector<8x16xf32> to vector<8x16xbf16>
    %187 = vector.extract_strided_slice %182 {offsets = [0, 0], sizes = [16, 16], strides = [1, 1]} : vector<16x128xf32> to vector<16x16xf32>
    %188 = arith.truncf %187 : vector<16x16xf32> to vector<16x16xbf16>
    %189 = vector.extract_strided_slice %182 {offsets = [0, 64], sizes = [16, 16], strides = [1, 1]} : vector<16x128xf32> to vector<16x16xf32>
    %190 = arith.truncf %189 : vector<16x16xf32> to vector<16x16xbf16>
    %cst_79 = arith.constant dense<0.000000e+00> : vector<8x16xf32>
    %191 = tpu.matmul %186, %188, %cst_79 {dimension_numbers = #tpu.dot_dimension_numbers<[1], [1], [0], [0], [0, 0, 1, 0], [], []>} : vector<8x16xbf16>, vector<16x16xbf16>, vector<8x16xf32> -> vector<8x16xf32>
    %cst_80 = arith.constant 2.500000e-01 : f32
    %192 = vector.broadcast %cst_80 : f32 to vector<8x16xf32>
    %193 = arith.mulf %191, %192 : vector<8x16xf32>
    %194 = vector.broadcast %18 : vector<1x16xf32> to vector<8x16xf32>
    %195 = arith.addf %193, %194 : vector<8x16xf32>
    %cst_81 = arith.constant dense<0xFF800000> : vector<8xf32>
    %196 = vector.multi_reduction <maximumf>, %195, %cst_81 [1] : vector<8x16xf32> to vector<8xf32>
    %197 = vector.shape_cast %196 : vector<8xf32> to vector<8x1xf32>
    %198 = vector.broadcast %197 : vector<8x1xf32> to vector<8x16xf32>
    %199 = arith.subf %195, %198 : vector<8x16xf32>
    %200 = math.exp %199 : vector<8x16xf32>
    %cst_82 = arith.constant dense<0.000000e+00> : vector<8xf32>
    %201 = vector.multi_reduction <add>, %200, %cst_82 [1] : vector<8x16xf32> to vector<8xf32>
    %202 = vector.shape_cast %201 : vector<8xf32> to vector<8x1xf32>
    %203 = tpu.reciprocal %202 {approx = true} : vector<8x1xf32> -> vector<8x1xf32>
    %204 = vector.broadcast %203 : vector<8x1xf32> to vector<8x16xf32>
    %205 = arith.mulf %200, %204 : vector<8x16xf32>
    %206 = arith.truncf %205 : vector<8x16xf32> to vector<8x16xbf16>
    %cst_83 = arith.constant dense<0.000000e+00> : vector<8x16xf32>
    %207 = tpu.matmul %206, %190, %cst_83 {dimension_numbers = #tpu.dot_dimension_numbers<[1], [0], [0], [1], [0, 0, 1, 1], [], []>} : vector<8x16xbf16>, vector<16x16xbf16>, vector<8x16xf32> -> vector<8x16xf32>
    %208 = arith.truncf %207 : vector<8x16xf32> to vector<8x16xbf16>
    %209 = vector.extract_strided_slice %184 {offsets = [0, 0], sizes = [16, 64], strides = [1, 1]} : vector<64x64xbf16> to vector<16x64xbf16>
    %cst_84 = arith.constant dense<0.000000e+00> : vector<8x64xf32>
    %210 = tpu.matmul %208, %209, %cst_84 {dimension_numbers = #tpu.dot_dimension_numbers<[1], [0], [0], [1], [0, 0, 1, 1], [], []>} : vector<8x16xbf16>, vector<16x64xbf16>, vector<8x64xf32> -> vector<8x64xf32>
    %211 = vector.extract_strided_slice %172 {offsets = [0, 16], sizes = [8, 16], strides = [1, 1]} : vector<8x64xf32> to vector<8x16xf32>
    %212 = arith.truncf %211 : vector<8x16xf32> to vector<8x16xbf16>
    %213 = vector.extract_strided_slice %182 {offsets = [0, 16], sizes = [16, 16], strides = [1, 1]} : vector<16x128xf32> to vector<16x16xf32>
    %214 = arith.truncf %213 : vector<16x16xf32> to vector<16x16xbf16>
    %215 = vector.extract_strided_slice %182 {offsets = [0, 80], sizes = [16, 16], strides = [1, 1]} : vector<16x128xf32> to vector<16x16xf32>
    %216 = arith.truncf %215 : vector<16x16xf32> to vector<16x16xbf16>
    %cst_85 = arith.constant dense<0.000000e+00> : vector<8x16xf32>
    %217 = tpu.matmul %212, %214, %cst_85 {dimension_numbers = #tpu.dot_dimension_numbers<[1], [1], [0], [0], [0, 0, 1, 0], [], []>} : vector<8x16xbf16>, vector<16x16xbf16>, vector<8x16xf32> -> vector<8x16xf32>
    %cst_86 = arith.constant 2.500000e-01 : f32
    %218 = vector.broadcast %cst_86 : f32 to vector<8x16xf32>
    %219 = arith.mulf %217, %218 : vector<8x16xf32>
    %220 = vector.broadcast %18 : vector<1x16xf32> to vector<8x16xf32>
    %221 = arith.addf %219, %220 : vector<8x16xf32>
    %cst_87 = arith.constant dense<0xFF800000> : vector<8xf32>
    %222 = vector.multi_reduction <maximumf>, %221, %cst_87 [1] : vector<8x16xf32> to vector<8xf32>
    %223 = vector.shape_cast %222 : vector<8xf32> to vector<8x1xf32>
    %224 = vector.broadcast %223 : vector<8x1xf32> to vector<8x16xf32>
    %225 = arith.subf %221, %224 : vector<8x16xf32>
    %226 = math.exp %225 : vector<8x16xf32>
    %cst_88 = arith.constant dense<0.000000e+00> : vector<8xf32>
    %227 = vector.multi_reduction <add>, %226, %cst_88 [1] : vector<8x16xf32> to vector<8xf32>
    %228 = vector.shape_cast %227 : vector<8xf32> to vector<8x1xf32>
    %229 = tpu.reciprocal %228 {approx = true} : vector<8x1xf32> -> vector<8x1xf32>
    %230 = vector.broadcast %229 : vector<8x1xf32> to vector<8x16xf32>
    %231 = arith.mulf %226, %230 : vector<8x16xf32>
    %232 = arith.truncf %231 : vector<8x16xf32> to vector<8x16xbf16>
    %cst_89 = arith.constant dense<0.000000e+00> : vector<8x16xf32>
    %233 = tpu.matmul %232, %216, %cst_89 {dimension_numbers = #tpu.dot_dimension_numbers<[1], [0], [0], [1], [0, 0, 1, 1], [], []>} : vector<8x16xbf16>, vector<16x16xbf16>, vector<8x16xf32> -> vector<8x16xf32>
    %234 = arith.truncf %233 : vector<8x16xf32> to vector<8x16xbf16>
    %235 = vector.extract_strided_slice %184 {offsets = [16, 0], sizes = [16, 64], strides = [1, 1]} : vector<64x64xbf16> to vector<16x64xbf16>
    %cst_90 = arith.constant dense<0.000000e+00> : vector<8x64xf32>
    %236 = tpu.matmul %234, %235, %cst_90 {dimension_numbers = #tpu.dot_dimension_numbers<[1], [0], [0], [1], [0, 0, 1, 1], [], []>} : vector<8x16xbf16>, vector<16x64xbf16>, vector<8x64xf32> -> vector<8x64xf32>
    %237 = arith.addf %210, %236 : vector<8x64xf32>
    %238 = vector.extract_strided_slice %172 {offsets = [0, 32], sizes = [8, 16], strides = [1, 1]} : vector<8x64xf32> to vector<8x16xf32>
    %239 = arith.truncf %238 : vector<8x16xf32> to vector<8x16xbf16>
    %240 = vector.extract_strided_slice %182 {offsets = [0, 32], sizes = [16, 16], strides = [1, 1]} : vector<16x128xf32> to vector<16x16xf32>
    %241 = arith.truncf %240 : vector<16x16xf32> to vector<16x16xbf16>
    %242 = vector.extract_strided_slice %182 {offsets = [0, 96], sizes = [16, 16], strides = [1, 1]} : vector<16x128xf32> to vector<16x16xf32>
    %243 = arith.truncf %242 : vector<16x16xf32> to vector<16x16xbf16>
    %cst_91 = arith.constant dense<0.000000e+00> : vector<8x16xf32>
    %244 = tpu.matmul %239, %241, %cst_91 {dimension_numbers = #tpu.dot_dimension_numbers<[1], [1], [0], [0], [0, 0, 1, 0], [], []>} : vector<8x16xbf16>, vector<16x16xbf16>, vector<8x16xf32> -> vector<8x16xf32>
    %cst_92 = arith.constant 2.500000e-01 : f32
    %245 = vector.broadcast %cst_92 : f32 to vector<8x16xf32>
    %246 = arith.mulf %244, %245 : vector<8x16xf32>
    %247 = vector.broadcast %18 : vector<1x16xf32> to vector<8x16xf32>
    %248 = arith.addf %246, %247 : vector<8x16xf32>
    %cst_93 = arith.constant dense<0xFF800000> : vector<8xf32>
    %249 = vector.multi_reduction <maximumf>, %248, %cst_93 [1] : vector<8x16xf32> to vector<8xf32>
    %250 = vector.shape_cast %249 : vector<8xf32> to vector<8x1xf32>
    %251 = vector.broadcast %250 : vector<8x1xf32> to vector<8x16xf32>
    %252 = arith.subf %248, %251 : vector<8x16xf32>
    %253 = math.exp %252 : vector<8x16xf32>
    %cst_94 = arith.constant dense<0.000000e+00> : vector<8xf32>
    %254 = vector.multi_reduction <add>, %253, %cst_94 [1] : vector<8x16xf32> to vector<8xf32>
    %255 = vector.shape_cast %254 : vector<8xf32> to vector<8x1xf32>
    %256 = tpu.reciprocal %255 {approx = true} : vector<8x1xf32> -> vector<8x1xf32>
    %257 = vector.broadcast %256 : vector<8x1xf32> to vector<8x16xf32>
    %258 = arith.mulf %253, %257 : vector<8x16xf32>
    %259 = arith.truncf %258 : vector<8x16xf32> to vector<8x16xbf16>
    %cst_95 = arith.constant dense<0.000000e+00> : vector<8x16xf32>
    %260 = tpu.matmul %259, %243, %cst_95 {dimension_numbers = #tpu.dot_dimension_numbers<[1], [0], [0], [1], [0, 0, 1, 1], [], []>} : vector<8x16xbf16>, vector<16x16xbf16>, vector<8x16xf32> -> vector<8x16xf32>
    %261 = arith.truncf %260 : vector<8x16xf32> to vector<8x16xbf16>
    %262 = vector.extract_strided_slice %184 {offsets = [32, 0], sizes = [16, 64], strides = [1, 1]} : vector<64x64xbf16> to vector<16x64xbf16>
    %cst_96 = arith.constant dense<0.000000e+00> : vector<8x64xf32>
    %263 = tpu.matmul %261, %262, %cst_96 {dimension_numbers = #tpu.dot_dimension_numbers<[1], [0], [0], [1], [0, 0, 1, 1], [], []>} : vector<8x16xbf16>, vector<16x64xbf16>, vector<8x64xf32> -> vector<8x64xf32>
    %264 = arith.addf %237, %263 : vector<8x64xf32>
    %265 = vector.extract_strided_slice %172 {offsets = [0, 48], sizes = [8, 16], strides = [1, 1]} : vector<8x64xf32> to vector<8x16xf32>
    %266 = arith.truncf %265 : vector<8x16xf32> to vector<8x16xbf16>
    %267 = vector.extract_strided_slice %182 {offsets = [0, 48], sizes = [16, 16], strides = [1, 1]} : vector<16x128xf32> to vector<16x16xf32>
    %268 = arith.truncf %267 : vector<16x16xf32> to vector<16x16xbf16>
    %269 = vector.extract_strided_slice %182 {offsets = [0, 112], sizes = [16, 16], strides = [1, 1]} : vector<16x128xf32> to vector<16x16xf32>
    %270 = arith.truncf %269 : vector<16x16xf32> to vector<16x16xbf16>
    %cst_97 = arith.constant dense<0.000000e+00> : vector<8x16xf32>
    %271 = tpu.matmul %266, %268, %cst_97 {dimension_numbers = #tpu.dot_dimension_numbers<[1], [1], [0], [0], [0, 0, 1, 0], [], []>} : vector<8x16xbf16>, vector<16x16xbf16>, vector<8x16xf32> -> vector<8x16xf32>
    %cst_98 = arith.constant 2.500000e-01 : f32
    %272 = vector.broadcast %cst_98 : f32 to vector<8x16xf32>
    %273 = arith.mulf %271, %272 : vector<8x16xf32>
    %274 = vector.broadcast %18 : vector<1x16xf32> to vector<8x16xf32>
    %275 = arith.addf %273, %274 : vector<8x16xf32>
    %cst_99 = arith.constant dense<0xFF800000> : vector<8xf32>
    %276 = vector.multi_reduction <maximumf>, %275, %cst_99 [1] : vector<8x16xf32> to vector<8xf32>
    %277 = vector.shape_cast %276 : vector<8xf32> to vector<8x1xf32>
    %278 = vector.broadcast %277 : vector<8x1xf32> to vector<8x16xf32>
    %279 = arith.subf %275, %278 : vector<8x16xf32>
    %280 = math.exp %279 : vector<8x16xf32>
    %cst_100 = arith.constant dense<0.000000e+00> : vector<8xf32>
    %281 = vector.multi_reduction <add>, %280, %cst_100 [1] : vector<8x16xf32> to vector<8xf32>
    %282 = vector.shape_cast %281 : vector<8xf32> to vector<8x1xf32>
    %283 = tpu.reciprocal %282 {approx = true} : vector<8x1xf32> -> vector<8x1xf32>
    %284 = vector.broadcast %283 : vector<8x1xf32> to vector<8x16xf32>
    %285 = arith.mulf %280, %284 : vector<8x16xf32>
    %286 = arith.truncf %285 : vector<8x16xf32> to vector<8x16xbf16>
    %cst_101 = arith.constant dense<0.000000e+00> : vector<8x16xf32>
    %287 = tpu.matmul %286, %270, %cst_101 {dimension_numbers = #tpu.dot_dimension_numbers<[1], [0], [0], [1], [0, 0, 1, 1], [], []>} : vector<8x16xbf16>, vector<16x16xbf16>, vector<8x16xf32> -> vector<8x16xf32>
    %288 = arith.truncf %287 : vector<8x16xf32> to vector<8x16xbf16>
    %289 = vector.extract_strided_slice %184 {offsets = [48, 0], sizes = [16, 64], strides = [1, 1]} : vector<64x64xbf16> to vector<16x64xbf16>
    %cst_102 = arith.constant dense<0.000000e+00> : vector<8x64xf32>
    %290 = tpu.matmul %288, %289, %cst_102 {dimension_numbers = #tpu.dot_dimension_numbers<[1], [0], [0], [1], [0, 0, 1, 1], [], []>} : vector<8x16xbf16>, vector<16x64xbf16>, vector<8x64xf32> -> vector<8x64xf32>
    %291 = arith.addf %264, %290 : vector<8x64xf32>
    %c0_103 = arith.constant 0 : index
    %c0_104 = arith.constant 0 : index
    %c0_105 = arith.constant 0 : index
    %292 = vector.load %arg19[%c0_103, %c0_104, %c0_105] : memref<1x1x64xf32, #tpu.memory_space<vmem>>, vector<1x1x64xf32>
    %293 = vector.shape_cast %292 : vector<1x1x64xf32> to vector<1x64xf32>
    %294 = vector.broadcast %293 : vector<1x64xf32> to vector<8x64xf32>
    %295 = arith.addf %291, %294 : vector<8x64xf32>
    %296 = arith.addf %295, %164 : vector<8x64xf32>
    %c0_106 = arith.constant 0 : index
    %c0_107 = arith.constant 0 : index
    %c0_108 = arith.constant 0 : index
    %297 = vector.load %arg20[%c0_106, %c0_107, %c0_108] : memref<1x1x64xf32, #tpu.memory_space<vmem>>, vector<1x1x64xf32>
    %298 = vector.shape_cast %297 : vector<1x1x64xf32> to vector<1x64xf32>
    %c0_109 = arith.constant 0 : index
    %c0_110 = arith.constant 0 : index
    %c0_111 = arith.constant 0 : index
    %299 = vector.load %arg21[%c0_109, %c0_110, %c0_111] : memref<1x1x64xf32, #tpu.memory_space<vmem>>, vector<1x1x64xf32>
    %300 = vector.shape_cast %299 : vector<1x1x64xf32> to vector<1x64xf32>
    %cst_112 = arith.constant dense<0.000000e+00> : vector<8xf32>
    %301 = vector.multi_reduction <add>, %296, %cst_112 [1] : vector<8x64xf32> to vector<8xf32>
    %302 = vector.shape_cast %301 : vector<8xf32> to vector<8x1xf32>
    %cst_113 = arith.constant 6.400000e+01 : f32
    %303 = vector.broadcast %cst_113 : f32 to vector<8x1xf32>
    %304 = arith.divf %302, %303 : vector<8x1xf32>
    %305 = vector.broadcast %304 : vector<8x1xf32> to vector<8x64xf32>
    %306 = arith.subf %296, %305 : vector<8x64xf32>
    %307 = arith.mulf %306, %306 : vector<8x64xf32>
    %cst_114 = arith.constant dense<0.000000e+00> : vector<8xf32>
    %308 = vector.multi_reduction <add>, %307, %cst_114 [1] : vector<8x64xf32> to vector<8xf32>
    %309 = vector.shape_cast %308 : vector<8xf32> to vector<8x1xf32>
    %cst_115 = arith.constant 6.400000e+01 : f32
    %310 = vector.broadcast %cst_115 : f32 to vector<8x1xf32>
    %311 = arith.divf %309, %310 : vector<8x1xf32>
    %312 = vector.broadcast %304 : vector<8x1xf32> to vector<8x64xf32>
    %313 = arith.subf %296, %312 : vector<8x64xf32>
    %cst_116 = arith.constant 9.99999974E-6 : f32
    %314 = vector.broadcast %cst_116 : f32 to vector<8x1xf32>
    %315 = arith.addf %311, %314 : vector<8x1xf32>
    %316 = math.rsqrt %315 : vector<8x1xf32>
    %317 = vector.broadcast %316 : vector<8x1xf32> to vector<8x64xf32>
    %318 = arith.mulf %313, %317 : vector<8x64xf32>
    %319 = vector.broadcast %298 : vector<1x64xf32> to vector<8x64xf32>
    %320 = arith.mulf %318, %319 : vector<8x64xf32>
    %321 = vector.broadcast %300 : vector<1x64xf32> to vector<8x64xf32>
    %322 = arith.addf %320, %321 : vector<8x64xf32>
    %323 = vector.broadcast %5 : vector<8x1xf32> to vector<8x64xf32>
    %324 = arith.mulf %322, %323 : vector<8x64xf32>
    %325 = arith.truncf %324 : vector<8x64xf32> to vector<8x64xbf16>
    %c0_117 = arith.constant 0 : index
    %c0_118 = arith.constant 0 : index
    %c0_119 = arith.constant 0 : index
    %326 = vector.load %arg22[%c0_117, %c0_118, %c0_119] : memref<1x64x128xbf16, #tpu.memory_space<vmem>>, vector<1x64x128xbf16>
    %327 = vector.shape_cast %326 : vector<1x64x128xbf16> to vector<64x128xbf16>
    %cst_120 = arith.constant dense<0.000000e+00> : vector<8x128xf32>
    %328 = tpu.matmul %325, %327, %cst_120 {dimension_numbers = #tpu.dot_dimension_numbers<[1], [0], [0], [1], [0, 0, 1, 1], [], []>} : vector<8x64xbf16>, vector<64x128xbf16>, vector<8x128xf32> -> vector<8x128xf32>
    %c0_121 = arith.constant 0 : index
    %c0_122 = arith.constant 0 : index
    %c0_123 = arith.constant 0 : index
    %329 = vector.load %arg23[%c0_121, %c0_122, %c0_123] : memref<1x1x128xf32, #tpu.memory_space<vmem>>, vector<1x1x128xf32>
    %330 = vector.shape_cast %329 : vector<1x1x128xf32> to vector<1x128xf32>
    %331 = vector.broadcast %330 : vector<1x128xf32> to vector<8x128xf32>
    %332 = arith.addf %328, %331 : vector<8x128xf32>
    %cst_124 = arith.constant 0.000000e+00 : f32
    %333 = vector.broadcast %cst_124 : f32 to vector<8x128xf32>
    %334 = arith.maximumf %332, %333 : vector<8x128xf32>
    %335 = arith.truncf %334 : vector<8x128xf32> to vector<8x128xbf16>
    %c0_125 = arith.constant 0 : index
    %c0_126 = arith.constant 0 : index
    %c0_127 = arith.constant 0 : index
    %336 = vector.load %arg24[%c0_125, %c0_126, %c0_127] : memref<1x128x64xbf16, #tpu.memory_space<vmem>>, vector<1x128x64xbf16>
    %337 = vector.shape_cast %336 : vector<1x128x64xbf16> to vector<128x64xbf16>
    %cst_128 = arith.constant dense<0.000000e+00> : vector<8x64xf32>
    %338 = tpu.matmul %335, %337, %cst_128 {dimension_numbers = #tpu.dot_dimension_numbers<[1], [0], [0], [1], [0, 0, 1, 1], [], []>} : vector<8x128xbf16>, vector<128x64xbf16>, vector<8x64xf32> -> vector<8x64xf32>
    %c0_129 = arith.constant 0 : index
    %c0_130 = arith.constant 0 : index
    %c0_131 = arith.constant 0 : index
    %339 = vector.load %arg25[%c0_129, %c0_130, %c0_131] : memref<1x1x64xf32, #tpu.memory_space<vmem>>, vector<1x1x64xf32>
    %340 = vector.shape_cast %339 : vector<1x1x64xf32> to vector<1x64xf32>
    %341 = vector.broadcast %340 : vector<1x64xf32> to vector<8x64xf32>
    %342 = arith.addf %338, %341 : vector<8x64xf32>
    %343 = arith.addf %342, %324 : vector<8x64xf32>
    %c0_132 = arith.constant 0 : index
    %c0_133 = arith.constant 0 : index
    %c0_134 = arith.constant 0 : index
    %344 = vector.load %arg26[%c0_132, %c0_133, %c0_134] : memref<1x1x64xf32, #tpu.memory_space<vmem>>, vector<1x1x64xf32>
    %345 = vector.shape_cast %344 : vector<1x1x64xf32> to vector<1x64xf32>
    %c0_135 = arith.constant 0 : index
    %c0_136 = arith.constant 0 : index
    %c0_137 = arith.constant 0 : index
    %346 = vector.load %arg27[%c0_135, %c0_136, %c0_137] : memref<1x1x64xf32, #tpu.memory_space<vmem>>, vector<1x1x64xf32>
    %347 = vector.shape_cast %346 : vector<1x1x64xf32> to vector<1x64xf32>
    %cst_138 = arith.constant dense<0.000000e+00> : vector<8xf32>
    %348 = vector.multi_reduction <add>, %343, %cst_138 [1] : vector<8x64xf32> to vector<8xf32>
    %349 = vector.shape_cast %348 : vector<8xf32> to vector<8x1xf32>
    %cst_139 = arith.constant 6.400000e+01 : f32
    %350 = vector.broadcast %cst_139 : f32 to vector<8x1xf32>
    %351 = arith.divf %349, %350 : vector<8x1xf32>
    %352 = vector.broadcast %351 : vector<8x1xf32> to vector<8x64xf32>
    %353 = arith.subf %343, %352 : vector<8x64xf32>
    %354 = arith.mulf %353, %353 : vector<8x64xf32>
    %cst_140 = arith.constant dense<0.000000e+00> : vector<8xf32>
    %355 = vector.multi_reduction <add>, %354, %cst_140 [1] : vector<8x64xf32> to vector<8xf32>
    %356 = vector.shape_cast %355 : vector<8xf32> to vector<8x1xf32>
    %cst_141 = arith.constant 6.400000e+01 : f32
    %357 = vector.broadcast %cst_141 : f32 to vector<8x1xf32>
    %358 = arith.divf %356, %357 : vector<8x1xf32>
    %359 = vector.broadcast %351 : vector<8x1xf32> to vector<8x64xf32>
    %360 = arith.subf %343, %359 : vector<8x64xf32>
    %cst_142 = arith.constant 9.99999974E-6 : f32
    %361 = vector.broadcast %cst_142 : f32 to vector<8x1xf32>
    %362 = arith.addf %358, %361 : vector<8x1xf32>
    %363 = math.rsqrt %362 : vector<8x1xf32>
    %364 = vector.broadcast %363 : vector<8x1xf32> to vector<8x64xf32>
    %365 = arith.mulf %360, %364 : vector<8x64xf32>
    %366 = vector.broadcast %345 : vector<1x64xf32> to vector<8x64xf32>
    %367 = arith.mulf %365, %366 : vector<8x64xf32>
    %368 = vector.broadcast %347 : vector<1x64xf32> to vector<8x64xf32>
    %369 = arith.addf %367, %368 : vector<8x64xf32>
    %370 = vector.broadcast %5 : vector<8x1xf32> to vector<8x64xf32>
    %371 = arith.mulf %369, %370 : vector<8x64xf32>
    %c0_143 = arith.constant 0 : index
    %c0_144 = arith.constant 0 : index
    %372 = vector.load %arg29[%c0_143, %c0_144] : memref<8x64xf32, #tpu.memory_space<vmem>>, vector<8x64xf32>
    tpu.vector_store %arg29[%c0_143, %c0_144], %371 {strides = array<i32>} : memref<8x64xf32, #tpu.memory_space<vmem>>, vector<8x64xf32>,
    %c1_i32 = arith.constant 1 : i32
    %373 = arith.cmpi eq, %arg1, %c1_i32 : i32
    %374 = arith.extui %373 : i1 to i32
    %c0_i32_145 = arith.constant 0 : i32
    %375 = arith.cmpi ne, %374, %c0_i32_145 : i32
    scf.if %375 {
      %376 = arith.truncf %371 : vector<8x64xf32> to vector<8x64xbf16>
      %c0_146 = arith.constant 0 : index
      %c0_147 = arith.constant 0 : index
      %377 = vector.load %arg7[%c0_146, %c0_147] : memref<64x128xbf16, #tpu.memory_space<vmem>>, vector<64x128xbf16>
      %cst_148 = arith.constant dense<0.000000e+00> : vector<8x128xf32>
      %378 = tpu.matmul %376, %377, %cst_148 {dimension_numbers = #tpu.dot_dimension_numbers<[1], [0], [0], [1], [0, 0, 1, 1], [], []>} : vector<8x64xbf16>, vector<64x128xbf16>, vector<8x128xf32> -> vector<8x128xf32>
      %cst_149 = arith.constant 1.250000e-01 : f32
      %379 = vector.broadcast %cst_149 : f32 to vector<8x128xf32>
      %380 = arith.mulf %378, %379 : vector<8x128xf32>
      %c0_150 = arith.constant 0 : index
      %c0_151 = arith.constant 0 : index
      %c0_152 = arith.constant 0 : index
      %381 = vector.load %arg28[%c0_150, %c0_151, %c0_152] : memref<1x8x128xf32, #tpu.memory_space<vmem>>, vector<1x8x128xf32>
      %382 = vector.shape_cast %381 : vector<1x8x128xf32> to vector<8x128xf32>
      %383 = vector.shape_cast %380 : vector<8x128xf32> to vector<1x8x128xf32>
      tpu.vector_store %arg28[%c0_150, %c0_151, %c0_152], %383 {strides = array<i32>} : memref<1x8x128xf32, #tpu.memory_space<vmem>>, vector<1x8x128xf32>,
    } else {
    }
    return
  }
  func.func @transform_0(%arg0: i32, %arg1: i32) -> (i32, i32, i32) {
    %c0_i32 = arith.constant 0 : i32
    %c0_i32_0 = arith.constant 0 : i32
    %c0_i32_1 = arith.constant 0 : i32
    return %arg0, %c0_i32, %c0_i32_0 : i32, i32, i32
  }
  func.func @transform_1(%arg0: i32, %arg1: i32) -> (i32, i32, i32) {
    %c0_i32 = arith.constant 0 : i32
    %c0_i32_0 = arith.constant 0 : i32
    %c0_i32_1 = arith.constant 0 : i32
    return %arg0, %c0_i32, %c0_i32_0 : i32, i32, i32
  }
  func.func @transform_2(%arg0: i32, %arg1: i32) -> (i32, i32, i32) {
    %c0_i32 = arith.constant 0 : i32
    %c0_i32_0 = arith.constant 0 : i32
    %c0_i32_1 = arith.constant 0 : i32
    return %arg0, %c0_i32, %c0_i32_0 : i32, i32, i32
  }
  func.func @transform_3(%arg0: i32, %arg1: i32) -> (i32, i32, i32) {
    %c0_i32 = arith.constant 0 : i32
    %c0_i32_0 = arith.constant 0 : i32
    %c0_i32_1 = arith.constant 0 : i32
    return %arg0, %c0_i32, %c0_i32_0 : i32, i32, i32
  }
  func.func @transform_4(%arg0: i32, %arg1: i32) -> (i32, i32, i32) {
    %c0_i32 = arith.constant 0 : i32
    %c0_i32_0 = arith.constant 0 : i32
    %c0_i32_1 = arith.constant 0 : i32
    return %arg0, %c0_i32, %c0_i32_0 : i32, i32, i32
  }
  func.func @transform_5(%arg0: i32, %arg1: i32) -> (i32, i32) {
    %c0_i32 = arith.constant 0 : i32
    %c0_i32_0 = arith.constant 0 : i32
    %c0_i32_1 = arith.constant 0 : i32
    return %c0_i32, %c0_i32_0 : i32, i32
  }
  func.func @transform_6(%arg0: i32, %arg1: i32) -> (i32, i32, i32) {
    %c0_i32 = arith.constant 0 : i32
    %c0_i32_0 = arith.constant 0 : i32
    %c0_i32_1 = arith.constant 0 : i32
    return %arg1, %c0_i32, %c0_i32_0 : i32, i32, i32
  }
  func.func @transform_7(%arg0: i32, %arg1: i32) -> (i32, i32, i32) {
    %c0_i32 = arith.constant 0 : i32
    %c0_i32_0 = arith.constant 0 : i32
    %c0_i32_1 = arith.constant 0 : i32
    return %arg1, %c0_i32, %c0_i32_0 : i32, i32, i32
  }
  func.func @transform_8(%arg0: i32, %arg1: i32) -> (i32, i32, i32) {
    %c0_i32 = arith.constant 0 : i32
    %c0_i32_0 = arith.constant 0 : i32
    %c0_i32_1 = arith.constant 0 : i32
    return %arg1, %c0_i32, %c0_i32_0 : i32, i32, i32
  }
  func.func @transform_9(%arg0: i32, %arg1: i32) -> (i32, i32, i32) {
    %c0_i32 = arith.constant 0 : i32
    %c0_i32_0 = arith.constant 0 : i32
    %c0_i32_1 = arith.constant 0 : i32
    return %arg1, %c0_i32, %c0_i32_0 : i32, i32, i32
  }
  func.func @transform_10(%arg0: i32, %arg1: i32) -> (i32, i32, i32) {
    %c0_i32 = arith.constant 0 : i32
    %c0_i32_0 = arith.constant 0 : i32
    %c0_i32_1 = arith.constant 0 : i32
    return %arg1, %c0_i32, %c0_i32_0 : i32, i32, i32
  }
  func.func @transform_11(%arg0: i32, %arg1: i32) -> (i32, i32, i32) {
    %c0_i32 = arith.constant 0 : i32
    %c0_i32_0 = arith.constant 0 : i32
    %c0_i32_1 = arith.constant 0 : i32
    return %arg1, %c0_i32, %c0_i32_0 : i32, i32, i32
  }
  func.func @transform_12(%arg0: i32, %arg1: i32) -> (i32, i32, i32) {
    %c0_i32 = arith.constant 0 : i32
    %c0_i32_0 = arith.constant 0 : i32
    %c0_i32_1 = arith.constant 0 : i32
    return %arg1, %c0_i32, %c0_i32_0 : i32, i32, i32
  }
  func.func @transform_13(%arg0: i32, %arg1: i32) -> (i32, i32, i32) {
    %c0_i32 = arith.constant 0 : i32
    %c0_i32_0 = arith.constant 0 : i32
    %c0_i32_1 = arith.constant 0 : i32
    return %arg1, %c0_i32, %c0_i32_0 : i32, i32, i32
  }
  func.func @transform_14(%arg0: i32, %arg1: i32) -> (i32, i32, i32) {
    %c0_i32 = arith.constant 0 : i32
    %c0_i32_0 = arith.constant 0 : i32
    %c0_i32_1 = arith.constant 0 : i32
    return %arg1, %c0_i32, %c0_i32_0 : i32, i32, i32
  }
  func.func @transform_15(%arg0: i32, %arg1: i32) -> (i32, i32, i32) {
    %c0_i32 = arith.constant 0 : i32
    %c0_i32_0 = arith.constant 0 : i32
    %c0_i32_1 = arith.constant 0 : i32
    return %arg1, %c0_i32, %c0_i32_0 : i32, i32, i32
  }
  func.func @transform_16(%arg0: i32, %arg1: i32) -> (i32, i32, i32) {
    %c0_i32 = arith.constant 0 : i32
    %c0_i32_0 = arith.constant 0 : i32
    %c0_i32_1 = arith.constant 0 : i32
    return %arg1, %c0_i32, %c0_i32_0 : i32, i32, i32
  }
  func.func @transform_17(%arg0: i32, %arg1: i32) -> (i32, i32, i32) {
    %c0_i32 = arith.constant 0 : i32
    %c0_i32_0 = arith.constant 0 : i32
    %c0_i32_1 = arith.constant 0 : i32
    return %arg1, %c0_i32, %c0_i32_0 : i32, i32, i32
  }
  func.func @transform_18(%arg0: i32, %arg1: i32) -> (i32, i32, i32) {
    %c0_i32 = arith.constant 0 : i32
    %c0_i32_0 = arith.constant 0 : i32
    %c0_i32_1 = arith.constant 0 : i32
    return %arg1, %c0_i32, %c0_i32_0 : i32, i32, i32
  }
  func.func @transform_19(%arg0: i32, %arg1: i32) -> (i32, i32, i32) {
    %c0_i32 = arith.constant 0 : i32
    %c0_i32_0 = arith.constant 0 : i32
    %c0_i32_1 = arith.constant 0 : i32
    return %arg1, %c0_i32, %c0_i32_0 : i32, i32, i32
  }
  func.func @transform_20(%arg0: i32, %arg1: i32) -> (i32, i32, i32) {
    %c0_i32 = arith.constant 0 : i32
    %c0_i32_0 = arith.constant 0 : i32
    %c0_i32_1 = arith.constant 0 : i32
    return %arg1, %c0_i32, %c0_i32_0 : i32, i32, i32
  }
  func.func @transform_21(%arg0: i32, %arg1: i32) -> (i32, i32, i32) {
    %c0_i32 = arith.constant 0 : i32
    %c0_i32_0 = arith.constant 0 : i32
    %c0_i32_1 = arith.constant 0 : i32
    return %arg1, %c0_i32, %c0_i32_0 : i32, i32, i32
  }
  func.func @transform_22(%arg0: i32, %arg1: i32) -> (i32, i32, i32) {
    %c0_i32 = arith.constant 0 : i32
    %c0_i32_0 = arith.constant 0 : i32
    %c0_i32_1 = arith.constant 0 : i32
    return %arg1, %c0_i32, %c0_i32_0 : i32, i32, i32
  }
  func.func @transform_23(%arg0: i32, %arg1: i32) -> (i32, i32, i32) {
    %c0_i32 = arith.constant 0 : i32
    %c0_i32_0 = arith.constant 0 : i32
    %c0_i32_1 = arith.constant 0 : i32
    return %arg1, %c0_i32, %c0_i32_0 : i32, i32, i32
  }
  func.func @transform_24(%arg0: i32, %arg1: i32) -> (i32, i32, i32) {
    %c0_i32 = arith.constant 0 : i32
    %c0_i32_0 = arith.constant 0 : i32
    %c0_i32_1 = arith.constant 0 : i32
    return %arg1, %c0_i32, %c0_i32_0 : i32, i32, i32
  }
  func.func @transform_25(%arg0: i32, %arg1: i32) -> (i32, i32, i32) {
    %c0_i32 = arith.constant 0 : i32
    %c0_i32_0 = arith.constant 0 : i32
    %c0_i32_1 = arith.constant 0 : i32
    return %arg1, %c0_i32, %c0_i32_0 : i32, i32, i32
  }
  func.func @transform_26(%arg0: i32, %arg1: i32) -> (i32, i32, i32) {
    %c0_i32 = arith.constant 0 : i32
    %c0_i32_0 = arith.constant 0 : i32
    %c0_i32_1 = arith.constant 0 : i32
    return %arg0, %c0_i32, %c0_i32_0 : i32, i32, i32
  }
}

</mosaic_0001>

<bundles_post_ra>
// kernel: forward.2
= control target key start
LH: loop header
LB: loop body
LE: loop exit
PB: predicated region body
PF: predicated region fallthrough
CT: control target
= control target key end

     0   :  { %s2196_s18 = smov 0   ;;  %s2198_s19 = smov 0   ;;  %s2513_s0 = inlined_call_operand.vmem [shape: f32[2,16,64], index: 0, kind: input, shape index: {}]   ;;  %s2514_s1 = inlined_call_operand.vmem [shape: f32[1,64], index: 1, kind: input, shape index: {}]   ;;  %s2515_s2 = inlined_call_operand.vmem [shape: f32[1,64], index: 2, kind: input, shape index: {}]   ;;  %s2516_s3 = inlined_call_operand.vmem [shape: bf16[2,64,192], index: 3, kind: input, shape index: {}]   ;;  %s2517_s4 = inlined_call_operand.vmem [shape: f32[2,1,192], index: 4, kind: input, shape index: {}]   ;;  %s2518_s5 = inlined_call_operand.vmem [shape: bf16[2,64,64], index: 5, kind: input, shape index: {}]   ;;  %s2519_s6 = inlined_call_operand.vmem [shape: f32[2,1,64], index: 6, kind: input, shape index: {}]   ;;  %s2520_s7 = inlined_call_operand.vmem [shape: f32[2,1,64], index: 7, kind: input, shape index: {}]   ;;  %s2521_s8 = inlined_call_operand.vmem [shape: f32[2,1,64], index: 8, kind: input, shape index: {}]   ;;  %s2522_s9 = inlined_call_operand.vmem [shape: bf16[2,64,128], index: 9, kind: input, shape index: {}]   ;;  %s2523_s10 = inlined_call_operand.vmem [shape: f32[2,1,128], index: 10, kind: input, shape index: {}]   ;;  %s2524_s11 = inlined_call_operand.vmem [shape: bf16[2,128,64], index: 11, kind: input, shape index: {}]   ;;  %s2525_s12 = inlined_call_operand.vmem [shape: f32[2,1,64], index: 12, kind: input, shape index: {}]   ;;  %s2526_s13 = inlined_call_operand.vmem [shape: f32[2,1,64], index: 13, kind: input, shape index: {}]   ;;  %s2527_s14 = inlined_call_operand.vmem [shape: f32[2,1,64], index: 14, kind: input, shape index: {}]   ;;  %s2528_s15 = inlined_call_operand.vmem [shape: f32[2,16,64], index: 15, kind: output, shape index: {}]  }
   0x1   :  { %2535 = sst [smem:[#allocation10_spill]] %s2513_s0  ;;  %s2200_s20 = smov 0  }
   0x2   :  { %2536 = sst [smem:[#allocation11_spill]] %s2514_s1  ;;  %s2202_s21 = smov 0  }
   0x3   :  { %2537 = sst [smem:[#allocation12_spill]] %s2515_s2  ;;  %s2204_s22 = smov 0  }
   0x4   :  { %2538 = sst [smem:[#allocation13_spill]] %s2516_s3 }
   0x5   :  { %2539 = sst [smem:[#allocation14_spill]] %s2517_s4 }
   0x6   :  { %2540 = sst [smem:[#allocation15_spill]] %s2518_s5 }
   0x7   :  { %2541 = sst [smem:[#allocation16_spill]] %s2528_s15 }
   0x8 LB: > { %2542 = sst [smem:[#allocation2_spill]] %s2089_s18  ;;  %s34_s23 = sadd.s32 1, %s2097_s20  ;;  %s2105_s22 = sphi %s2204_s22, %s25_s22   ;;  %s2101_s21 = sphi %s2202_s21, %s2568_s21   ;;  %s2097_s20 = sphi %s2200_s20, %s2567_s20   ;;  %s2093_s19 = sphi %s2198_s19, %s2566_s19   ;;  %s2089_s18 = sphi %s2196_s18, %s2565_s18  }
   0x9   : > { %2543 = sst [smem:[#allocation3_spill]] %s2097_s20  ;;  %s37_s24 = sadd.s32 1, %s2101_s21 }
   0xa   : > { %2544 = sst [smem:[#allocation4_spill]] %s2101_s21  ;;  %p35_p0 = scmp.ge.s32.totalorder %s34_s23, 2 }
   0xb   : > { %2545 = sst [smem:[#allocation5_spill]] %s2105_s22  ;;  %p1797_p1 = scmp.ge.s32.totalorder %s2105_s22, 1 }
   0xc   : > { %p554_p2 = scmp.lt.s32.totalorder %s2105_s22, 5  ;;  %s2570_s23 = smov (%p35_p0, %s34_s23), 0 }
   0xd   : > { %2546 = sst [smem:[#allocation6_spill]] %s2570_s23  ;;  %s2572_s24 = smov (!%p35_p0, %s37_s24), %s2101_s21 }
   0xe   : > { %p555_p3 = pnand %p1797_p1, %p554_p2  ;;  %p39_p4 = scmp.ge.s32.totalorder %s2572_s24, 2 }
  0x10   : > { %s2574_s24 = smov (%p39_p4, %s2572_s24), 0  ;;  %558 = sbr.rel (%p555_p3) target bundleno = 2726 (0xaa6), region = 80 }
  0x11   : > { %2547 = sst [smem:[#allocation7_spill]] %s2574_s24 }
  0x15   : > { %p647_p5 = scmp.lt.s32.totalorder %s2093_s19, 1  ;;  %p652_p6 = scmp.lt.s32.totalorder %s2089_s18, 1 }
  0x16   : > { %s2548_s0 = sld [smem:[#allocation10_spill]] }
  0x17   : > { %s2576_s19 = smov (!%p647_p5, %s2093_s19), 1  ;;  %s2549_s3 = sld [smem:[#allocation13_spill]] }
  0x18   : > { %s2230_s25 = scalar_select %p652_p6, %s2089_s18, 1 }
  0x19   : > { %s1927_s26 = sshll.u32 %s2576_s19, 4  ;;  %s2551_s4 = sld [smem:[#allocation14_spill]] }
  0x1a   : > { %s1928_s30 = sshll.u32 %s2230_s25, 6  ;;  %s1802_s23 = sshll.u32 %s2230_s25, 1 }
  0x1b   : > { %s1929_s2 = sshll.u32 %s2230_s25, 5  ;;  %s2552_s5 = sld [smem:[#allocation15_spill]] }
  0x1c   : > { %s651_s29 = scalar_lea.vmem %s2548_s0, %s1927_s26  ;;  %s2277_s28 = scalar_lea.vmem %s2524_s11, %s1928_s30 }
  0x1d   : > { %s2239_s24 = scalar_lea.vmem %s2549_s3, %s1928_s30  ;;  %s690_s17 = scalar_lea.vmem %s2525_s12, %s2230_s25 }
  0x1e   : > { %2550 = sst [smem:[#allocation8_spill]] %s2239_s24  ;;  %s693_s20 = scalar_lea.vmem %s2526_s13, %s2230_s25 }
  0x1f   : > { %s2245_s22 = scalar_lea.vmem %s2551_s4, %s1802_s23  ;;  %s2268_s4 = scalar_lea.vmem %s2522_s9, %s1929_s2 }
  0x20   : > { %s696_s23 = scalar_lea.vmem %s2527_s14, %s2230_s25  ;;  %s2554_s19 = sld [smem:[#allocation16_spill]] }
  0x21   : > { %s2251_s18 = scalar_lea.vmem %s2552_s5, %s1929_s2 }
  0x22   : > { %2553 = sst [smem:[#allocation9_spill]] %s2251_s18 }
  0x23   : > { %s2555_s18 = sld [smem:[#allocation2_spill]] }
  0x26   : > { %s2294_s5 = scalar_lea.vmem %s2554_s19, %s1927_s26 }
  0x29   : > { %p1811_p7 = scmp.ne.s32.totalorder %s2555_s18, 0 }
  0x2a   : > { %s2557_s15 = sld [smem:[#allocation12_spill]] (!%p1811_p7) }
  0x2b   : > { %706 = sbr.rel (%p1811_p7) target bundleno = 326 (0x146), region = 84 }
  0x30   : > { %v707_v0 = vld [vmem:[%s651_s29] sm:$0xff]  ;;  %vm711_vm0 = vcmask 523264   ;;  %v708_v2 = vld [vmem:[%s651_s29 + $0x8] sm:$0xff]  ;;  %v2107_v4 = vmov 64.0   ;;  %s2556_s29 = sld [smem:[#allocation11_spill]] }
  0x31   : > { %v712_v1 = vsel %vm711_vm0, %v707_v0, 0.0  ;;  %v715_v3 = vsel %vm711_vm0, %v708_v2, 0.0  ;;  %2008 = vrcp.f32 %v2107_v4  ;;  %v2007_v38 = vld [vmem:[%s2557_s15] ss:$0 sm:$0xff] }
  0x32   : > { %713 = vadd.xlane.f32.xlu0 %v712_v1 }
  0x36   : > { %v2006_v35 = vld [vmem:[%s2556_s29] ss:$0 sm:$0xff] }
  0x37   : > { %v2009_v5 = vpop.eup %2008 }
  0x38   : > { %v719_v6 = vmul.f32 64.0, %v2009_v5  ;;  %vm723_vm1 = vweird.f32 %v2009_v5 }
  0x3a   : > { %716 = vadd.xlane.f32.xlu0 %v715_v3  ;;  %v720_v7 = vsub.f32 1.0, %v719_v6 }
  0x3c   : > { %v721_v8 = vmul.f32 %v2009_v5, %v720_v7 }
  0x3e   : > { %v722_v9 = vadd.f32 %v2009_v5, %v721_v8 }
  0x40   : > { %v724_v10 = vsel %vm723_vm1, %v2009_v5, %v722_v9 }
  0xa5   : > { %v714_v11 = vpop.xlane.xlu0 %713 }
  0xa6   : > { %v725_v12 = vmul.f32 %v724_v10, %v714_v11 }
  0xa8   : > { %v727_v13 = vsub.f32 %v707_v0, %v725_v12 }
  0xaa   : > { %v729_v14 = vmul.f32 %v727_v13, %v727_v13 }
  0xac   : > { %v731_v15 = vsel %vm711_vm0, %v729_v14, 0.0 }
  0xad   : > { %732 = vadd.xlane.f32.xlu1 %v731_v15  ;;  %v717_v16 = vpop.xlane.xlu0 %716 }
  0xae   : > { %v726_v17 = vmul.f32 %v724_v10, %v717_v16 }
  0xb0   : > { %v728_v18 = vsub.f32 %v708_v2, %v726_v17 }
  0xb2   : > { %v730_v19 = vmul.f32 %v728_v18, %v728_v18 }
  0xb4   : > { %v734_v20 = vsel %vm711_vm0, %v730_v19, 0.0 }
  0xb5   : > { %735 = vadd.xlane.f32.xlu1 %v734_v20 }
 0x120   : > { %v733_v21 = vpop.xlane.xlu1 %732 }
 0x121   : > { %v737_v22 = vmul.f32 %v733_v21, %v724_v10 }
 0x123   : > { %v739_v23 = vadd.f32 1e-12, %v737_v22 }
 0x125   : > { %2010 = vrsqrt.f32 %v739_v23  ;;  %vm747_vm3 = vweird.f32 %v739_v23 }
 0x128   : > { %v736_v24 = vpop.xlane.xlu1 %735 }
 0x129   : > { %v738_v25 = vmul.f32 %v736_v24, %v724_v10 }
 0x12b   : > { %v2011_v26 = vpop.eup %2010  ;;  %v740_v27 = vadd.f32 1e-12, %v738_v25 }
 0x12c   : > { %v742_v28 = vmul.f32 %v2011_v26, %v739_v23  ;;  %vm748_vm2 = vweird.f32 %v2011_v26 }
 0x12d   : > { %2012 = vrsqrt.f32 %v740_v27  ;;  %vm749_vm4 = vmor %vm747_vm3, %vm748_vm2  ;;  %vm757_vm6 = vweird.f32 %v740_v27 }
 0x12e   : > { %v743_v29 = vmul.f32 %v2011_v26, %v742_v28 }
 0x130   : > { %v744_v30 = vmul.f32 0.5, %v743_v29 }
 0x132   : > { %v745_v31 = vsub.f32 1.5, %v744_v30 }
 0x133   : > { %v2013_v32 = vpop.eup %2012 }
 0x134   : > { %v746_v33 = vmul.f32 %v2011_v26, %v745_v31  ;;  %v752_v34 = vmul.f32 %v2013_v32, %v740_v27  ;;  %vm758_vm5 = vweird.f32 %v2013_v32 }
 0x135   : > { %vm759_vm7 = vmor %vm757_vm6, %vm758_vm5 }
 0x136   : > { %v750_v36 = vsel %vm749_vm4, %v2011_v26, %v746_v33  ;;  %v753_v37 = vmul.f32 %v2013_v32, %v752_v34 }
 0x137   : > { %v761_v39 = vmul.f32 %v750_v36, %v727_v13 }
 0x138   : > { %v754_v40 = vmul.f32 0.5, %v753_v37 }
 0x139   : > { %v766_v41 = vmul.f32 %v2006_v35, %v761_v39 }
 0x13a   : > { %v755_v42 = vsub.f32 1.5, %v754_v40 }
 0x13b   : > { %v771_v43 = vadd.f32 %v2007_v38, %v766_v41 }
 0x13c   : > { %v756_v44 = vmul.f32 %v2013_v32, %v755_v42 }
 0x13d   : > { %773 = vst.msk [vmem:[%s2294_s5] sm:$0xff] %vm711_vm0, %v771_v43 }
 0x13e   : > { %v760_v45 = vsel %vm759_vm7, %v2013_v32, %v756_v44 }
 0x13f   : > { %v762_v46 = vmul.f32 %v760_v45, %v728_v18 }
 0x141   : > { %v767_v47 = vmul.f32 %v2006_v35, %v762_v46 }
 0x143   : > { %v772_v48 = vadd.f32 %v2007_v38, %v767_v47 }
 0x145   : > { %774 = vst.msk [vmem:[%s2294_s5 + $0x8] sm:$0xff] %vm711_vm0, %v772_v48 }
 0x146 PF: > { %s2558_s16 = sld [smem:[#allocation8_spill]]  ;;  %v2320_v61 = vld [vmem:[%s2294_s5] sm:$0xff]  ;;  %vm832_vm8 = vcmask 523264   ;;  %s2108_s3 = smov 64   ;;  %vm877_vm9 = vcmask 130048  }
 0x147   : > { %v2329_v1 = vld [vmem:[%s2245_s22] sm:$0x3]  ;;  %s2109_s22 = smov 112   ;;  %s2110_s24 = smov 48  }
 0x148   : > { %v788_v2 = vperm.slane %v2329_v1, 0  ;;  %s2111_s21 = smov 96   ;;  %s2112_s2 = smov 32   ;;  %v789_v38 = vperm.slane %v2329_v1, 1 }
 0x149   : > { %s2113_s1 = smov 16   ;;  %s2114_s19 = smov 80  }
 0x14a   : > { %s2559_s18 = sld [smem:[#allocation9_spill]]  ;;  %s2560_s29 = scalar_lea.vmem %s2519_s6, %s2230_s25 }
 0x14b   : > { %s2561_s27 = scalar_lea.vmem %s2520_s7, %s2230_s25 }
 0x14c   : > { %v1838_v49 = vld [vmem:[%s2558_s16 + $0x30] sm:$0xf]  ;;  %v1940_v50 = vld [vmem:[%s2558_s16 + $0x34] sm:$0xf0]  ;;  %v1830_v51 = vld [vmem:[%s2558_s16 + $0x20] sm:$0xf] }
 0x14d   : > { %v1839_v52 = vor.u32 %v1940_v50, %v1838_v49  ;;  %v1938_v53 = vld [vmem:[%s2558_s16 + $0x24] sm:$0xf0]  ;;  %v1822_v55 = vld [vmem:[%s2558_s16 + $0x10] sm:$0xf]  ;;  %v1936_v56 = vld [vmem:[%s2558_s16 + $0x14] sm:$0xf0] }
 0x14e   : > { %v1831_v54 = vor.u32 %v1938_v53, %v1830_v51  ;;  %v1823_v57 = vor.u32 %v1936_v56, %v1822_v55  ;;  %v1814_v58 = vld [vmem:[%s2558_s16] sm:$0xf]  ;;  %v1934_v59 = vld [vmem:[%s2558_s16 + $0x4] sm:$0xf0]  ;;  %v1939_v9 = vld [vmem:[%s2558_s16 + $0x34] sm:$0xf] }
 0x14f   : > { %840 = vmatpush.bf16.msra.mxu0 %v1839_v52  ;;  %v1815_v60 = vor.u32 %v1934_v59, %v1814_v58  ;;  %v2323_v62 = vld [vmem:[%s2294_s5 + $0x8] sm:$0xff]  ;;  %v1840_v10 = vld [vmem:[%s2558_s16 + $0x38] sm:$0xf0]  ;;  %v1937_v11 = vld [vmem:[%s2558_s16 + $0x24] sm:$0xf] }
 0x150   : > { %v777_v63 = vpack.c.bf16 %v2323_v62, %v2320_v61  ;;  %v1843_v12 = vor.u32 %v1939_v9, %v1840_v10  ;;  %v1832_v13 = vld [vmem:[%s2558_s16 + $0x28] sm:$0xf0]  ;;  %v1935_v15 = vld [vmem:[%s2558_s16 + $0x14] sm:$0xf]  ;;  %v1824_v16 = vld [vmem:[%s2558_s16 + $0x18] sm:$0xf0] }
 0x151   : > { %v1835_v14 = vor.u32 %v1937_v11, %v1832_v13  ;;  %v1827_v17 = vor.u32 %v1935_v15, %v1824_v16  ;;  %v1933_v18 = vld [vmem:[%s2558_s16 + $0x4] sm:$0xf]  ;;  %v1816_v19 = vld [vmem:[%s2558_s16 + $0x8] sm:$0xf0] }
 0x152   : > { %854 = vmatpush.bf16.msra.mxu1 %v1843_v12  ;;  %v1819_v20 = vor.u32 %v1933_v18, %v1816_v19  ;;  %v1941_v51 = vld [vmem:[%s2559_s18] sm:$0xff] }
 0x153   : > { %841 = vmatpush.bf16.msra.mxu0 %v1831_v54 }
 0x156   : > { %855 = vmatpush.bf16.msra.mxu1 %v1835_v14 }
 0x157   : > { %842 = vmatpush.bf16.msra.mxu0 %v1823_v57 }
 0x15a   : > { %856 = vmatpush.bf16.msra.mxu1 %v1827_v17 }
 0x15b   : > { %843 = vmatpush.bf16.msra.mxu0 %v1815_v60 }
 0x15e   : > { %1844 = vmatmul.msk.bf16.vlgmr.msra.gmra.mxu0 %vm832_vm8, %v777_v63  ;;  %857 = vmatpush.bf16.msra.mxu1 %v1819_v20 }
 0x161   : > { %1845 = vmatmul.msk.bf16.vlgmr.msra.gmra.mxu1 %vm832_vm8, %v777_v63 }
 0x1db   : > { %v845_v0 = vpop.f32.mrf.mxu0 }
 0x1dc   : > { %v846_v4 = vadd.f32 %v845_v0, %v788_v2 }
 0x1de   : > { %v859_v37 = vpop.f32.mrf.mxu1 }
 0x1df   : > { %v860_v39 = vadd.f32 %v859_v37, %v789_v38 }
 0x1e3   : > { %v847_v3 = vpop.f32.mrf.mxu0 }
 0x1e4   : > { %v848_v5 = vadd.f32 %v847_v3, %v788_v2 }
 0x1e6   : > { %v872_v6 = vpack.c.bf16 %v848_v5, %v846_v4  ;;  %v861_v40 = vpop.f32.mrf.mxu1 }
 0x1e7   : > { %v862_v41 = vadd.f32 %v861_v40, %v789_v38 }
 0x1e8   : > { %875 = vrot.lane.b32.xlu0 %v872_v6, %s2108_s3  ;;  %s2562_s3 = scalar_lea.vmem %s2521_s8, %s2230_s25 }
 0x1e9   : > { %v2351_v42 = vpack.c.bf16 %v862_v41, %v860_v39 }
 0x1eb   : > { %933 = vmatpush.bf16.msra.mxu3 %v2351_v42 }
 0x25a   : > { %v876_v7 = vpop.permute.xlu0 %875 }
 0x25b   : > { %v882_v8 = vsel %vm877_vm9, %v876_v7, 0 }
 0x25c   : > { %891 = vmatpush.bf16.xpose.msra.mxu2 %v882_v8 }
 0x263   : > { %1846 = vmatmul.msk.bf16.vlgmr.msra.gmra.mxu2 %vm877_vm9, %v872_v6 }
 0x2e6   : > { %v893_v21 = vpop.f32.mrf.mxu2 }
 0x2e7   : > { %v898_v22 = vmul.f32 0.25, %v893_v21 }
 0x2e9   : > { %v900_v23 = vsel %vm877_vm9, %v898_v22, -inf }
 0x2ea   : > { %901 = vmax.xlane.f32.xlu0 %v900_v23 }
 0x2ee   : > { %v895_v24 = vpop.f32.mrf.mxu2 }
 0x2ef   : > { %v899_v25 = vmul.f32 0.25, %v895_v24 }
 0x2f1   : > { %v903_v26 = vsel %vm877_vm9, %v899_v25, -inf }
 0x2f2   : > { %904 = vmax.xlane.f32.xlu1 %v903_v26 }
 0x35d   : > { %v902_v27 = vpop.xlane.xlu0 %901 }
 0x35e   : > { %v906_v28 = vsub.f32 %v898_v22, %v902_v27 }
 0x360   : > { %v908_v29 = vmul.f32 1.442695, %v906_v28 }
 0x362   : > { %2021 = vpow2.f32 %v908_v29 }
 0x365   : > { %v905_v30 = vpop.xlane.xlu1 %904 }
 0x366   : > { %v907_v31 = vsub.f32 %v899_v25, %v905_v30 }
 0x368   : > { %v2022_v32 = vpop.eup %2021  ;;  %v910_v33 = vmul.f32 1.442695, %v907_v31 }
 0x369   : > { %v912_v34 = vsel %vm877_vm9, %v2022_v32, 0.0 }
 0x36a   : > { %2023 = vpow2.f32 %v910_v33  ;;  %913 = vadd.xlane.f32.xlu1 %v912_v34 }
 0x370   : > { %v2024_v35 = vpop.eup %2023 }
 0x371   : > { %v915_v36 = vsel %vm877_vm9, %v2024_v35, 0.0 }
 0x372   : > { %916 = vadd.xlane.f32.xlu2 %v915_v36 }
 0x383   : > { %941 = vrot.lane.b32.xlu1 %v872_v6, %s2109_s22 }
 0x38a   : > { %943 = vrot.lane.b32.xlu2 %v872_v6, %s2110_s24 }
 0x38b   : > { %1058 = vrot.lane.b32.xlu1 %v872_v6, %s2111_s21 }
 0x392   : > { %1060 = vrot.lane.b32.xlu2 %v872_v6, %s2112_s2 }
 0x39a   : > { %1155 = vrot.lane.b32.xlu2 %v872_v6, %s2113_s1 }
 0x3a2   : > { %1153 = vrot.lane.b32.xlu2 %v872_v6, %s2114_s19 }
 0x3dd   : > { %v914_v43 = vpop.xlane.xlu1 %913 }
 0x3de   : > { %2025 = vrcp.f32 %v914_v43 }
 0x3e4   : > { %v2026_v45 = vpop.eup %2025 }
 0x3e5   : > { %v917_v44 = vpop.xlane.xlu2 %916  ;;  %v920_v48 = vmul.f32 %v2026_v45, %v2022_v32 }
 0x3e6   : > { %2027 = vrcp.f32 %v917_v44 }
 0x3ec   : > { %v2028_v46 = vpop.eup %2027 }
 0x3ed   : > { %v944_v47 = vpop.permute.xlu2 %943  ;;  %v921_v49 = vmul.f32 %v2028_v46, %v2024_v35 }
 0x3ee   : > { %v949_v50 = vsel %vm877_vm9, %v944_v47, 0 }
 0x3ef   : > { %958 = vmatpush.bf16.xpose.msrb.mxu3 %v949_v50  ;;  %v922_v52 = vpack.c.bf16 %v921_v49, %v920_v48 }
 0x3f1   : > { %1847 = vmatmul.msk.bf16.vlgmr.msra.gmra.mxu3 %vm877_vm9, %v922_v52 }
 0x3f5   : > { %v1061_v53 = vpop.permute.xlu2 %1060  ;;  %v942_v56 = vpop.permute.xlu1 %941 }
 0x3f6   : > { %v1066_v57 = vsel %vm877_vm9, %v1061_v53, 0 }
 0x3f7   : > { %1051 = vmatpush.bf16.msra.mxu3 %v1941_v51 }
 0x3fd   : > { %v1156_v54 = vpop.permute.xlu2 %1155  ;;  %v1059_v8 = vpop.permute.xlu1 %1058 }
 0x3fe   : > { %v1161_v55 = vsel %vm877_vm9, %v1156_v54, 0 }
 0x3ff   : > { %1170 = vmatpush.bf16.xpose.msrb.mxu1 %v1161_v55 }
 0x401   : > { %1848 = vmatmul.msk.bf16.vlgmr.msrb.gmra.mxu3 %vm877_vm9, %v942_v56 }
 0x402   : > { %1075 = vmatpush.bf16.xpose.msrb.mxu3 %v1066_v57 }
 0x405   : > { %v1154_v58 = vpop.permute.xlu2 %1153 }
 0x406   : > { %1867 = vmatmul.msk.bf16.vlgmr.msrb.gmra.mxu1 %vm877_vm9, %v1154_v58 }
 0x474   : > { %v935_v59 = vpop.f32.mrf.mxu3 }
 0x47c   : > { %v937_v60 = vpop.f32.mrf.mxu3 }
 0x47d   : > { %v940_v63 = vpack.c.bf16 %v937_v60, %v935_v59 }
 0x47f   : > { %1859 = vmatmul.msk.bf16.vlgmr.msra.gmra.mxu3 %vm877_vm9, %v940_v63 }
 0x483   : > { %v1172_v0 = vpop.f32.mrf.mxu1 }
 0x484   : > { %v1177_v1 = vmul.f32 0.25, %v1172_v0  ;;  %v960_v2 = vpop.f32.mrf.mxu3 }
 0x485   : > { %v965_v3 = vmul.f32 0.25, %v960_v2 }
 0x486   : > { %v1179_v4 = vsel %vm877_vm9, %v1177_v1, -inf }
 0x487   : > { %1180 = vmax.xlane.f32.xlu2 %v1179_v4  ;;  %v967_v5 = vsel %vm877_vm9, %v965_v3, -inf  ;;  %v1942_v4 = vld [vmem:[%s2559_s18 + $0x8] sm:$0xff] }
 0x488   : > { %968 = vmax.xlane.f32.xlu1 %v967_v5  ;;  %1028 = vmatpush.bf16.msrb.mxu0 %v1942_v4  ;;  %v1945_v4 = vld [vmem:[%s2268_s4] sm:$0xff] }
 0x48b   : > { %v1174_v6 = vpop.f32.mrf.mxu1 }
 0x48c   : > { %v1178_v7 = vmul.f32 0.25, %v1174_v6  ;;  %v962_v10 = vpop.f32.mrf.mxu3 }
 0x48d   : > { %v966_v11 = vmul.f32 0.25, %v962_v10 }
 0x48e   : > { %v1182_v9 = vsel %vm877_vm9, %v1178_v7, -inf }
 0x48f   : > { %1183 = vmax.xlane.f32.xlu0 %v1182_v9  ;;  %1860 = vmatmul.msk.bf16.vlgmr.msrb.gmra.mxu3 %vm877_vm9, %v1059_v8  ;;  %v970_v12 = vsel %vm877_vm9, %v966_v11, -inf }
 0x497   : > { %971 = vmax.xlane.f32.xlu0 %v970_v12 }
 0x4a1   : > { %991 = vrot.lane.b32.xlu1 %v2351_v42, %s2109_s22 }
 0x4fa   : > { %v1181_v13 = vpop.xlane.xlu2 %1180 }
 0x4fb   : > { %v1185_v14 = vsub.f32 %v1177_v1, %v1181_v13  ;;  %v969_v15 = vpop.xlane.xlu1 %968 }
 0x4fc   : > { %v973_v16 = vsub.f32 %v965_v3, %v969_v15 }
 0x4fd   : > { %v1187_v17 = vmul.f32 1.442695, %v1185_v14 }
 0x4fe   : > { %v975_v18 = vmul.f32 1.442695, %v973_v16 }
 0x4ff   : > { %2029 = vpow2.f32 %v1187_v17  ;;  %v1944_v17 = vld [vmem:[%s2559_s18 + $0x18] sm:$0xff] }
 0x500   : > { %2031 = vpow2.f32 %v975_v18  ;;  %v1943_v18 = vld [vmem:[%s2559_s18 + $0x10] sm:$0xff] }
 0x501   : > { %1144 = vmatpush.bf16.msra.mxu0 %v1943_v18 }
 0x502   : > { %v2369_v19 = vpop.f32.mrf.mxu3  ;;  %v1184_v23 = vpop.xlane.xlu0 %1183 }
 0x503   : > { %v1186_v35 = vsub.f32 %v1178_v7, %v1184_v23 }
 0x505   : > { %v2371_v20 = vpop.eup %2029  ;;  %v1189_v37 = vmul.f32 1.442695, %v1186_v35 }
 0x506   : > { %v2032_v21 = vpop.eup %2031  ;;  %v1191_v22 = vsel %vm877_vm9, %v2371_v20, 0.0 }
 0x507   : > { %1192 = vadd.xlane.f32.xlu2 %v1191_v22  ;;  %v979_v24 = vsel %vm877_vm9, %v2032_v21, 0.0 }
 0x508   : > { %980 = vadd.xlane.f32.xlu0 %v979_v24 }
 0x50a   : > { %v2376_v25 = vpop.f32.mrf.mxu3  ;;  %v972_v26 = vpop.xlane.xlu0 %971 }
 0x50b   : > { %v974_v30 = vsub.f32 %v966_v11, %v972_v26 }
 0x50d   : > { %v977_v32 = vmul.f32 1.442695, %v974_v30 }
 0x50f   : > { %2033 = vpow2.f32 %v977_v32 }
 0x510   : > { %2035 = vpow2.f32 %v1189_v37 }
 0x512   : > { %v1077_v27 = vpop.f32.mrf.mxu3 }
 0x513   : > { %v1082_v28 = vmul.f32 0.25, %v1077_v27  ;;  %v992_v29 = vpop.permute.xlu1 %991 }
 0x514   : > { %1004 = vmatpush.bf16.msrb.mxu2 %v992_v29 }
 0x515   : > { %v1084_v31 = vsel %vm877_vm9, %v1082_v28, -inf  ;;  %v2034_v38 = vpop.eup %2033 }
 0x516   : > { %1085 = vmax.xlane.f32.xlu0 %v1084_v31  ;;  %v982_v39 = vsel %vm877_vm9, %v2034_v38, 0.0  ;;  %v2036_v40 = vpop.eup %2035 }
 0x517   : > { %v1194_v41 = vsel %vm877_vm9, %v2036_v40, 0.0 }
 0x51a   : > { %v1079_v33 = vpop.f32.mrf.mxu3 }
 0x51b   : > { %v1083_v34 = vmul.f32 0.25, %v1079_v33  ;;  %v2014_v33 = vld [vmem:[%s2560_s29] ss:$0 sm:$0xff] }
 0x51d   : > { %v1087_v36 = vsel %vm877_vm9, %v1083_v34, -inf }
 0x51e   : > { %1088 = vmax.xlane.f32.xlu0 %v1087_v36 }
 0x526   : > { %983 = vadd.xlane.f32.xlu0 %v982_v39 }
 0x52e   : > { %1195 = vadd.xlane.f32.xlu0 %v1194_v41 }
 0x57a   : > { %v1193_v60 = vpop.xlane.xlu2 %1192 }
 0x57b   : > { %v981_v43 = vpop.xlane.xlu0 %980 }
 0x589   : > { %v1086_v44 = vpop.xlane.xlu0 %1085 }
 0x58a   : > { %v1090_v45 = vsub.f32 %v1082_v28, %v1086_v44 }
 0x58c   : > { %v1092_v46 = vmul.f32 1.442695, %v1090_v45 }
 0x58e   : > { %2037 = vpow2.f32 %v1092_v46  ;;  %v2115_v46 = vmov 64.0  }
 0x591   : > { %v1089_v47 = vpop.xlane.xlu0 %1088 }
 0x592   : > { %v1091_v48 = vsub.f32 %v1083_v34, %v1089_v47 }
 0x594   : > { %v2038_v49 = vpop.eup %2037  ;;  %v1094_v50 = vmul.f32 1.442695, %v1091_v48 }
 0x595   : > { %v1096_v51 = vsel %vm877_vm9, %v2038_v49, 0.0 }
 0x596   : > { %2039 = vpow2.f32 %v1094_v50  ;;  %1097 = vadd.xlane.f32.xlu2 %v1096_v51 }
 0x597   : > { %2041 = vrcp.f32 %v981_v43 }
 0x599   : > { %v984_v52 = vpop.xlane.xlu0 %983 }
 0x59a   : > { %2043 = vrcp.f32 %v984_v52 }
 0x59c   : > { %v2040_v53 = vpop.eup %2039 }
 0x59d   : > { %v1099_v54 = vsel %vm877_vm9, %v2040_v53, 0.0  ;;  %v2042_v55 = vpop.eup %2041 }
 0x59e   : > { %1100 = vadd.xlane.f32.xlu0 %v1099_v54  ;;  %v987_v57 = vmul.f32 %v2042_v55, %v2032_v21 }
 0x5a0   : > { %v2044_v56 = vpop.eup %2043 }
 0x5a1   : > { %v988_v58 = vmul.f32 %v2044_v56, %v2034_v38  ;;  %v1196_v63 = vpop.xlane.xlu0 %1195 }
 0x5a2   : > { %2045 = vrcp.f32 %v1196_v63  ;;  %v1947_v63 = vld [vmem:[%s2268_s4 + $0x10] sm:$0xff] }
 0x5a3   : > { %v989_v59 = vpack.c.bf16 %v988_v58, %v987_v57  ;;  %2047 = vrcp.f32 %v1193_v60  ;;  %v1948_v60 = vld [vmem:[%s2268_s4 + $0x18] sm:$0xff] }
 0x5a5   : > { %1849 = vmatmul.msk.bf16.vlgmr.msrb.gmra.mxu2 %vm877_vm9, %v989_v59 }
 0x5a8   : > { %v2046_v1 = vpop.eup %2045 }
 0x5a9   : > { %v2048_v2 = vpop.eup %2047  ;;  %v1200_v3 = vmul.f32 %v2046_v1, %v2036_v40 }
 0x5aa   : > { %v1199_v5 = vmul.f32 %v2048_v2, %v2371_v20 }
 0x5ac   : > { %v1201_v7 = vpack.c.bf16 %v1200_v3, %v1199_v5 }
 0x5ae   : > { %1202 = vrot.lane.b32.xlu2 %v2351_v42, %s2114_s19 }
 0x5b2   : > { %1107 = vrot.lane.b32.xlu0 %v2351_v42, %s2111_s21  ;;  %s2563_s21 = scalar_lea.vmem %s2523_s10, %s2230_s25 }
 0x609   : > { %v1098_v0 = vpop.xlane.xlu2 %1097 }
 0x611   : > { %v1203_v6 = vpop.permute.xlu2 %1202  ;;  %v1101_v8 = vpop.xlane.xlu0 %1100 }
 0x612   : > { %1215 = vmatpush.bf16.msra.mxu3 %v1203_v6  ;;  %2049 = vrcp.f32 %v1101_v8 }
 0x613   : > { %2051 = vrcp.f32 %v1098_v0  ;;  %v1946_v0 = vld [vmem:[%s2268_s4 + $0x8] sm:$0xff] }
 0x614   : > { %2053 = vrcp.f32 %v2115_v46 }
 0x615   : > { %1868 = vmatmul.msk.bf16.vlgmr.msra.gmra.mxu3 %vm877_vm9, %v1201_v7 }
 0x618   : > { %v2050_v42 = vpop.eup %2049 }
 0x619   : > { %v2052_v9 = vpop.eup %2051  ;;  %v1105_v10 = vmul.f32 %v2050_v42, %v2040_v53 }
 0x61a   : > { %v1104_v11 = vmul.f32 %v2052_v9, %v2038_v49  ;;  %v2054_v47 = vpop.eup %2053 }
 0x61b   : > { %v1265_v48 = vmul.f32 64.0, %v2054_v47  ;;  %vm1269_vm10 = vweird.f32 %v2054_v47 }
 0x61c   : > { %v1106_v13 = vpack.c.bf16 %v1105_v10, %v1104_v11 }
 0x624   : > { %v1108_v12 = vpop.permute.xlu0 %1107 }
 0x625   : > { %1120 = vmatpush.bf16.msra.mxu2 %v1108_v12 }
 0x628   : > { %v1006_v14 = vpop.f32.mrf.mxu2  ;;  %1861 = vmatmul.msk.bf16.vlgmr.msra.gmra.mxu2 %vm877_vm9, %v1106_v13 }
 0x629   : > { %1239 = vmatpush.bf16.msrb.mxu2 %v1944_v17 }
 0x630   : > { %v1008_v15 = vpop.f32.mrf.mxu2 }
 0x631   : > { %v1011_v16 = vpack.c.bf16 %v1008_v15, %v1006_v14 }
 0x633   : > { %1854 = vmatmul.msk.bf16.vlgmr.msrb.gmra.mxu0 %vm877_vm9, %v1011_v16 }
 0x634   : > { %1363 = vmatpush.bf16.msrb.mxu0 %v1948_v60 }
 0x638   : > { %1364 = vmatpush.bf16.msrb.mxu0 %v1947_v63  ;;  %v1951_v63 = vld [vmem:[%s2277_s28 + $0x10] sm:$0xff] }
 0x63c   : > { %1365 = vmatpush.bf16.msrb.mxu0 %v1946_v0 }
 0x640   : > { %1366 = vmatpush.bf16.msrb.mxu0 %v1945_v4 }
 0x698   : > { %v1217_v20 = vpop.f32.mrf.mxu3 }
 0x6a0   : > { %v1219_v21 = vpop.f32.mrf.mxu3 }
 0x6a1   : > { %v1222_v22 = vpack.c.bf16 %v1219_v21, %v1217_v20  ;;  %v2015_v20 = vld [vmem:[%s2561_s27] ss:$0 sm:$0xff] }
 0x6a3   : > { %1873 = vmatmul.msk.bf16.vlgmr.msrb.gmra.mxu2 %vm877_vm9, %v1222_v22 }
 0x6ab   : > { %v1122_v23 = vpop.f32.mrf.mxu2 }
 0x6b0   : > { %v1030_v27 = vpop.f32.mrf.mxu0 }
 0x6b1   : > { %v1054_v29 = vadd.f32 %v2369_v19, %v1030_v27 }
 0x6b3   : > { %v1124_v24 = vpop.f32.mrf.mxu2 }
 0x6b4   : > { %v1127_v26 = vpack.c.bf16 %v1124_v24, %v1122_v23  ;;  %v2016_v24 = vld [vmem:[%s2562_s3] ss:$0 sm:$0xff] }
 0x6b6   : > { %1866 = vmatmul.msk.bf16.vlgmr.msra.gmra.mxu0 %vm877_vm9, %v1127_v26 }
 0x6b8   : > { %v1032_v28 = vpop.f32.mrf.mxu0 }
 0x6b9   : > { %v1056_v36 = vadd.f32 %v2376_v25, %v1032_v28  ;;  %v1266_v25 = vsub.f32 1.0, %v1265_v48 }
 0x6bb   : > { %v1267_v49 = vmul.f32 %v2054_v47, %v1266_v25  ;;  %v1953_v25 = vld [vmem:[%s2277_s28 + $0x20] sm:$0xff] }
 0x726   : > { %v1241_v30 = vpop.f32.mrf.mxu2 }
 0x72e   : > { %v1243_v41 = vpop.f32.mrf.mxu2 }
 0x733   : > { %v1146_v31 = vpop.f32.mrf.mxu0 }
 0x734   : > { %v1151_v32 = vadd.f32 %v1146_v31, %v1054_v29 }
 0x736   : > { %v1246_v34 = vadd.f32 %v1241_v30, %v1151_v32  ;;  %v2017_v32 = vld [vmem:[%s2563_s21] ss:$0 sm:$0xff] }
 0x738   : > { %v1252_v35 = vadd.f32 %v2014_v33, %v1246_v34 }
 0x73a   : > { %v1254_v37 = vadd.f32 %v1252_v35, %v2320_v61  ;;  %v1268_v61 = vadd.f32 %v2054_v47, %v1267_v49  ;;  %v1956_v35 = vld [vmem:[%s2277_s28 + $0x38] sm:$0xff] }
 0x73b   : > { %v1148_v38 = vpop.f32.mrf.mxu0  ;;  %1530 = vmatpush.bf16.msra.mxu1 %v1956_v35 }
 0x73c   : > { %v1152_v39 = vadd.f32 %v1148_v38, %v1056_v36  ;;  %v1258_v40 = vsel %vm832_vm8, %v1254_v37, 0.0  ;;  %v2409_v50 = vsel %vm1269_vm10, %v2054_v47, %v1268_v61  ;;  %v1955_v38 = vld [vmem:[%s2277_s28 + $0x30] sm:$0xff] }
 0x73d   : > { %1259 = vadd.xlane.f32.xlu1 %v1258_v40 }
 0x73e   : > { %v1247_v19 = vadd.f32 %v1243_v41, %v1152_v39 }
 0x73f   : > { %1531 = vmatpush.bf16.msra.mxu1 %v1955_v38 }
 0x740   : > { %v1253_v43 = vadd.f32 %v2014_v33, %v1247_v19 }
 0x742   : > { %v1255_v44 = vadd.f32 %v1253_v43, %v2323_v62 }
 0x744   : > { %v1261_v45 = vsel %vm832_vm8, %v1255_v44, 0.0 }
 0x745   : > { %1262 = vadd.xlane.f32.xlu0 %v1261_v45 }
 0x7b0   : > { %v1260_v51 = vpop.xlane.xlu1 %1259 }
 0x7b1   : > { %v1271_v52 = vmul.f32 %v2409_v50, %v1260_v51 }
 0x7b3   : > { %v1273_v62 = vsub.f32 %v1254_v37, %v1271_v52 }
 0x7b5   : > { %v1275_v53 = vmul.f32 %v1273_v62, %v1273_v62 }
 0x7b7   : > { %v1277_v54 = vsel %vm832_vm8, %v1275_v53, 0.0  ;;  %v1952_v53 = vld [vmem:[%s2277_s28 + $0x18] sm:$0xff] }
 0x7b8   : > { %1278 = vadd.xlane.f32.xlu2 %v1277_v54  ;;  %v1263_v55 = vpop.xlane.xlu0 %1262 }
 0x7b9   : > { %v1272_v56 = vmul.f32 %v2409_v50, %v1263_v55 }
 0x7bb   : > { %v1274_v57 = vsub.f32 %v1255_v44, %v1272_v56  ;;  %v1954_v44 = vld [vmem:[%s2277_s28 + $0x28] sm:$0xff] }
 0x7bc   : > { %1532 = vmatpush.bf16.msra.mxu1 %v1954_v44 }
 0x7bd   : > { %v1276_v58 = vmul.f32 %v1274_v57, %v1274_v57 }
 0x7bf   : > { %v1280_v59 = vsel %vm832_vm8, %v1276_v58, 0.0 }
 0x7c0   : > { %1281 = vadd.xlane.f32.xlu1 %v1280_v59  ;;  %1533 = vmatpush.bf16.msra.mxu1 %v1953_v25 }
 0x7c4   : > { %1534 = vmatpush.bf16.msra.mxu1 %v1952_v53 }
 0x7c8   : > { %1535 = vmatpush.bf16.msra.mxu1 %v1951_v63 }
 0x82b   : > { %v1279_v1 = vpop.xlane.xlu2 %1278 }
 0x82c   : > { %v1283_v2 = vmul.f32 %v1279_v1, %v2409_v50 }
 0x82e   : > { %v1285_v3 = vadd.f32 1e-12, %v1283_v2 }
 0x830   : > { %2055 = vrsqrt.f32 %v1285_v3  ;;  %vm1293_vm12 = vweird.f32 %v1285_v3 }
 0x833   : > { %v1282_v5 = vpop.xlane.xlu1 %1281 }
 0x834   : > { %v1284_v6 = vmul.f32 %v1282_v5, %v2409_v50 }
 0x836   : > { %v2056_v7 = vpop.eup %2055  ;;  %v1286_v8 = vadd.f32 1e-12, %v1284_v6 }
 0x837   : > { %v1288_v42 = vmul.f32 %v2056_v7, %v1285_v3  ;;  %vm1294_vm11 = vweird.f32 %v2056_v7 }
 0x838   : > { %2057 = vrsqrt.f32 %v1286_v8  ;;  %vm1295_vm13 = vmor %vm1293_vm12, %vm1294_vm11  ;;  %vm1303_vm15 = vweird.f32 %v1286_v8 }
 0x839   : > { %v1289_v9 = vmul.f32 %v2056_v7, %v1288_v42 }
 0x83b   : > { %v1290_v10 = vmul.f32 0.5, %v1289_v9 }
 0x83d   : > { %v1291_v11 = vsub.f32 1.5, %v1290_v10 }
 0x83e   : > { %v2058_v12 = vpop.eup %2057 }
 0x83f   : > { %v1292_v13 = vmul.f32 %v2056_v7, %v1291_v11  ;;  %v1298_v14 = vmul.f32 %v2058_v12, %v1286_v8  ;;  %vm1304_vm14 = vweird.f32 %v2058_v12 }
 0x840   : > { %vm1305_vm0 = vmor %vm1303_vm15, %vm1304_vm14 }
 0x841   : > { %v1299_v15 = vmul.f32 %v2058_v12, %v1298_v14  ;;  %v1296_v16 = vsel %vm1295_vm13, %v2056_v7, %v1292_v13  ;;  %v1950_v7 = vld [vmem:[%s2277_s28 + $0x8] sm:$0xff] }
 0x842   : > { %v1307_v21 = vmul.f32 %v1296_v16, %v1273_v62  ;;  %1536 = vmatpush.bf16.msra.mxu1 %v1950_v7 }
 0x843   : > { %v1300_v17 = vmul.f32 0.5, %v1299_v15 }
 0x844   : > { %v1312_v26 = vmul.f32 %v2015_v20, %v1307_v21 }
 0x845   : > { %v1301_v18 = vsub.f32 1.5, %v1300_v17 }
 0x846   : > { %v2431_v29 = vadd.f32 %v2016_v24, %v1312_v26 }
 0x847   : > { %v1302_v22 = vmul.f32 %v2058_v12, %v1301_v18 }
 0x849   : > { %v1306_v23 = vsel %vm1305_vm0, %v2058_v12, %v1302_v22  ;;  %v1949_v12 = vld [vmem:[%s2277_s28] sm:$0xff] }
 0x84a   : > { %v1308_v27 = vmul.f32 %v1306_v23, %v1274_v57  ;;  %1537 = vmatpush.bf16.msra.mxu1 %v1949_v12 }
 0x84c   : > { %v1313_v28 = vmul.f32 %v2015_v20, %v1308_v27 }
 0x84e   : > { %v2433_v30 = vadd.f32 %v2016_v24, %v1313_v28 }
 0x850   : > { %v1319_v31 = vpack.c.bf16 %v2433_v30, %v2431_v29 }
 0x852   : > { %1890 = vmatmul.msk.bf16.vlgmr.msrb.gmra.mxu0 %vm832_vm8, %v1319_v31 }
 0x8cf   : > { %v1368_v33 = vpop.f32.mrf.mxu0 }
 0x8d0   : > { %v2443_v34 = vadd.f32 %v2017_v32, %v1368_v33 }
 0x8d2   : > { %v2447_v36 = vmul.f32 0.70710677, %v2443_v34 }
 0x8d4   : > { %v1377_v37 = vmul.f32 %v2447_v36, %v2447_v36 }
 0x8d6   : > { %v1378_v39 = vmin.f32 %v1377_v37, 16.0 }
 0x8d7   : > { %v1370_v40 = vpop.f32.mrf.mxu0 }
 0x8d8   : > { %v1379_v41 = vmul.f32 2.1237322e-06, %v1378_v39  ;;  %v1390_v19 = vmul.f32 3.8918573e-05, %v1378_v39  ;;  %v2452_v43 = vadd.f32 %v2017_v32, %v1370_v40 }
 0x8da   : > { %v1380_v45 = vadd.f32 0.00028619796, %v1379_v41  ;;  %v1391_v46 = vadd.f32 0.001143296, %v1390_v19  ;;  %v2456_v47 = vmul.f32 0.70710677, %v2452_v43 }
 0x8dc   : > { %v1392_v48 = vmul.f32 %v1391_v46, %v1378_v39  ;;  %v1417_v49 = vmul.f32 %v2456_v47, %v2456_v47  ;;  %v1381_v61 = vmul.f32 %v1380_v45, %v1378_v39 }
 0x8de   : > { %v1393_v51 = vadd.f32 0.014752088, %v1392_v48  ;;  %v1418_v52 = vmin.f32 %v1417_v49, 16.0  ;;  %v1382_v56 = vadd.f32 0.0036580483, %v1381_v61 }
 0x8e0   : > { %v1394_v62 = vmul.f32 %v1393_v51, %v1378_v39  ;;  %v1419_v54 = vmul.f32 2.1237322e-06, %v1418_v52  ;;  %v1430_v55 = vmul.f32 3.8918573e-05, %v1418_v52  ;;  %v1383_v2 = vmul.f32 %v1382_v56, %v1378_v39 }
 0x8e2   : > { %v1395_v57 = vadd.f32 0.112945676, %v1394_v62  ;;  %v1420_v58 = vadd.f32 0.00028619796, %v1419_v54  ;;  %v1431_v59 = vadd.f32 0.001143296, %v1430_v55 }
 0x8e3   : > { %v1384_v42 = vadd.f32 0.05243302, %v1383_v2 }
 0x8e4   : > { %v1396_v60 = vmul.f32 %v1395_v57, %v1378_v39  ;;  %v1421_v0 = vmul.f32 %v1420_v58, %v1418_v52  ;;  %v1432_v1 = vmul.f32 %v1431_v59, %v1418_v52  ;;  %v1373_v58 = vmul.f32 0.5, %v2443_v34 }
 0x8e5   : > { %v1385_v14 = vmul.f32 %v1384_v42, %v1378_v39  ;;  %v1374_v59 = vmul.f32 0.5, %v2452_v43 }
 0x8e6   : > { %v1397_v3 = vadd.f32 0.4994258, %v1396_v60  ;;  %v1422_v4 = vadd.f32 0.0036580483, %v1421_v0  ;;  %v1433_v5 = vadd.f32 0.014752088, %v1432_v1 }
 0x8e7   : > { %v1386_v20 = vadd.f32 0.18741608, %v1385_v14 }
 0x8e8   : > { %v1398_v6 = vmul.f32 %v1397_v3, %v1378_v39  ;;  %v1434_v8 = vmul.f32 %v1433_v5, %v1418_v52  ;;  %v1423_v10 = vmul.f32 %v1422_v4, %v1418_v52 }
 0x8e9   : > { %v1387_v26 = vmul.f32 %v1386_v20, %v1378_v39 }
 0x8ea   : > { %v1399_v9 = vadd.f32 1.0, %v1398_v6  ;;  %v1435_v11 = vadd.f32 0.112945676, %v1434_v8  ;;  %v1424_v15 = vadd.f32 0.05243302, %v1423_v10 }
 0x8eb   : > { %v1388_v35 = vadd.f32 1.1283791, %v1387_v26 }
 0x8ec   : > { %2059 = vrcp.f32 %v1399_v9  ;;  %v1436_v13 = vmul.f32 %v1435_v11, %v1418_v52  ;;  %v1425_v22 = vmul.f32 %v1424_v15, %v1418_v52  ;;  %v1411_v28 = vand.u32 2147483648, %v1399_v9 }
 0x8ed   : > { %v1409_v32 = vand.u32 2147483647, %v1399_v9  ;;  %vm1405_vm2 = vweird.f32 %v1399_v9  ;;  %v1389_v45 = vmul.f32 %v1388_v35, %v2447_v36 }
 0x8ee   : > { %v1437_v16 = vadd.f32 0.4994258, %v1436_v13  ;;  %v1426_v31 = vadd.f32 0.18741608, %v1425_v22  ;;  %v1412_v40 = vor.u32 1.1754944e-38, %v1411_v28 }
 0x8ef   : > { %vm1410_vm4 = vcmp.eq.f32.partialorder %v1409_v32, 8.507059e+37 }
 0x8f0   : > { %v1438_v17 = vmul.f32 %v1437_v16, %v1418_v52  ;;  %v1427_v41 = vmul.f32 %v1426_v31, %v1418_v52 }
 0x8f2   : > { %v2060_v18 = vpop.eup %2059  ;;  %v1439_v23 = vadd.f32 1.0, %v1438_v17  ;;  %v1428_v39 = vadd.f32 1.1283791, %v1427_v41 }
 0x8f3   : > { %v1401_v21 = vmul.f32 %v2060_v18, %v1399_v9  ;;  %vm1406_vm1 = vweird.f32 %v2060_v18 }
 0x8f4   : > { %2061 = vrcp.f32 %v1439_v23  ;;  %vm1407_vm3 = vmor %vm1405_vm2, %vm1406_vm1  ;;  %v1451_v48 = vand.u32 2147483648, %v1439_v23  ;;  %v1449_v61 = vand.u32 2147483647, %v1439_v23  ;;  %vm1445_vm6 = vweird.f32 %v1439_v23 }
 0x8f5   : > { %v1402_v24 = vsub.f32 1.0, %v1401_v21  ;;  %v1429_v52 = vmul.f32 %v1428_v39, %v2456_v47  ;;  %v2018_v47 = vld [vmem:[%s690_s17] ss:$0 sm:$0xff] }
 0x8f6   : > { %v1452_v62 = vor.u32 1.1754944e-38, %v1451_v48  ;;  %vm1450_vm9 = vcmp.eq.f32.partialorder %v1449_v61, 8.507059e+37 }
 0x8f7   : > { %v1403_v27 = vmul.f32 %v2060_v18, %v1402_v24 }
 0x8f9   : > { %v1404_v33 = vadd.f32 %v2060_v18, %v1403_v27 }
 0x8fa   : > { %v2062_v37 = vpop.eup %2061 }
 0x8fb   : > { %v1408_v38 = vsel %vm1407_vm3, %v2060_v18, %v1404_v33  ;;  %v1441_v19 = vmul.f32 %v2062_v37, %v1439_v23  ;;  %vm1446_vm5 = vweird.f32 %v2062_v37  ;;  %v2019_v33 = vld [vmem:[%s693_s20] ss:$0 sm:$0xff] }
 0x8fc   : > { %v1413_v44 = vsel %vm1410_vm4, %v1412_v40, %v1408_v38  ;;  %vm1447_vm7 = vmor %vm1445_vm6, %vm1446_vm5 }
 0x8fd   : > { %v1442_v46 = vsub.f32 1.0, %v1441_v19  ;;  %v1414_v25 = vmul.f32 %v1413_v44, %v1389_v45 }
 0x8ff   : > { %v1443_v49 = vmul.f32 %v2062_v37, %v1442_v46  ;;  %v1891_v53 = vclamps-f32 %v1414_v25, 1.0 }
 0x901   : > { %v1444_v51 = vadd.f32 %v2062_v37, %v1443_v49  ;;  %v1457_v36 = vadd.f32 1.0, %v1891_v53 }
 0x903   : > { %v1448_v54 = vsel %vm1447_vm7, %v2062_v37, %v1444_v51  ;;  %v1459_v63 = vmul.f32 %v1457_v36, %v1373_v58  ;;  %v2020_v37 = vld [vmem:[%s696_s23] ss:$0 sm:$0xff] }
 0x904   : > { %v1453_v55 = vsel %vm1450_vm9, %v1452_v62, %v1448_v54 }
 0x905   : > { %v1454_v56 = vmul.f32 %v1453_v55, %v1429_v52 }
 0x907   : > { %v1892_v57 = vclamps-f32 %v1454_v56, 1.0 }
 0x909   : > { %v1458_v60 = vadd.f32 1.0, %v1892_v57 }
 0x90b   : > { %v1460_v0 = vmul.f32 %v1458_v60, %v1374_v59 }
 0x90d   : > { %v1461_v1 = vpack.c.bf16 %v1460_v0, %v1459_v63 }
 0x90f   : > { %1538 = vmatmul.bf16.vlgmr.msra.gmra.mxu1 %v1461_v1 }
 0x98c   : > { %v1539_v2 = vpop.f32.mrf.mxu1 }
 0x98d   : > { %v1540_v3 = vadd.f32 %v2018_v47, %v1539_v2 }
 0x98f   : > { %v1544_v4 = vadd.f32 %v1540_v3, %v2431_v29 }
 0x991   : > { %v1548_v5 = vsel %vm832_vm8, %v1544_v4, 0.0 }
 0x992   : > { %1549 = vadd.xlane.f32.xlu1 %v1548_v5 }
 0x994   : > { %v1541_v34 = vpop.f32.mrf.mxu1 }
 0x995   : > { %v1542_v6 = vadd.f32 %v2018_v47, %v1541_v34 }
 0x997   : > { %v1545_v43 = vadd.f32 %v1542_v6, %v2433_v30 }
 0x999   : > { %v1551_v7 = vsel %vm832_vm8, %v1545_v43, 0.0 }
 0x99a   : > { %1552 = vadd.xlane.f32.xlu1 %v1551_v7 }
 0xa05   : > { %v1550_v8 = vpop.xlane.xlu1 %1549 }
 0xa06   : > { %v1554_v42 = vmul.f32 %v1550_v8, %v2409_v50 }
 0xa08   : > { %v1556_v9 = vsub.f32 %v1544_v4, %v1554_v42 }
 0xa0a   : > { %v1558_v10 = vmul.f32 %v1556_v9, %v1556_v9 }
 0xa0c   : > { %v1560_v11 = vsel %vm832_vm8, %v1558_v10, 0.0 }
 0xa0d   : > { %1561 = vadd.xlane.f32.xlu0 %v1560_v11  ;;  %v1553_v12 = vpop.xlane.xlu1 %1552 }
 0xa0e   : > { %v1555_v29 = vmul.f32 %v1553_v12, %v2409_v50 }
 0xa10   : > { %v1557_v13 = vsub.f32 %v1545_v43, %v1555_v29 }
 0xa12   : > { %v1559_v14 = vmul.f32 %v1557_v13, %v1557_v13 }
 0xa14   : > { %v1563_v15 = vsel %vm832_vm8, %v1559_v14, 0.0 }
 0xa15   : > { %1564 = vadd.xlane.f32.xlu2 %v1563_v15 }
 0xa80   : > { %v1562_v30 = vpop.xlane.xlu0 %1561 }
 0xa81   : > { %v1566_v16 = vmul.f32 %v1562_v30, %v2409_v50 }
 0xa83   : > { %v1568_v17 = vadd.f32 1e-12, %v1566_v16 }
 0xa85   : > { %2063 = vrsqrt.f32 %v1568_v17  ;;  %vm1576_vm11 = vweird.f32 %v1568_v17 }
 0xa88   : > { %v1565_v18 = vpop.xlane.xlu2 %1564 }
 0xa89   : > { %v1567_v20 = vmul.f32 %v1565_v18, %v2409_v50 }
 0xa8b   : > { %v2064_v21 = vpop.eup %2063  ;;  %v1569_v22 = vadd.f32 1e-12, %v1567_v20 }
 0xa8c   : > { %v1571_v23 = vmul.f32 %v2064_v21, %v1568_v17  ;;  %vm1577_vm10 = vweird.f32 %v2064_v21 }
 0xa8d   : > { %2065 = vrsqrt.f32 %v1569_v22  ;;  %vm1578_vm12 = vmor %vm1576_vm11, %vm1577_vm10  ;;  %vm1586_vm14 = vweird.f32 %v1569_v22 }
 0xa8e   : > { %v1572_v24 = vmul.f32 %v2064_v21, %v1571_v23 }
 0xa90   : > { %v1573_v26 = vmul.f32 0.5, %v1572_v24 }
 0xa92   : > { %v1574_v27 = vsub.f32 1.5, %v1573_v26 }
 0xa93   : > { %v2066_v28 = vpop.eup %2065 }
 0xa94   : > { %v1575_v31 = vmul.f32 %v2064_v21, %v1574_v27  ;;  %v1581_v32 = vmul.f32 %v2066_v28, %v1569_v22  ;;  %vm1587_vm13 = vweird.f32 %v2066_v28 }
 0xa95   : > { %vm1588_vm15 = vmor %vm1586_vm14, %vm1587_vm13 }
 0xa96   : > { %v1579_v50 = vsel %vm1578_vm12, %v2064_v21, %v1575_v31  ;;  %v1582_v35 = vmul.f32 %v2066_v28, %v1581_v32 }
 0xa97   : > { %v1590_v38 = vmul.f32 %v1579_v50, %v1556_v9 }
 0xa98   : > { %v1583_v40 = vmul.f32 0.5, %v1582_v35 }
 0xa99   : > { %v1595_v41 = vmul.f32 %v2019_v33, %v1590_v38 }
 0xa9a   : > { %v1584_v19 = vsub.f32 1.5, %v1583_v40 }
 0xa9b   : > { %v1600_v44 = vadd.f32 %v2020_v37, %v1595_v41 }
 0xa9c   : > { %v1585_v45 = vmul.f32 %v2066_v28, %v1584_v19 }
 0xa9d   : > { %1602 = vst.msk [vmem:[%s2294_s5] sm:$0xff] %vm832_vm8, %v1600_v44 }
 0xa9e   : > { %v1589_v46 = vsel %vm1588_vm15, %v2066_v28, %v1585_v45 }
 0xa9f   : > { %v1591_v39 = vmul.f32 %v1589_v46, %v1557_v13 }
 0xaa1   : > { %v1596_v48 = vmul.f32 %v2019_v33, %v1591_v39 }
 0xaa3   : > { %v1601_v25 = vadd.f32 %v2020_v37, %v1596_v48 }
 0xaa5   : > { %1603 = vst.msk [vmem:[%s2294_s5 + $0x8] sm:$0xff] %vm832_vm8, %v1601_v25 }
 0xaa6 PF: > { %s2564_s25 = sld [smem:[#allocation5_spill]] }
 0xaa7   : > { %s2565_s18 = sld [smem:[#allocation3_spill]] }
 0xaa8   : > { %s2566_s19 = sld [smem:[#allocation4_spill]] }
 0xaa9   : > { %s2567_s20 = sld [smem:[#allocation6_spill]] }
 0xaaa   : > { %s2568_s21 = sld [smem:[#allocation7_spill]] }
 0xaac   : > { %s25_s22 = sadd.s32 1, %s2564_s25  }
 0xaad   : > { %p22_p8 = scmp.ge.s32.totalorder %s25_s22, 6  }
 0xaaf   :  { %24 = sbr.rel (!%p22_p8) target bundleno = 8 (0x8), region = 150 }

// kernel: forward.3
= control target key start
LH: loop header
LB: loop body
LE: loop exit
PB: predicated region body
PF: predicated region fallthrough
CT: control target
= control target key end

     0   :  { %s3905_s0 = inlined_call_operand.vmem [shape: f32[2,8,64], index: 0, kind: input, shape index: {}]   ;;  %s3906_s1 = inlined_call_operand.vmem [shape: f32[2,16,64], index: 1, kind: input, shape index: {}]   ;;  %s3907_s2 = inlined_call_operand.vmem [shape: f32[2,8,1], index: 2, kind: input, shape index: {}]   ;;  %s3908_s3 = inlined_call_operand.vmem [shape: f32[2,1,8], index: 3, kind: input, shape index: {}]   ;;  %s3909_s4 = inlined_call_operand.vmem [shape: f32[2,1,16], index: 4, kind: input, shape index: {}]   ;;  %s3910_s5 = inlined_call_operand.vmem [shape: bf16[64,128], index: 5, kind: input, shape index: {}]   ;;  %s3911_s6 = inlined_call_operand.vmem [shape: bf16[2,64,192], index: 6, kind: input, shape index: {}]   ;;  %s3912_s7 = inlined_call_operand.vmem [shape: f32[2,1,192], index: 7, kind: input, shape index: {}]   ;;  %s3913_s8 = inlined_call_operand.vmem [shape: bf16[2,64,64], index: 8, kind: input, shape index: {}]   ;;  %s3914_s9 = inlined_call_operand.vmem [shape: f32[2,1,64], index: 9, kind: input, shape index: {}]   ;;  %s3915_s10 = inlined_call_operand.vmem [shape: f32[2,1,64], index: 10, kind: input, shape index: {}]   ;;  %s3916_s11 = inlined_call_operand.vmem [shape: f32[2,1,64], index: 11, kind: input, shape index: {}]   ;;  %s3917_s12 = inlined_call_operand.vmem [shape: bf16[2,64,64], index: 12, kind: input, shape index: {}]   ;;  %s3918_s13 = inlined_call_operand.vmem [shape: f32[2,1,64], index: 13, kind: input, shape index: {}]   ;;  %s3919_s14 = inlined_call_operand.vmem [shape: bf16[2,64,128], index: 14, kind: input, shape index: {}]   ;;  %s3920_s15 = inlined_call_operand.vmem [shape: f32[2,1,128], index: 15, kind: input, shape index: {}]   ;;  %s3921_s16 = inlined_call_operand.vmem [shape: bf16[2,64,64], index: 16, kind: input, shape index: {}]   ;;  %s3922_s17 = inlined_call_operand.vmem [shape: f32[2,1,64], index: 17, kind: input, shape index: {}]   ;;  %s3923_s18 = inlined_call_operand.vmem [shape: f32[2,1,64], index: 18, kind: input, shape index: {}]   ;;  %s3924_s19 = inlined_call_operand.vmem [shape: f32[2,1,64], index: 19, kind: input, shape index: {}]   ;;  %s3925_s20 = inlined_call_operand.vmem [shape: bf16[2,64,128], index: 20, kind: input, shape index: {}]   ;;  %s3926_s21 = inlined_call_operand.vmem [shape: f32[2,1,128], index: 21, kind: input, shape index: {}]   ;;  %s3927_s22 = inlined_call_operand.vmem [shape: bf16[2,128,64], index: 22, kind: input, shape index: {}]   ;;  %s3928_s23 = inlined_call_operand.vmem [shape: f32[2,1,64], index: 23, kind: input, shape index: {}]   ;;  %s3929_s24 = inlined_call_operand.vmem [shape: f32[2,1,64], index: 24, kind: input, shape index: {}]   ;;  %s3930_s25 = inlined_call_operand.vmem [shape: f32[2,1,64], index: 25, kind: input, shape index: {}]   ;;  %s3931_s26 = inlined_call_operand.hbm [shape: f32[2,8,128], index: 26, kind: output, shape index: {}]  }
   0x1   :  { %3953 = sst [smem:[#allocation25_spill]] %s3905_s0 }
   0x2   :  { %3954 = sst [smem:[#allocation26_spill]] %s3906_s1 }
   0x3   :  { %3955 = sst [smem:[#allocation27_spill]] %s3907_s2 }
   0x4   :  { %3956 = sst [smem:[#allocation28_spill]] %s3908_s3 }
   0x5   :  { %3957 = sst [smem:[#allocation29_spill]] %s3909_s4 }
   0x6   :  { %3958 = sst [smem:[#allocation30_spill]] %s3910_s5 }
   0x7   :  { %3959 = sst [smem:[#allocation31_spill]] %s3911_s6 }
   0x8   :  { %3960 = sst [smem:[#allocation32_spill]] %s3912_s7 }
   0x9   :  { %3961 = sst [smem:[#allocation33_spill]] %s3913_s8 }
   0xa   :  { %3962 = sst [smem:[#allocation34_spill]] %s3914_s9 }
   0xb   :  { %3963 = sst [smem:[#allocation35_spill]] %s3915_s10 }
   0xc   :  { %3964 = sst [smem:[#allocation36_spill]] %s3917_s12 }
   0xd   :  { %3965 = sst [smem:[#allocation37_spill]] %s3918_s13 }
   0xe   :  { %3966 = sst [smem:[#allocation38_spill]] %s3919_s14 }
   0xf   :  { %3967 = sst [smem:[#allocation39_spill]] %s3921_s16 }
  0x10   :  { %3968 = sst [smem:[#allocation40_spill]] %s3922_s17 }
  0x11   :  { %3969 = sst [smem:[#allocation41_spill]] %s3923_s18 }
  0x12   :  { %3970 = sst [smem:[#allocation42_spill]] %s3924_s19 }
  0x13   :  { %3971 = sst [smem:[#allocation43_spill]] %s3925_s20 }
  0x14   :  { %3972 = sst [smem:[#allocation44_spill]] %s3926_s21 }
  0x15   :  { %3973 = sst [smem:[#allocation45_spill]] %s3927_s22 }
  0x16   :  { %3974 = sst [smem:[#allocation46_spill]] %s3928_s23 }
  0x17   :  { %3975 = sst [smem:[#allocation47_spill]] %s3929_s24 }
  0x18   :  { %3976 = sst [smem:[#allocation48_spill]] %s3930_s25 }
  0x19   :  { %3977 = sst [smem:[#allocation49_spill]] %s3931_s26 }
  0x1a   :  { %31 = vsyncpa [#allocation4], 0 }
  0x1b   :  { %33 = vsyncpa [#allocation4 + $0x1], 0  ;;  %s3369_s27 = smov 0   ;;  %s3371_s3 = smov 0  }
  0x1c   :  { %s3373_s7 = smov 0   ;;  %s3375_s28 = smov 0  }
  0x1d   :  { %s3377_s8 = smov 0   ;;  %s3379_s4 = smov 0  }
  0x1e   :  { %s3381_s29 = smov 0   ;;  %s3383_s0 = smov 0  }
  0x1f LB: > { %3978 = sst [smem:[#allocation6_spill]] %s3194_s27  ;;  %s2721_s9 = sadd.s32 4294967295, %s3222_s0   ;;  %s3222_s0 = sphi %s3383_s0, %s39_s0   ;;  %s3218_s29 = sphi %s3381_s29, %s4067_s29   ;;  %s3214_s4 = sphi %s3379_s4, %s4066_s4   ;;  %s3210_s8 = sphi %s3377_s8, %s4065_s8   ;;  %s3206_s28 = sphi %s3375_s28, %s4064_s28   ;;  %s3202_s7 = sphi %s3373_s7, %s4063_s7   ;;  %s3198_s3 = sphi %s3371_s3, %s4062_s3   ;;  %s3194_s27 = sphi %s3369_s27, %s4061_s27  }
  0x20   : > { %3979 = sst [smem:[#allocation7_spill]] %s3198_s3  ;;  %s2722_s30 = sadd.s32 4294967294, %s3222_s0  }
  0x21   : > { %3980 = sst [smem:[#allocation8_spill]] %s3202_s7  ;;  %s48_s2 = sadd.s32 1, %s3214_s4 }
  0x22   : > { %3981 = sst [smem:[#allocation9_spill]] %s3206_s28  ;;  %p49_p0 = scmp.ge.s32.totalorder %s48_s2, 2 }
  0x23   : > { %3982 = sst [smem:[#allocation10_spill]] %s3210_s8  ;;  %s51_s5 = sadd.s32 1, %s3218_s29 }
  0x24   : > { %3983 = sst [smem:[#allocation11_spill]] %s3214_s4  ;;  %p739_p1 = scmp.ne.s32.totalorder %s3202_s7, %s3198_s3 }
  0x25   : > { %3984 = sst [smem:[#allocation12_spill]] %s3218_s29  ;;  %p740_p2 = scmp.eq.s32.totalorder %s2721_s9, 3 }
  0x26   : > { %3985 = sst [smem:[#allocation13_spill]] %s3222_s0  ;;  %s4069_s2 = smov (%p49_p0, %s48_s2), 0 }
  0x27   : > { %3986 = sst [smem:[#allocation14_spill]] %s4069_s2  ;;  %s4071_s5 = smov (!%p49_p0, %s51_s5), %s3218_s29 }
  0x28   : > { %p3418_p3 = por %p740_p2, %p739_p1  ;;  %p745_p4 = scmp.ne.s32.totalorder %s3198_s3, %s3194_s27 }
  0x29   : > { %p53_p5 = scmp.ge.s32.totalorder %s4071_s5, 2  ;;  %p746_p6 = scmp.eq.s32.totalorder %s2722_s30, 3 }
  0x2a   : > { %s3987_s10 = scalar_select %p3418_p3, 1, 0 }
  0x2b   : > { %p2725_p7 = scmp.ge.s32.totalorder %s3222_s0, 1  ;;  %p936_p8 = scmp.lt.s32.totalorder %s3222_s0, 5 }
  0x2c   : > { %3988 = sst [smem:[#allocation15_spill]] %s3987_s10  ;;  %s4073_s5 = smov (%p53_p5, %s4071_s5), 0 }
  0x2d   : > { %3989 = sst [smem:[#allocation16_spill]] %s4073_s5  ;;  %p3428_p9 = por %p746_p6, %p745_p4 }
  0x2e   : > { %p937_p10 = pnand %p2725_p7, %p936_p8  ;;  %s726_s1 = ssub.s32 %s3218_s29, %s4073_s5 }
  0x2f   : > { %s3990_s6 = scalar_select %p3428_p9, 1, 0 }
  0x30   : > { %s729_s9 = sadd.s32 1, %s3202_s7  ;;  %p727_p11 = scmp.eq.s32.totalorder %s726_s1, 0 }
  0x31   : > { %3991 = sst [smem:[#allocation17_spill]] %s3990_s6  ;;  %940 = sbr.rel (%p937_p10) target bundleno = 4173 (0x104d), region = 124 }
  0x32   : > { %s3436_s2 = scalar_select %p727_p11, %s3202_s7, %s729_s9  }
  0x34   : > { %3992 = sst [smem:[#allocation18_spill]] %s3436_s2 }
  0x36   : > { %s3937_s30 = sand.u32 1, %s3198_s3   ;;  %p1095_p12 = scmp.lt.s32.totalorder %s3210_s8, 1 }
  0x37   : > { %s3442_s4 = sshll.u32 %s3937_s30, 3  ;;  %p1114_p13 = scmp.lt.s32.totalorder %s3206_s28, 1 }
  0x38   : > { %s3446_s6 = scalar_select %p1095_p12, %s3210_s8, 1 }
  0x39   : > { %s3449_s1 = scalar_select %p1114_p13, %s3206_s28, 1 }
  0x3a   : > { %3993 = sst [smem:[#allocation19_spill]] %s3446_s6  ;;  %s2727_s9 = sshll.u32 %s3446_s6, 3 }
  0x3b   : > { %s2943_s5 = sshll.u32 %s3446_s6, 4  ;;  %s3994_s2 = sld [smem:[#allocation25_spill]] }
  0x3c   : > { %s3996_s26 = sld [smem:[#allocation26_spill]]  ;;  %s2733_s3 = sshll.u32 %s3449_s1, 1 }
  0x3d   : > { %s3998_s28 = sld [smem:[#allocation27_spill]]  ;;  %s2945_s22 = sshll.u32 %s3449_s1, 5 }
  0x3e   : > { %s4002_s0 = sld [smem:[#allocation31_spill]]  ;;  %s1094_s17 = scalar_lea.vmem [#allocation3], %s3442_s4 }
  0x3f   : > { %s4004_s29 = sld [smem:[#allocation33_spill]] }
  0x40   : > { %s4008_s12 = sld [smem:[#allocation36_spill]] }
  0x41   : > { %s3456_s7 = scalar_lea.vmem %s3994_s2, %s2727_s9  ;;  %s4010_s14 = sld [smem:[#allocation38_spill]] }
  0x42   : > { %3995 = sst [smem:[#allocation20_spill]] %s3456_s7  ;;  %s3461_s10 = scalar_lea.vmem %s3996_s26, %s2943_s5 }
  0x43   : > { %3997 = sst [smem:[#allocation21_spill]] %s3461_s10  ;;  %s3466_s25 = scalar_lea.vmem %s3998_s28, %s2727_s9 }
  0x44   : > { %3999 = sst [smem:[#allocation22_spill]] %s3466_s25  ;;  %s2944_s7 = sshll.u32 %s3449_s1, 6 }
  0x45   : > { %s3480_s5 = scalar_lea.vmem %s4002_s0, %s2944_s7  ;;  %s4003_s9 = sld [smem:[#allocation32_spill]] }
  0x46   : > { %s3492_s30 = scalar_lea.vmem %s4004_s29, %s2945_s22  ;;  %s3509_s20 = scalar_lea.vmem %s4008_s12, %s2945_s22 }
  0x47   : > { %4005 = sst [smem:[#allocation23_spill]] %s3492_s30  ;;  %s3518_s10 = scalar_lea.vmem %s4010_s14, %s2945_s22 }
  0x48   : > { %s4011_s16 = sld [smem:[#allocation39_spill]] }
  0x49   : > { %s4016_s0 = sld [smem:[#allocation43_spill]] }
  0x4a   : > { %s4018_s24 = sld [smem:[#allocation45_spill]] }
  0x4b   : > { %s3486_s23 = scalar_lea.vmem %s4003_s9, %s2733_s3  ;;  %s4019_s21 = sld [smem:[#allocation46_spill]] }
  0x4c   : > { %s4020_s12 = sld [smem:[#allocation47_spill]] }
  0x4d   : > { %s4021_s25 = sld [smem:[#allocation48_spill]] }
  0x4e   : > { %s3527_s28 = scalar_lea.vmem %s4011_s16, %s2945_s22  ;;  %s4017_s16 = sld [smem:[#allocation44_spill]] }
  0x4f   : > { %4012 = sst [smem:[#allocation24_spill]] %s3527_s28  ;;  %s3544_s8 = scalar_lea.vmem %s4016_s0, %s2945_s22 }
  0x50   : > { %s3553_s26 = scalar_lea.vmem %s4018_s24, %s2944_s7  ;;  %s4022_s9 = sld [smem:[#allocation9_spill]] }
  0x51   : > { %s1182_s18 = scalar_lea.vmem %s4019_s21, %s3449_s1 }
  0x52   : > { %s1185_s19 = scalar_lea.vmem %s4020_s12, %s3449_s1 }
  0x53   : > { %s1188_s0 = scalar_lea.vmem %s4021_s25, %s3449_s1 }
  0x54   : > { %s1174_s28 = scalar_lea.vmem %s4017_s16, %s3449_s1 }
  0x56   : > { %p2746_p0 = scmp.ne.s32.totalorder %s4022_s9, 0 }
  0x57   : > { %s4023_s16 = sld [smem:[#allocation20_spill]] (!%p2746_p0) }
  0x58   : > { %1193 = sbr.rel (%p2746_p0) target bundleno = 95 (0x5f), region = 128 }
  0x5d   : > { %v1194_v0 = vld [vmem:[%s4023_s16] sm:$0xff]  ;;  %vm1195_vm0 = vcmask 523264  }
  0x5e   : > { %1196 = vst.msk [vmem:[#allocation2] sm:$0xff] %vm1195_vm0, %v1194_v0 }
  0x5f PF: > { %v2774_v1 = vld [vmem:[%s3480_s5 + $0x30] sm:$0xf]  ;;  %v2958_v2 = vld [vmem:[%s3480_s5 + $0x34] sm:$0xf0]  ;;  %v2766_v3 = vld [vmem:[%s3480_s5 + $0x20] sm:$0xf]  ;;  %v1199_v40 = vlaneseq }
  0x60   : > { %v2775_v4 = vor.u32 %v2958_v2, %v2774_v1  ;;  %v2956_v5 = vld [vmem:[%s3480_s5 + $0x24] sm:$0xf0]  ;;  %v2758_v7 = vld [vmem:[%s3480_s5 + $0x10] sm:$0xf]  ;;  %v2954_v8 = vld [vmem:[%s3480_s5 + $0x14] sm:$0xf0] }
  0x61   : > { %v2767_v6 = vor.u32 %v2956_v5, %v2766_v3  ;;  %v2759_v9 = vor.u32 %v2954_v8, %v2758_v7  ;;  %v2750_v10 = vld [vmem:[%s3480_s5] sm:$0xf]  ;;  %v2952_v11 = vld [vmem:[%s3480_s5 + $0x4] sm:$0xf0]  ;;  %vm1268_vm1 = vcmask 523264   ;;  %s3224_s12 = smov 112  }
  0x62   : > { %1276 = vmatpush.bf16.msra.mxu0 %v2775_v4  ;;  %v2751_v12 = vor.u32 %v2952_v11, %v2750_v10  ;;  %v3584_v15 = vld [vmem:[%s3486_s23] sm:$0x3]  ;;  %s3225_s13 = smov 64   ;;  %s3226_s7 = smov 32   ;;  %v2957_v21 = vld [vmem:[%s3480_s5 + $0x34] sm:$0xf] }
  0x63   : > { %v1224_v16 = vperm.slane %v3584_v15, 0  ;;  %s3227_s23 = smov 16   ;;  %s3228_s21 = smov 96   ;;  %v2776_v22 = vld [vmem:[%s3480_s5 + $0x38] sm:$0xf0]  ;;  %vm1311_vm2 = vcmask 130048  }
  0x64   : > { %s3229_s3 = smov 80   ;;  %s4024_s6 = sld [smem:[#allocation23_spill]]  ;;  %v2779_v23 = vor.u32 %v2957_v21, %v2776_v22  ;;  %v2955_v24 = vld [vmem:[%s3480_s5 + $0x24] sm:$0xf]  ;;  %v2768_v25 = vld [vmem:[%s3480_s5 + $0x28] sm:$0xf0] }
  0x65   : > { %v3578_v13 = vld [vmem:[#allocation2] sm:$0xff]  ;;  %v2771_v26 = vor.u32 %v2955_v24, %v2768_v25  ;;  %v2953_v27 = vld [vmem:[%s3480_s5 + $0x14] sm:$0xf]  ;;  %v2760_v28 = vld [vmem:[%s3480_s5 + $0x18] sm:$0xf0]  ;;  %s4025_s24 = sld [smem:[#allocation19_spill]] }
  0x66   : > { %1277 = vmatpush.bf16.msra.mxu0 %v2767_v6  ;;  %v1213_v14 = vpack.c.bf16 %v3578_v13, %v3578_v13  ;;  %1289 = vmatpush.bf16.msra.mxu1 %v2779_v23  ;;  %v2763_v29 = vor.u32 %v2953_v27, %v2760_v28  ;;  %v2951_v30 = vld [vmem:[%s3480_s5 + $0x4] sm:$0xf]  ;;  %v2752_v31 = vld [vmem:[%s3480_s5 + $0x8] sm:$0xf0]  ;;  %v1200_v41 = vshrl.u32 %v1199_v40, 7  ;;  %v1202_v42 = vand.u32 127, %v1199_v40 }
  0x67   : > { %v2755_v32 = vor.u32 %v2951_v30, %v2752_v31  ;;  %v3230_v43 = vmov 0.0   ;;  %s4026_s29 = sld [smem:[#allocation28_spill]]  ;;  %vm1333_vm4 = vcmask 64512   ;;  %s3231_s27 = smov 48   ;;  %v1225_v60 = vperm.slane %v3584_v15, 1 }
  0x68   : > { %vm1203_vm3 = vcmp.gt.s32.totalorder %v1202_v42, %v1200_v41  ;;  %vm1349_vm5 = vcmask 1043456   ;;  %s4028_s14 = sld [smem:[#allocation22_spill]] }
  0x69   : > { %v2747_v44 = vsel %vm1203_vm3, 1.0, %v3230_v43  ;;  %s4029_s9 = sld [smem:[#allocation34_spill]] }
  0x6a   : > { %1278 = vmatpush.bf16.msra.mxu0 %v2759_v9  ;;  %1290 = vmatpush.bf16.msra.mxu1 %v2771_v26  ;;  %v2959_v33 = vld [vmem:[%s4024_s6] sm:$0xff]  ;;  %v1206_v45 = vmul.f32 -1e+30, %v2747_v44  ;;  %s4045_s25 = sld [smem:[#allocation42_spill]] }
  0x6d   : > { %s4027_s2 = scalar_lea.vmem %s4026_s29, %s4025_s24 }
  0x6e   : > { %1279 = vmatpush.bf16.msra.mxu0 %v2751_v12  ;;  %1291 = vmatpush.bf16.msra.mxu1 %v2763_v29  ;;  %v3074_v46 = vld [vmem:[%s4027_s2] ss:$0 sm:$0xff]  ;;  %s4040_s2 = sld [smem:[#allocation24_spill]] }
  0x6f   : > { %v3620_v47 = vadd.f32 %v3074_v46, %v1206_v45  ;;  %s4030_s16 = scalar_lea.vmem %s4029_s9, %s3449_s1  ;;  %s4035_s9 = scalar_lea.vmem %s3920_s15, %s3449_s1 }
  0x71   : > { %2780 = vmatmul.msk.bf16.vlgmr.msra.gmra.mxu0 %vm1268_vm1, %v1213_v14 }
  0x72   : > { %1292 = vmatpush.bf16.msra.mxu1 %v2755_v32 }
  0x75   : > { %2781 = vmatmul.msk.bf16.vlgmr.msra.gmra.mxu1 %vm1268_vm1, %v1213_v14 }
  0x76   : > { %1465 = vmatpush.bf16.msrb.mxu1 %v2959_v33 }
  0xee   : > { %v1281_v17 = vpop.f32.mrf.mxu0 }
  0xef   : > { %v1282_v18 = vadd.f32 %v1281_v17, %v1224_v16 }
  0xf1   : > { %v3587_v19 = vpack.c.bf16 %v1282_v18, %v1282_v18 }
  0xf2   : > { %v1294_v56 = vpop.f32.mrf.mxu1 }
  0xf3   : > { %1367 = vrot.lane.b32.xlu2 %v3587_v19, %s3224_s12  ;;  %1309 = vrot.lane.b32.xlu0 %v3587_v19, %s3225_s13  ;;  %v1295_v61 = vadd.f32 %v1294_v56, %v1225_v60 }
  0xf5   : > { %v3628_v62 = vpack.c.bf16 %v1295_v61, %v1295_v61 }
  0xf6   : > { %v1283_v20 = vpop.f32.mrf.mxu0 }
  0xf7   : > { %v1351_v63 = vsel %vm1349_vm5, %v3628_v62, 0 }
  0xf8   : > { %1360 = vmatpush.bf16.msra.mxu3 %v1351_v63 }
  0xfa   : > { %v1296_v59 = vpop.f32.mrf.mxu1 }
  0xfb   : > { %1473 = vrot.lane.b32.xlu2 %v3587_v19, %s3226_s7 }
 0x103   : > { %1555 = vrot.lane.b32.xlu2 %v3587_v19, %s3227_s23 }
 0x10b   : > { %1471 = vrot.lane.b32.xlu2 %v3587_v19, %s3228_s21 }
 0x113   : > { %1553 = vrot.lane.b32.xlu2 %v3587_v19, %s3229_s3 }
 0x14d   : > { %v1368_v34 = vpop.permute.xlu2 %1367 }
 0x155   : > { %v1474_v35 = vpop.permute.xlu2 %1473 }
 0x156   : > { %v1479_v6 = vsel %vm1311_vm2, %v1474_v35, 0 }
 0x15d   : > { %v1556_v36 = vpop.permute.xlu2 %1555 }
 0x15e   : > { %v1561_v37 = vsel %vm1311_vm2, %v1556_v36, 0 }
 0x15f   : > { %1570 = vmatpush.bf16.xpose.msra.mxu1 %v1561_v37 }
 0x165   : > { %v1310_v38 = vpop.permute.xlu0 %1309  ;;  %v1472_v7 = vpop.permute.xlu2 %1471 }
 0x166   : > { %v1316_v39 = vsel %vm1311_vm2, %v1310_v38, 0 }
 0x167   : > { %1325 = vmatpush.bf16.xpose.msrb.mxu0 %v1316_v39 }
 0x16d   : > { %v1554_v11 = vpop.permute.xlu2 %1553 }
 0x16e   : > { %2782 = vmatmul.msk.bf16.vlgmr.msrb.gmra.mxu0 %vm1311_vm2, %v3587_v19 }
 0x1eb   : > { %v1327_v48 = vpop.f32.mrf.mxu0 }
 0x1ec   : > { %v1331_v49 = vmul.f32 0.25, %v1327_v48 }
 0x1ee   : > { %v1332_v50 = vadd.f32 %v1331_v49, %v3620_v47 }
 0x1f0   : > { %v1334_v51 = vsel %vm1333_vm4, %v1332_v50, -inf }
 0x1f1   : > { %1335 = vmax.xlane.f32.xlu0 %v1334_v51 }
 0x1f3   : > { %v1329_v52 = vpop.f32.mrf.mxu0 }
 0x264   : > { %v1336_v53 = vpop.xlane.xlu0 %1335 }
 0x265   : > { %v1337_v54 = vsub.f32 %v1332_v50, %v1336_v53 }
 0x267   : > { %v1338_v55 = vmul.f32 1.442695, %v1337_v54 }
 0x269   : > { %3088 = vpow2.f32 %v1338_v55 }
 0x26f   : > { %v3089_v57 = vpop.eup %3088 }
 0x270   : > { %v1340_v58 = vsel %vm1333_vm4, %v3089_v57, 0.0 }
 0x271   : > { %1341 = vadd.xlane.f32.xlu1 %v1340_v58  ;;  %v2961_v58 = vld [vmem:[%s4024_s6 + $0x10] sm:$0xff] }
 0x28a   : > { %1369 = vrot.lane.b32.xlu1 %v3587_v19, %s3231_s27 }
 0x2e4   : > { %v1342_v0 = vpop.xlane.xlu1 %1341 }
 0x2e5   : > { %3090 = vrcp.f32 %v1342_v0 }
 0x2eb   : > { %v3091_v1 = vpop.eup %3090 }
 0x2ec   : > { %v1344_v2 = vmul.f32 %v3091_v1, %v3089_v57  ;;  %v2960_v57 = vld [vmem:[%s4024_s6 + $0x8] sm:$0xff] }
 0x2ed   : > { %1443 = vmatpush.bf16.msra.mxu0 %v2960_v57 }
 0x2ee   : > { %v1345_v3 = vpack.c.bf16 %v1344_v2, %v1344_v2 }
 0x2f0   : > { %2783 = vmatmul.msk.bf16.vlgmr.msra.gmra.mxu3 %vm1333_vm4, %v1345_v3 }
 0x2f1   : > { %1546 = vmatpush.bf16.msrb.mxu0 %v2961_v58 }
 0x2fc   : > { %v1370_v4 = vpop.permute.xlu1 %1369 }
 0x2fd   : > { %v1375_v5 = vsel %vm1311_vm2, %v1370_v4, 0 }
 0x2fe   : > { %1384 = vmatpush.bf16.xpose.msrb.mxu3 %v1375_v5 }
 0x305   : > { %2784 = vmatmul.msk.bf16.vlgmr.msrb.gmra.mxu3 %vm1311_vm2, %v1368_v34 }
 0x306   : > { %1488 = vmatpush.bf16.xpose.msra.mxu3 %v1479_v6 }
 0x315   : > { %2796 = vmatmul.msk.bf16.vlgmr.msra.gmra.mxu3 %vm1311_vm2, %v1472_v7  ;;  %v2962_v7 = vld [vmem:[%s4024_s6 + $0x18] sm:$0xff]  ;;  %s4031_s6 = sld [smem:[#allocation21_spill]] }
 0x373   : > { %v1362_v8 = vpop.f32.mrf.mxu3 }
 0x374   : > { %v1366_v9 = vpack.c.bf16 %v1362_v8, %v1362_v8 }
 0x376   : > { %2795 = vmatmul.msk.bf16.vlgmr.msrb.gmra.mxu1 %vm1311_vm2, %v1366_v9 }
 0x37b   : > { %v1364_v10 = vpop.f32.mrf.mxu3 }
 0x386   : > { %2803 = vmatmul.msk.bf16.vlgmr.msra.gmra.mxu1 %vm1311_vm2, %v1554_v11 }
 0x388   : > { %v1386_v12 = vpop.f32.mrf.mxu3 }
 0x389   : > { %v1390_v14 = vmul.f32 0.25, %v1386_v12 }
 0x38b   : > { %v1391_v15 = vadd.f32 %v1390_v14, %v3620_v47 }
 0x38d   : > { %v1392_v16 = vsel %vm1333_vm4, %v1391_v15, -inf }
 0x38e   : > { %1393 = vmax.xlane.f32.xlu1 %v1392_v16 }
 0x390   : > { %v1388_v17 = vpop.f32.mrf.mxu3 }
 0x398   : > { %v1490_v18 = vpop.f32.mrf.mxu3 }
 0x399   : > { %v1494_v19 = vmul.f32 0.25, %v1490_v18  ;;  %v3075_v18 = vld [vmem:[%s4030_s16] ss:$0 sm:$0xff] }
 0x39b   : > { %v1495_v20 = vadd.f32 %v1494_v19, %v3620_v47 }
 0x39d   : > { %v1496_v21 = vsel %vm1333_vm4, %v1495_v20, -inf }
 0x39e   : > { %1497 = vmax.xlane.f32.xlu0 %v1496_v21 }
 0x3a0   : > { %v1492_v22 = vpop.f32.mrf.mxu3 }
 0x3b2   : > { %1405 = vrot.lane.b32.xlu0 %v3628_v62, %s3224_s12 }
 0x3f3   : > { %v3645_v23 = vpop.f32.mrf.mxu1 }
 0x3fb   : > { %v1469_v24 = vpop.f32.mrf.mxu1 }
 0x401   : > { %v1394_v25 = vpop.xlane.xlu1 %1393 }
 0x402   : > { %v1395_v26 = vsub.f32 %v1391_v15, %v1394_v25  ;;  %v3232_v25 = vmov 64.0  }
 0x403   : > { %v1572_v27 = vpop.f32.mrf.mxu1 }
 0x404   : > { %v1396_v28 = vmul.f32 1.442695, %v1395_v26  ;;  %v1576_v29 = vmul.f32 0.25, %v1572_v27  ;;  %v1198_v26 = vld [vmem:[%s4028_s14] sm:$0xff]  ;;  %v2970_v27 = vld [vmem:[%s3518_s10 + $0x18] sm:$0xff]  ;;  %s4034_s14 = scalar_lea.vmem %s3916_s11, %s3449_s1 }
 0x405   : > { %1785 = vmatpush.bf16.msrb.mxu1 %v2970_v27 }
 0x406   : > { %3092 = vpow2.f32 %v1396_v28  ;;  %v1577_v30 = vadd.f32 %v1576_v29, %v3620_v47  ;;  %v3233_v28 = vmov 0   ;;  %v2969_v29 = vld [vmem:[%s3518_s10 + $0x10] sm:$0xff] }
 0x407   : > { %3072 = vset.pattern.permute.xlu2 %v3233_v28  ;;  %3073 = vset.pattern.permute.xlu0 %v3233_v28 }
 0x408   : > { %v1578_v31 = vsel %vm1333_vm4, %v1577_v30, -inf }
 0x409   : > { %1579 = vmax.xlane.f32.xlu2 %v1578_v31  ;;  %1786 = vmatpush.bf16.msrb.mxu1 %v2969_v29 }
 0x40b   : > { %v1574_v32 = vpop.f32.mrf.mxu1 }
 0x40c   : > { %v3093_v33 = vpop.eup %3092 }
 0x40d   : > { %v1398_v34 = vsel %vm1333_vm4, %v3093_v33, 0.0 }
 0x40e   : > { %1399 = vadd.xlane.f32.xlu0 %v1398_v34 }
 0x411   : > { %v1498_v35 = vpop.xlane.xlu0 %1497 }
 0x412   : > { %v1499_v36 = vsub.f32 %v1495_v20, %v1498_v35 }
 0x414   : > { %v1500_v37 = vmul.f32 1.442695, %v1499_v36 }
 0x416   : > { %3094 = vpow2.f32 %v1500_v37 }
 0x41c   : > { %v3095_v38 = vpop.eup %3094 }
 0x41d   : > { %v1502_v39 = vsel %vm1333_vm4, %v3095_v38, 0.0 }
 0x41e   : > { %1503 = vadd.xlane.f32.xlu2 %v1502_v39 }
 0x422   : > { %1508 = vrot.lane.b32.xlu0 %v3628_v62, %s3228_s21 }
 0x424   : > { %v1406_v40 = vpop.permute.xlu0 %1405 }
 0x425   : > { %v1411_v41 = vsel %vm1349_vm5, %v1406_v40, 0  ;;  %v2968_v40 = vld [vmem:[%s3518_s10 + $0x8] sm:$0xff] }
 0x426   : > { %1420 = vmatpush.bf16.msra.mxu2 %v1411_v41  ;;  %1787 = vmatpush.bf16.msrb.mxu1 %v2968_v40  ;;  %v2967_v41 = vld [vmem:[%s3518_s10] sm:$0xff]  ;;  %s4036_s10 = sld [smem:[#allocation37_spill]] }
 0x42a   : > { %1788 = vmatpush.bf16.msrb.mxu1 %v2967_v41 }
 0x42c   : > { %s4037_s5 = scalar_lea.vmem %s4036_s10, %s3449_s1 }
 0x47c   : > { %v1580_v42 = vpop.xlane.xlu2 %1579 }
 0x47d   : > { %v1581_v43 = vsub.f32 %v1577_v30, %v1580_v42  ;;  %v1739_v42 = vld [vmem:[%s4031_s6] sm:$0xff] }
 0x47f   : > { %v1582_v44 = vmul.f32 1.442695, %v1581_v43  ;;  %v1740_v43 = vld [vmem:[%s4031_s6 + $0x8] sm:$0xff] }
 0x481   : > { %3096 = vpow2.f32 %v1582_v44  ;;  %v1400_v45 = vpop.xlane.xlu0 %1399  ;;  %v1741_v44 = vpack.c.bf16 %v1740_v43, %v1739_v42 }
 0x482   : > { %3098 = vrcp.f32 %v1400_v45  ;;  %v2966_v45 = vld [vmem:[%s3509_s20 + $0x18] sm:$0xff] }
 0x483   : > { %2843 = vmatmul.msk.bf16.vlgmr.msrb.gmra.mxu1 %vm1268_vm1, %v1741_v44 }
 0x487   : > { %v3097_v46 = vpop.eup %3096 }
 0x488   : > { %v3099_v47 = vpop.eup %3098  ;;  %v1584_v48 = vsel %vm1333_vm4, %v3097_v46, 0.0 }
 0x489   : > { %1585 = vadd.xlane.f32.xlu1 %v1584_v48  ;;  %v1402_v49 = vmul.f32 %v3099_v47, %v3093_v33  ;;  %v2964_v47 = vld [vmem:[%s3509_s20 + $0x8] sm:$0xff]  ;;  %v2963_v48 = vld [vmem:[%s3509_s20] sm:$0xff] }
 0x48b   : > { %v1403_v50 = vpack.c.bf16 %v1402_v49, %v1402_v49 }
 0x48d   : > { %2785 = vmatmul.msk.bf16.vlgmr.msra.gmra.mxu2 %vm1333_vm4, %v1403_v50 }
 0x491   : > { %v1504_v51 = vpop.xlane.xlu2 %1503 }
 0x492   : > { %3100 = vrcp.f32 %v1504_v51 }
 0x494   : > { %v1509_v52 = vpop.permute.xlu0 %1508 }
 0x495   : > { %v1514_v53 = vsel %vm1349_vm5, %v1509_v52, 0 }
 0x496   : > { %1523 = vmatpush.bf16.msrb.mxu2 %v1514_v53 }
 0x498   : > { %v3101_v54 = vpop.eup %3100 }
 0x499   : > { %v1506_v55 = vmul.f32 %v3101_v54, %v3095_v38 }
 0x49a   : > { %1628 = vmatpush.bf16.msra.mxu2 %v2962_v7 }
 0x49b   : > { %v1507_v56 = vpack.c.bf16 %v1506_v55, %v1506_v55 }
 0x49d   : > { %2797 = vmatmul.msk.bf16.vlgmr.msrb.gmra.mxu2 %vm1333_vm4, %v1507_v56 }
 0x4a2   : > { %1590 = vrot.lane.b32.xlu1 %v3628_v62, %s3229_s3 }
 0x4fc   : > { %v1586_v59 = vpop.xlane.xlu1 %1585 }
 0x4fd   : > { %3102 = vrcp.f32 %v1586_v59 }
 0x4fe   : > { %3104 = vrcp.f32 %v3232_v25 }
 0x503   : > { %v3103_v60 = vpop.eup %3102 }
 0x504   : > { %v1588_v0 = vmul.f32 %v3103_v60, %v3097_v46  ;;  %v3105_v30 = vpop.eup %3104  ;;  %v2965_v46 = vld [vmem:[%s3509_s20 + $0x10] sm:$0xff]  ;;  %s4032_s20 = sld [smem:[#allocation35_spill]] }
 0x505   : > { %v1647_v31 = vmul.f32 64.0, %v3105_v30  ;;  %vm1651_vm6 = vweird.f32 %v3105_v30 }
 0x506   : > { %v1589_v3 = vpack.c.bf16 %v1588_v0, %v1588_v0 }
 0x50a   : > { %s4033_s30 = scalar_lea.vmem %s4032_s20, %s3449_s1 }
 0x50b   : > { %v3076_v58 = vld [vmem:[%s4033_s30] ss:$0 sm:$0xff]  ;;  %s4038_s30 = sld [smem:[#allocation29_spill]] }
 0x510   : > { %v1422_v61 = vpop.f32.mrf.mxu2 }
 0x511   : > { %v1426_v63 = vpack.c.bf16 %v1422_v61, %v1422_v61  ;;  %v3077_v61 = vld [vmem:[%s4034_s14] ss:$0 sm:$0xff]  ;;  %s4039_s29 = scalar_lea.vmem %s4038_s30, %s4025_s24  ;;  %s4043_s24 = sld [smem:[#allocation41_spill]] }
 0x513   : > { %2790 = vmatmul.msk.bf16.vlgmr.msra.gmra.mxu0 %vm1311_vm2, %v1426_v63 }
 0x514   : > { %v1591_v1 = vpop.permute.xlu1 %1590  ;;  %1730 = vmatpush.bf16.msra.mxu0 %v2966_v45 }
 0x515   : > { %v1596_v2 = vsel %vm1349_vm5, %v1591_v1, 0 }
 0x516   : > { %1605 = vmatpush.bf16.msrb.mxu3 %v1596_v2 }
 0x518   : > { %v1424_v4 = vpop.f32.mrf.mxu2  ;;  %1731 = vmatpush.bf16.msra.mxu0 %v2965_v46 }
 0x519   : > { %2804 = vmatmul.msk.bf16.vlgmr.msrb.gmra.mxu3 %vm1333_vm4, %v1589_v3  ;;  %v1790_v4 = vpop.f32.mrf.mxu1 }
 0x51c   : > { %1732 = vmatpush.bf16.msra.mxu0 %v2964_v47 }
 0x520   : > { %v1525_v62 = vpop.f32.mrf.mxu2  ;;  %1733 = vmatpush.bf16.msra.mxu0 %v2963_v48 }
 0x521   : > { %v1529_v5 = vpack.c.bf16 %v1525_v62, %v1525_v62  ;;  %v3078_v62 = vld [vmem:[%s4035_s9] ss:$0 sm:$0xff]  ;;  %s4046_s9 = scalar_lea.vmem %s4045_s25, %s3449_s1 }
 0x523   : > { %2802 = vmatmul.msk.bf16.vlgmr.msrb.gmra.mxu0 %vm1311_vm2, %v1529_v5  ;;  %v1791_v5 = vadd.f32 %v3078_v62, %v1790_v4 }
 0x528   : > { %v1527_v6 = vpop.f32.mrf.mxu2 }
 0x529   : > { %v1792_v6 = vpop.f32.mrf.mxu1 }
 0x52a   : > { %v1793_v7 = vadd.f32 %v3078_v62, %v1792_v6 }
 0x590   : > { %v1445_v8 = vpop.f32.mrf.mxu0 }
 0x591   : > { %v1468_v12 = vadd.f32 %v3645_v23, %v1445_v8  ;;  %v3716_v8 = vpack.c.bf16 %v1793_v7, %v1791_v5 }
 0x598   : > { %v1447_v9 = vpop.f32.mrf.mxu0 }
 0x599   : > { %v1809_v9 = vsel %vm1311_vm2, %v3716_v8, 0 }
 0x59a   : > { %1818 = vmatpush.bf16.xpose.msra.mxu3 %v1809_v9 }
 0x59c   : > { %v1607_v10 = vpop.f32.mrf.mxu3 }
 0x59d   : > { %v1611_v11 = vpack.c.bf16 %v1607_v10, %v1607_v10  ;;  %v3079_v10 = vld [vmem:[%s4037_s5] ss:$0 sm:$0xff] }
 0x59f   : > { %2809 = vmatmul.msk.bf16.vlgmr.msra.gmra.mxu2 %vm1311_vm2, %v1611_v11 }
 0x5a0   : > { %v1548_v14 = vpop.f32.mrf.mxu0 }
 0x5a1   : > { %v1552_v15 = vadd.f32 %v1548_v14, %v1468_v12 }
 0x5a4   : > { %v1609_v16 = vpop.f32.mrf.mxu3 }
 0x5a8   : > { %v1550_v17 = vpop.f32.mrf.mxu0 }
 0x5a9   : > { %v3737_v17 = vld [vmem:[%s4039_s29] ss:$0 sm:$0xff] }
 0x622   : > { %v1630_v19 = vpop.f32.mrf.mxu2 }
 0x623   : > { %v1634_v20 = vadd.f32 %v1630_v19, %v1552_v15 }
 0x625   : > { %v1639_v21 = vadd.f32 %v3075_v18, %v1634_v20 }
 0x627   : > { %v1640_v22 = vadd.f32 %v1639_v21, %v3578_v13  ;;  %v1648_v13 = vsub.f32 1.0, %v1647_v31  ;;  %v2971_v31 = vld [vmem:[%s4040_s2] sm:$0xff] }
 0x629   : > { %v1643_v23 = vsel %vm1268_vm1, %v1640_v22, 0.0  ;;  %v1649_v32 = vmul.f32 %v3105_v30, %v1648_v13 }
 0x62a   : > { %v1632_v24 = vpop.f32.mrf.mxu2  ;;  %1644 = vadd.xlane.f32.xlu2 %v1643_v23 }
 0x62b   : > { %v1650_v33 = vadd.f32 %v3105_v30, %v1649_v32 }
 0x62d   : > { %v3679_v34 = vsel %vm1651_vm6, %v3105_v30, %v1650_v33 }
 0x642   : > { %1682 = vperm.xlu2 %3072, %v1198_v26  }
 0x69d   : > { %v1645_v35 = vpop.xlane.xlu2 %1644 }
 0x69e   : > { %v1653_v36 = vmul.f32 %v3679_v34, %v1645_v35 }
 0x6a0   : > { %v1654_v37 = vsub.f32 %v1640_v22, %v1653_v36 }
 0x6a2   : > { %v1655_v38 = vmul.f32 %v1654_v37, %v1654_v37 }
 0x6a4   : > { %v1656_v39 = vsel %vm1268_vm1, %v1655_v38, 0.0 }
 0x6a5   : > { %1657 = vadd.xlane.f32.xlu0 %v1656_v39  ;;  %v3703_v0 = vpop.permute.xlu2 %1682 }
 0x6b9   : > { %1842 = vrot.lane.b32.xlu0 %v3716_v8, %s3225_s13 }
 0x718   : > { %v1658_v49 = vpop.xlane.xlu0 %1657 }
 0x719   : > { %v1659_v50 = vmul.f32 %v1658_v49, %v3679_v34 }
 0x71b   : > { %v1660_v51 = vadd.f32 1e-05, %v1659_v50 }
 0x71d   : > { %3106 = vrsqrt.f32 %v1660_v51  ;;  %vm1667_vm8 = vweird.f32 %v1660_v51 }
 0x723   : > { %v3107_v52 = vpop.eup %3106 }
 0x724   : > { %v1662_v53 = vmul.f32 %v3107_v52, %v1660_v51  ;;  %vm1668_vm7 = vweird.f32 %v3107_v52 }
 0x725   : > { %vm1669_vm9 = vmor %vm1667_vm8, %vm1668_vm7 }
 0x726   : > { %v1663_v54 = vmul.f32 %v3107_v52, %v1662_v53 }
 0x728   : > { %v1664_v55 = vmul.f32 0.5, %v1663_v54 }
 0x72a   : > { %v1665_v56 = vsub.f32 1.5, %v1664_v55 }
 0x72b   : > { %v1843_v16 = vpop.permute.xlu0 %1842 }
 0x72c   : > { %v1666_v57 = vmul.f32 %v3107_v52, %v1665_v56  ;;  %1855 = vmatpush.bf16.msrb.mxu2 %v1843_v16 }
 0x72e   : > { %v1670_v59 = vsel %vm1669_vm9, %v3107_v52, %v1666_v57 }
 0x72f   : > { %v1671_v60 = vmul.f32 %v1670_v59, %v1654_v37 }
 0x730   : > { %1958 = vmatpush.bf16.msra.mxu2 %v2971_v31  ;;  %v2973_v31 = vld [vmem:[%s4040_s2 + $0x10] sm:$0xff] }
 0x731   : > { %v1675_v63 = vmul.f32 %v3076_v58, %v1671_v60 }
 0x733   : > { %v1679_v1 = vadd.f32 %v3077_v61, %v1675_v63 }
 0x735   : > { %v3706_v2 = vmul.f32 %v3703_v0, %v1679_v1 }
 0x737   : > { %v1686_v3 = vpack.c.bf16 %v3706_v2, %v3706_v2 }
 0x739   : > { %2826 = vmatmul.msk.bf16.vlgmr.msra.gmra.mxu0 %vm1268_vm1, %v1686_v3 }
 0x7b6   : > { %v1735_v11 = vpop.f32.mrf.mxu0 }
 0x7b7   : > { %v1736_v12 = vadd.f32 %v3079_v10, %v1735_v11 }
 0x7b9   : > { %v1803_v14 = vpack.c.bf16 %v1736_v12, %v1736_v12 }
 0x7bb   : > { %1863 = vrot.lane.b32.xlu0 %v1803_v14, %s3224_s12  ;;  %2844 = vmatmul.msk.bf16.vlgmr.msra.gmra.mxu3 %vm1311_vm2, %v1803_v14 }
 0x7be   : > { %v1737_v15 = vpop.f32.mrf.mxu0 }
 0x7c3   : > { %2046 = vrot.lane.b32.xlu0 %v3716_v8, %s3229_s3 }
 0x7cb   : > { %1964 = vrot.lane.b32.xlu0 %v1803_v14, %s3228_s21 }
 0x82d   : > { %v1864_v30 = vpop.permute.xlu0 %1863 }
 0x835   : > { %v2047_v32 = vpop.permute.xlu0 %2046 }
 0x836   : > { %v2052_v39 = vsel %vm1311_vm2, %v2047_v32, 0 }
 0x83d   : > { %v1965_v40 = vpop.permute.xlu0 %1964 }
 0x83e   : > { %v1820_v18 = vpop.f32.mrf.mxu3 }
 0x83f   : > { %v1824_v19 = vmul.f32 0.25, %v1820_v18  ;;  %v2972_v18 = vld [vmem:[%s4040_s2 + $0x8] sm:$0xff] }
 0x840   : > { %1936 = vmatpush.bf16.msrb.mxu3 %v2972_v18  ;;  %v2981_v18 = vld [vmem:[%s3553_s26 + $0x10] sm:$0xff] }
 0x841   : > { %v1828_v20 = vadd.f32 %v3737_v17, %v1824_v19 }
 0x843   : > { %v1829_v21 = vsel %vm1311_vm2, %v1828_v20, -inf }
 0x844   : > { %1830 = vmax.xlane.f32.xlu1 %v1829_v21  ;;  %2037 = vmatpush.bf16.msra.mxu3 %v2973_v31 }
 0x846   : > { %v1822_v22 = vpop.f32.mrf.mxu3 }
 0x85d   : > { %1865 = vrot.lane.b32.xlu1 %v3716_v8, %s3224_s12  ;;  %s4051_s12 = sld [smem:[#allocation9_spill]] }
 0x863   : > { %p2921_p1 = scmp.ne.s32.totalorder %s4051_s12, 1 }
 0x865   : > { %2044 = vrot.lane.b32.xlu1 %v1803_v14, %s3229_s3 }
 0x8b7   : > { %v1831_v23 = vpop.xlane.xlu1 %1830 }
 0x8b8   : > { %v1832_v24 = vsub.f32 %v1828_v20, %v1831_v23 }
 0x8ba   : > { %v1833_v25 = vmul.f32 1.442695, %v1832_v24 }
 0x8bc   : > { %3108 = vpow2.f32 %v1833_v25 }
 0x8c2   : > { %v3109_v26 = vpop.eup %3108 }
 0x8c3   : > { %v1835_v27 = vsel %vm1311_vm2, %v3109_v26, 0.0 }
 0x8c4   : > { %1836 = vadd.xlane.f32.xlu2 %v1835_v27 }
 0x8cf   : > { %v1866_v28 = vpop.permute.xlu1 %1865 }
 0x8d0   : > { %v1871_v29 = vsel %vm1311_vm2, %v1866_v28, 0 }
 0x8d1   : > { %1880 = vmatpush.bf16.xpose.msrb.mxu0 %v1871_v29 }
 0x8d7   : > { %v2045_v57 = vpop.permute.xlu1 %2044 }
 0x8d8   : > { %2846 = vmatmul.msk.bf16.vlgmr.msrb.gmra.mxu0 %vm1311_vm2, %v1864_v30 }
 0x8dc   : > { %1966 = vrot.lane.b32.xlu2 %v3716_v8, %s3228_s21 }
 0x937   : > { %v1837_v13 = vpop.xlane.xlu2 %1836 }
 0x938   : > { %3110 = vrcp.f32 %v1837_v13 }
 0x93e   : > { %v3111_v33 = vpop.eup %3110 }
 0x93f   : > { %v1839_v35 = vmul.f32 %v3111_v33, %v3109_v26  ;;  %v1967_v36 = vpop.permute.xlu2 %1966 }
 0x940   : > { %v1972_v37 = vsel %vm1311_vm2, %v1967_v36, 0 }
 0x941   : > { %v1840_v38 = vpack.c.bf16 %v1839_v35, %v1839_v35  ;;  %1981 = vmatpush.bf16.xpose.msra.mxu0 %v1972_v37 }
 0x943   : > { %2845 = vmatmul.msk.bf16.vlgmr.msrb.gmra.mxu2 %vm1311_vm2, %v1840_v38 }
 0x944   : > { %2061 = vmatpush.bf16.xpose.msrb.mxu2 %v2052_v39 }
 0x948   : > { %2858 = vmatmul.msk.bf16.vlgmr.msra.gmra.mxu0 %vm1311_vm2, %v1965_v40 }
 0x955   : > { %v1882_v41 = vpop.f32.mrf.mxu0 }
 0x956   : > { %v1886_v42 = vmul.f32 0.25, %v1882_v41  ;;  %v2974_v41 = vld [vmem:[%s4040_s2 + $0x18] sm:$0xff] }
 0x958   : > { %v1887_v43 = vadd.f32 %v3737_v17, %v1886_v42 }
 0x95a   : > { %v1888_v44 = vsel %vm1311_vm2, %v1887_v43, -inf }
 0x95b   : > { %1889 = vmax.xlane.f32.xlu0 %v1888_v44 }
 0x95d   : > { %v1884_v45 = vpop.f32.mrf.mxu0 }
 0x9c5   : > { %v1983_v46 = vpop.f32.mrf.mxu0 }
 0x9c6   : > { %v1987_v47 = vmul.f32 0.25, %v1983_v46  ;;  %v1857_v48 = vpop.f32.mrf.mxu2 }
 0x9c7   : > { %v1861_v49 = vpack.c.bf16 %v1857_v48, %v1857_v48 }
 0x9c8   : > { %v1988_v50 = vadd.f32 %v3737_v17, %v1987_v47 }
 0x9c9   : > { %2857 = vmatmul.msk.bf16.vlgmr.msra.gmra.mxu2 %vm1311_vm2, %v1861_v49 }
 0x9ca   : > { %v1989_v51 = vsel %vm1311_vm2, %v1988_v50, -inf }
 0x9cb   : > { %1990 = vmax.xlane.f32.xlu1 %v1989_v51 }
 0x9cd   : > { %v1985_v52 = vpop.f32.mrf.mxu0 }
 0x9ce   : > { %v1859_v53 = vpop.f32.mrf.mxu2  ;;  %v1890_v54 = vpop.xlane.xlu0 %1889 }
 0x9cf   : > { %v1891_v55 = vsub.f32 %v1887_v43, %v1890_v54 }
 0x9d1   : > { %v1892_v56 = vmul.f32 1.442695, %v1891_v55 }
 0x9d3   : > { %3112 = vpow2.f32 %v1892_v56 }
 0x9d9   : > { %v3113_v58 = vpop.eup %3112  ;;  %2865 = vmatmul.msk.bf16.vlgmr.msrb.gmra.mxu2 %vm1311_vm2, %v2045_v57 }
 0x9da   : > { %v1894_v59 = vsel %vm1311_vm2, %v3113_v58, 0.0 }
 0x9db   : > { %1895 = vadd.xlane.f32.xlu0 %v1894_v59 }
 0x9e4   : > { %1900 = vrot.lane.b32.xlu1 %v3716_v8, %s3231_s27  ;;  %s4044_s27 = scalar_lea.vmem %s4043_s24, %s3449_s1 }
 0xa3e   : > { %v1991_v61 = vpop.xlane.xlu1 %1990 }
 0xa3f   : > { %v1992_v5 = vsub.f32 %v1988_v50, %v1991_v61  ;;  %v2978_v61 = vld [vmem:[%s3544_s8 + $0x18] sm:$0xff] }
 0xa41   : > { %v1993_v7 = vmul.f32 1.442695, %v1992_v5 }
 0xa4c   : > { %v3763_v60 = vpop.f32.mrf.mxu2 }
 0xa4e   : > { %v1896_v63 = vpop.xlane.xlu0 %1895 }
 0xa4f   : > { %3114 = vrcp.f32 %v1896_v63  ;;  %v2977_v63 = vld [vmem:[%s3544_s8 + $0x10] sm:$0xff] }
 0xa50   : > { %3116 = vpow2.f32 %v1993_v7  ;;  %v2984_v7 = vld [vmem:[%s3553_s26 + $0x28] sm:$0xff] }
 0xa54   : > { %v1962_v1 = vpop.f32.mrf.mxu2 }
 0xa55   : > { %v3115_v3 = vpop.eup %3114  ;;  %v2975_v1 = vld [vmem:[%s3544_s8] sm:$0xff] }
 0xa56   : > { %v1898_v4 = vmul.f32 %v3115_v3, %v3113_v58  ;;  %v1901_v62 = vpop.permute.xlu1 %1900  ;;  %v3117_v15 = vpop.eup %3116 }
 0xa57   : > { %1913 = vmatpush.bf16.msra.mxu1 %v1901_v62  ;;  %v1995_v16 = vsel %vm1311_vm2, %v3117_v15, 0.0  ;;  %v2986_v62 = vld [vmem:[%s3553_s26 + $0x38] sm:$0xff] }
 0xa58   : > { %v1899_v6 = vpack.c.bf16 %v1898_v4, %v1898_v4  ;;  %2286 = vmatpush.bf16.msra.mxu2 %v2986_v62 }
 0xa5a   : > { %2847 = vmatmul.msk.bf16.vlgmr.msra.gmra.mxu1 %vm1311_vm2, %v1899_v6  ;;  %v2985_v6 = vld [vmem:[%s3553_s26 + $0x30] sm:$0xff] }
 0xa5c   : > { %v2063_v9 = vpop.f32.mrf.mxu2  ;;  %2287 = vmatpush.bf16.msra.mxu2 %v2985_v6 }
 0xa5d   : > { %v2067_v10 = vmul.f32 0.25, %v2063_v9 }
 0xa5f   : > { %v2068_v11 = vadd.f32 %v3737_v17, %v2067_v10  ;;  %v2983_v10 = vld [vmem:[%s3553_s26 + $0x20] sm:$0xff] }
 0xa60   : > { %2288 = vmatpush.bf16.msra.mxu2 %v2984_v7 }
 0xa61   : > { %v2069_v12 = vsel %vm1311_vm2, %v2068_v11, -inf }
 0xa62   : > { %2070 = vmax.xlane.f32.xlu2 %v2069_v12 }
 0xa64   : > { %v2065_v14 = vpop.f32.mrf.mxu2  ;;  %2289 = vmatpush.bf16.msra.mxu2 %v2983_v10 }
 0xa65   : > { %v2982_v14 = vld [vmem:[%s3553_s26 + $0x18] sm:$0xff] }
 0xa68   : > { %2290 = vmatpush.bf16.msra.mxu2 %v2982_v14 }
 0xa6a   : > { %1996 = vadd.xlane.f32.xlu2 %v1995_v16 }
 0xa6c   : > { %2291 = vmatpush.bf16.msra.mxu2 %v2981_v18 }
 0xa82   : > { %2001 = vrot.lane.b32.xlu2 %v3716_v8, %s3226_s7 }
 0xad5   : > { %v2071_v19 = vpop.xlane.xlu2 %2070 }
 0xad6   : > { %v2072_v20 = vsub.f32 %v2068_v11, %v2071_v19 }
 0xad7   : > { %v1915_v21 = vpop.f32.mrf.mxu1 }
 0xad8   : > { %v2073_v22 = vmul.f32 1.442695, %v2072_v20  ;;  %v1919_v23 = vpack.c.bf16 %v1915_v21, %v1915_v21  ;;  %v3082_v20 = vld [vmem:[%s4044_s27] ss:$0 sm:$0xff] }
 0xada   : > { %3118 = vpow2.f32 %v2073_v22  ;;  %2852 = vmatmul.msk.bf16.vlgmr.msrb.gmra.mxu3 %vm1311_vm2, %v1919_v23  ;;  %v3083_v22 = vld [vmem:[%s4046_s9] ss:$0 sm:$0xff] }
 0xadb   : > { %2207 = vmatpush.bf16.msrb.mxu3 %v2978_v61 }
 0xadd   : > { %v1997_v17 = vpop.xlane.xlu2 %1996 }
 0xade   : > { %3120 = vrcp.f32 %v1997_v17 }
 0xadf   : > { %v1917_v24 = vpop.f32.mrf.mxu1  ;;  %2208 = vmatpush.bf16.msrb.mxu3 %v2977_v63 }
 0xae0   : > { %v3119_v25 = vpop.eup %3118 }
 0xae1   : > { %v2075_v26 = vsel %vm1311_vm2, %v3119_v25, 0.0 }
 0xae2   : > { %2076 = vadd.xlane.f32.xlu0 %v2075_v26 }
 0xae4   : > { %v3121_v27 = vpop.eup %3120 }
 0xae5   : > { %v1999_v28 = vmul.f32 %v3121_v27, %v3117_v15  ;;  %v2002_v29 = vpop.permute.xlu2 %2001  ;;  %v2980_v27 = vld [vmem:[%s3553_s26 + $0x8] sm:$0xff] }
 0xae6   : > { %2014 = vmatpush.bf16.msrb.mxu1 %v2002_v29  ;;  %2292 = vmatpush.bf16.msra.mxu2 %v2980_v27  ;;  %v3084_v29 = vld [vmem:[%s1174_s28] ss:$0 sm:$0xff] }
 0xae7   : > { %v2000_v30 = vpack.c.bf16 %v1999_v28, %v1999_v28  ;;  %v2979_v28 = vld [vmem:[%s3553_s26] sm:$0xff] }
 0xae9   : > { %2859 = vmatmul.msk.bf16.vlgmr.msrb.gmra.mxu1 %vm1311_vm2, %v2000_v30 }
 0xaea   : > { %2117 = vmatpush.bf16.msra.mxu1 %v2974_v41  ;;  %2293 = vmatpush.bf16.msra.mxu2 %v2979_v28 }
 0xaf6   : > { %2081 = vrot.lane.b32.xlu0 %v3716_v8, %s3227_s23  ;;  %s4041_s23 = sld [smem:[#allocation40_spill]] }
 0xafc   : > { %s4042_s21 = scalar_lea.vmem %s4041_s23, %s3449_s1 }
 0xafd   : > { %v3081_v49 = vld [vmem:[%s4042_s21] ss:$0 sm:$0xff] }
 0xb55   : > { %v2077_v13 = vpop.xlane.xlu0 %2076 }
 0xb56   : > { %3122 = vrcp.f32 %v2077_v13 }
 0xb5c   : > { %v3123_v33 = vpop.eup %3122 }
 0xb5d   : > { %v1938_v32 = vpop.f32.mrf.mxu3  ;;  %v2079_v36 = vmul.f32 %v3123_v33, %v3119_v25 }
 0xb5e   : > { %v1961_v44 = vadd.f32 %v3763_v60, %v1938_v32 }
 0xb5f   : > { %v2080_v40 = vpack.c.bf16 %v2079_v36, %v2079_v36 }
 0xb65   : > { %v1940_v35 = vpop.f32.mrf.mxu3 }
 0xb66   : > { %v2016_v37 = vpop.f32.mrf.mxu1  ;;  %v3085_v35 = vld [vmem:[%s1182_s18] ss:$0 sm:$0xff] }
 0xb67   : > { %v2020_v38 = vpack.c.bf16 %v2016_v37, %v2016_v37 }
 0xb68   : > { %v2082_v39 = vpop.permute.xlu0 %2081 }
 0xb69   : > { %2864 = vmatmul.msk.bf16.vlgmr.msra.gmra.mxu3 %vm1311_vm2, %v2020_v38  ;;  %2094 = vmatpush.bf16.msrb.mxu0 %v2082_v39 }
 0xb6c   : > { %2866 = vmatmul.msk.bf16.vlgmr.msrb.gmra.mxu0 %vm1311_vm2, %v2080_v40 }
 0xb6e   : > { %v2018_v8 = vpop.f32.mrf.mxu1 }
 0xbe9   : > { %v2096_v42 = vpop.f32.mrf.mxu0 }
 0xbea   : > { %v2100_v43 = vpack.c.bf16 %v2096_v42, %v2096_v42 }
 0xbec   : > { %v2039_v45 = vpop.f32.mrf.mxu3  ;;  %2871 = vmatmul.msk.bf16.vlgmr.msra.gmra.mxu1 %vm1311_vm2, %v2100_v43 }
 0xbed   : > { %v2043_v46 = vadd.f32 %v2039_v45, %v1961_v44 }
 0xbf1   : > { %v2098_v47 = vpop.f32.mrf.mxu0 }
 0xbf4   : > { %v2041_v48 = vpop.f32.mrf.mxu3 }
 0xc69   : > { %v2119_v50 = vpop.f32.mrf.mxu1 }
 0xc6a   : > { %v2123_v51 = vadd.f32 %v2119_v50, %v2043_v46 }
 0xc6c   : > { %v2128_v52 = vadd.f32 %v3081_v49, %v2123_v51 }
 0xc6e   : > { %v2129_v53 = vadd.f32 %v2128_v52, %v3706_v2  ;;  %v2976_v2 = vld [vmem:[%s3544_s8 + $0x8] sm:$0xff] }
 0xc6f   : > { %2209 = vmatpush.bf16.msrb.mxu3 %v2976_v2 }
 0xc70   : > { %v2132_v54 = vsel %vm1268_vm1, %v2129_v53, 0.0 }
 0xc71   : > { %v2121_v55 = vpop.f32.mrf.mxu1  ;;  %2133 = vadd.xlane.f32.xlu1 %v2132_v54  ;;  %v3086_v54 = vld [vmem:[%s1185_s19] ss:$0 sm:$0xff]  ;;  %s4052_s19 = sld [smem:[#allocation30_spill]] (!%p2921_p1) }
 0xc73   : > { %2210 = vmatpush.bf16.msrb.mxu3 %v2975_v1 }
 0xce4   : > { %v2134_v56 = vpop.xlane.xlu1 %2133 }
 0xce5   : > { %v2135_v57 = vmul.f32 %v2134_v56, %v3679_v34 }
 0xce7   : > { %v2136_v58 = vsub.f32 %v2129_v53, %v2135_v57 }
 0xce9   : > { %v2137_v59 = vmul.f32 %v2136_v58, %v2136_v58 }
 0xceb   : > { %v2138_v60 = vsel %vm1268_vm1, %v2137_v59, 0.0 }
 0xcec   : > { %2139 = vadd.xlane.f32.xlu0 %v2138_v60 }
 0xd5f   : > { %v2140_v3 = vpop.xlane.xlu0 %2139 }
 0xd60   : > { %v2141_v4 = vmul.f32 %v2140_v3, %v3679_v34 }
 0xd62   : > { %v2142_v5 = vadd.f32 1e-05, %v2141_v4 }
 0xd64   : > { %3124 = vrsqrt.f32 %v2142_v5  ;;  %vm2149_vm11 = vweird.f32 %v2142_v5 }
 0xd6a   : > { %v3125_v9 = vpop.eup %3124 }
 0xd6b   : > { %v2144_v11 = vmul.f32 %v3125_v9, %v2142_v5  ;;  %vm2150_vm10 = vweird.f32 %v3125_v9 }
 0xd6c   : > { %vm2151_vm12 = vmor %vm2149_vm11, %vm2150_vm10 }
 0xd6d   : > { %v2145_v12 = vmul.f32 %v3125_v9, %v2144_v11 }
 0xd6f   : > { %v2146_v15 = vmul.f32 0.5, %v2145_v12 }
 0xd71   : > { %v2147_v16 = vsub.f32 1.5, %v2146_v15 }
 0xd73   : > { %v2148_v19 = vmul.f32 %v3125_v9, %v2147_v16 }
 0xd75   : > { %v2152_v21 = vsel %vm2151_vm12, %v3125_v9, %v2148_v19 }
 0xd76   : > { %v2153_v23 = vmul.f32 %v2152_v21, %v2136_v58 }
 0xd78   : > { %v2157_v17 = vmul.f32 %v3082_v20, %v2153_v23 }
 0xd7a   : > { %v2161_v24 = vadd.f32 %v3083_v22, %v2157_v17 }
 0xd7c   : > { %v2162_v25 = vmul.f32 %v2161_v24, %v3703_v0 }
 0xd7e   : > { %v2163_v26 = vpack.c.bf16 %v2162_v25, %v2162_v25 }
 0xd80   : > { %2888 = vmatmul.msk.bf16.vlgmr.msrb.gmra.mxu3 %vm1268_vm1, %v2163_v26 }
 0xe03   : > { %v2212_v30 = vpop.f32.mrf.mxu3 }
 0xe04   : > { %v2213_v31 = vadd.f32 %v3084_v29, %v2212_v30 }
 0xe06   : > { %v2216_v13 = vmax.f32 %v2213_v31, 0.0 }
 0xe08   : > { %v2217_v32 = vpack.c.bf16 %v2216_v13, %v2216_v13 }
 0xe0a   : > { %2294 = vmatmul.bf16.vlgmr.msra.gmra.mxu2 %v2217_v32 }
 0xe0b   : > { %v2214_v33 = vpop.f32.mrf.mxu3 }
 0xe8d   : > { %v2295_v36 = vpop.f32.mrf.mxu2 }
 0xe8e   : > { %v2296_v37 = vadd.f32 %v3085_v35, %v2295_v36 }
 0xe90   : > { %v2299_v38 = vadd.f32 %v2296_v37, %v2162_v25 }
 0xe92   : > { %v2302_v39 = vsel %vm1268_vm1, %v2299_v38, 0.0 }
 0xe93   : > { %2303 = vadd.xlane.f32.xlu2 %v2302_v39 }
 0xe95   : > { %v2297_v40 = vpop.f32.mrf.mxu2 }
 0xf06   : > { %v2304_v8 = vpop.xlane.xlu2 %2303 }
 0xf07   : > { %v2305_v41 = vmul.f32 %v2304_v8, %v3679_v34 }
 0xf09   : > { %v2306_v42 = vsub.f32 %v2299_v38, %v2305_v41 }
 0xf0b   : > { %v2307_v43 = vmul.f32 %v2306_v42, %v2306_v42 }
 0xf0d   : > { %v2308_v44 = vsel %vm1268_vm1, %v2307_v43, 0.0 }
 0xf0e   : > { %2309 = vadd.xlane.f32.xlu1 %v2308_v44 }
 0xf81   : > { %v2310_v45 = vpop.xlane.xlu1 %2309 }
 0xf82   : > { %v2311_v46 = vmul.f32 %v2310_v45, %v3679_v34  ;;  %v3087_v34 = vld [vmem:[%s1188_s0] ss:$0 sm:$0xff] }
 0xf84   : > { %v2312_v47 = vadd.f32 1e-05, %v2311_v46 }
 0xf86   : > { %3126 = vrsqrt.f32 %v2312_v47  ;;  %vm2319_vm14 = vweird.f32 %v2312_v47 }
 0xf8c   : > { %v3127_v48 = vpop.eup %3126 }
 0xf8d   : > { %v2314_v49 = vmul.f32 %v3127_v48, %v2312_v47  ;;  %vm2320_vm13 = vweird.f32 %v3127_v48 }
 0xf8e   : > { %vm2321_vm15 = vmor %vm2319_vm14, %vm2320_vm13 }
 0xf8f   : > { %v2315_v50 = vmul.f32 %v3127_v48, %v2314_v49 }
 0xf91   : > { %v2316_v51 = vmul.f32 0.5, %v2315_v50 }
 0xf93   : > { %v2317_v52 = vsub.f32 1.5, %v2316_v51 }
 0xf95   : > { %v2318_v53 = vmul.f32 %v3127_v48, %v2317_v52 }
 0xf97   : > { %v2322_v55 = vsel %vm2321_vm15, %v3127_v48, %v2318_v53 }
 0xf98   : > { %v2323_v56 = vmul.f32 %v2322_v55, %v2306_v42 }
 0xf9a   : > { %v2327_v57 = vmul.f32 %v3086_v54, %v2323_v56 }
 0xf9c   : > { %v2331_v58 = vadd.f32 %v3087_v34, %v2327_v57  ;;  %2337 = sbr.rel (%p2921_p1) target bundleno = 4151 (0x1037), region = 132 }
 0xf9e   : > { %v2332_v59 = vmul.f32 %v2331_v58, %v3703_v0 }
 0xfa0   : > { %2333 = vst.msk [vmem:[#allocation2] sm:$0xff] %vm1268_vm1, %v2332_v59 }
 0xfa1   : > { %v2990_v60 = vld [vmem:[%s4052_s19 + $0x18] sm:$0xff]  ;;  %v2989_v61 = vld [vmem:[%s4052_s19 + $0x10] sm:$0xff]  ;;  %v2988_v0 = vld [vmem:[%s4052_s19 + $0x8] sm:$0xff]  ;;  %v2338_v2 = vpack.c.bf16 %v2332_v59, %v2332_v59 }
 0xfa2   : > { %2378 = vmatpush.bf16.msra.mxu0 %v2990_v60  ;;  %v2987_v63 = vld [vmem:[%s4052_s19] sm:$0xff] }
 0xfa6   : > { %2379 = vmatpush.bf16.msra.mxu0 %v2989_v61 }
 0xfaa   : > { %2380 = vmatpush.bf16.msra.mxu0 %v2988_v0 }
 0xfae   : > { %2381 = vmatpush.bf16.msra.mxu0 %v2987_v63 }
 0xfb1   : > { %2938 = vmatmul.msk.bf16.vlgmr.msra.gmra.mxu0 %vm1268_vm1, %v2338_v2 }
0x102e   : > { %v2383_v1 = vpop.f32.mrf.mxu0 }
0x102f   : > { %v2387_v3 = vmul.f32 0.125, %v2383_v1 }
0x1031   : > { %2388 = vst [vmem:[%s1094_s17] sm:$0xff] %v2387_v3 }
0x1036   : > { %v2385_v4 = vpop.f32.mrf.mxu0 }
0x1037 PF: > { %s4053_s27 = sld [smem:[#allocation10_spill]]  ;;  %s2402_s5 = sshll.u32 %s1094_s17, 4  ;;  %s2403_s5 = int_to_ptr.vmem [resolvable:$true] %s2402_s5 }
0x1038   : > { %s4054_s14 = sld [smem:[#allocation7_spill]] }
0x1039   : > { %s4056_s6 = sld [smem:[#allocation49_spill]] }
0x103d   : > { %s2940_s25 = sshll.u32 %s4053_s27, 3 }
0x103e   : > { %s4057_s20 = sand.u32 1, %s4054_s14  }
0x103f   : > { %s2400_s10 = scalar_lea.hbm %s4056_s6, %s2940_s25  ;;  %s2390_s18 = scalar_lea.sflag [#allocation4], %s4057_s20 }
0x1040   : > { %s2404_s13 = sshll.u32 %s2400_s10, 4  ;;  %s3148_s2 = scalar_lea.hbm %s4056_s6, 16  ;;  %s2405_s13 = int_to_ptr.hbm [resolvable:$true] %s2404_s13 }
0x1041   : > { %s3142_s26 = sshra.s32 %s2405_s13, 4  ;;  %s3143_s26 = int_to_ptr.hbm [resolvable:$true] %s3142_s26 }
0x1042   : > { %s3144_s28 = scalar_lea.hbm %s3143_s26, 8  ;;  %p3149_p6 = scmp.lt.s32.totalorder %s3143_s26, %s4056_s6 }
0x1043   : > { %p3145_p2 = scmp.ne.s32.totalorder %s3143_s26, %s3144_s28  ;;  %p3150_p7 = scmp.lt.s32.totalorder %s3148_s2, %s3144_s28 }
0x1045   : > { %p3146_p4 = pnand %p3145_p2, %p3418_p3  ;;  %p3151_p8 = por %p3150_p7, %p3149_p6 }
0x1047   : > { %p3147_p5 = pneg %p3146_p4 }
0x1049   : > { %p3152_p10 = pnand %p3151_p8, %p3147_p5 }
0x104b   : > { %3155 = shalt.err (!%p3152_p10)
}
0x104c   : > { %2991 = dma.vmem_to_hbm [thread:$0]  (%p3418_p3), %s2403_s5, 128, %s2405_s13, %s2390_s18  }
0x104d PF: > { %s4058_s17 = sld [smem:[#allocation13_spill]] }
0x104e   : > { %s4059_s4 = sld [smem:[#allocation6_spill]] }
0x1053   : > { %p2997_p11 = scmp.ge.s32.totalorder %s4058_s17, 2 }
0x1054   : > { %s2416_s21 = sand.u32 1, %s4059_s4  }
0x1055   : > { %p2994_p12 = pnand %p2997_p11, %p3428_p9  ;;  %s2417_s8 = scalar_lea.sflag [#allocation4], %s2416_s21 }
0x1057   : > { %p2995_p13 = pneg %p2994_p12 }
0x1059   : > { %3189 = dma.done.wait (%p2995_p13), %s2417_s8, 128  }
0x105a   : > { %3191 = vsyncadd (%p2995_p13), %s2417_s8, 4294967168  ;;  %s39_s0 = sadd.s32 1, %s4058_s17   ;;  %s4061_s27 = sld [smem:[#allocation7_spill]] }
0x105b   : > { %p36_p0 = scmp.ge.s32.totalorder %s39_s0, 6   ;;  %s4062_s3 = sld [smem:[#allocation8_spill]] }
0x105c   : > { %s4063_s7 = sld [smem:[#allocation18_spill]] }
0x105d   : > { %s4064_s28 = sld [smem:[#allocation11_spill]]  ;;  %38 = sbr.rel (!%p36_p0) target bundleno = 31 (0x1f), region = 239 }
0x105e   : > { %s4065_s8 = sld [smem:[#allocation12_spill]] }
0x105f   : > { %s4066_s4 = sld [smem:[#allocation14_spill]] }
0x1060   : > { %s4067_s29 = sld [smem:[#allocation16_spill]] }
0x1062   :  { %2423 = vsyncpa [#allocation4], 1 }
0x1063   :  { %2425 = vsyncpa [#allocation4 + $0x1], 1 }

</bundles_post_ra>
